<compile_context>
chip_gen: v7x
topology: tpu7x:2x2x1
jax: 0.10.0
libtpu: 0.0.40
codegen_flags: <defaults>
</compile_context>

<pallas_src>
import math
import functools

import jax
import jax.numpy as jnp
from jax import lax
from jax.experimental import pallas as pl
from jax.experimental.pallas import tpu as pltpu

# ------------------------- synthetic hyper-parameters -------------------------
VOCAB = 100
PAD = 0                       # extractor.pad
EMBED_DIM = 32                # extractor.embeddings.shape[1]
NUM_HEADS = 4                 # config['numattheads']
HEAD_DIM = EMBED_DIM // NUM_HEADS
FF_DIM = 64                   # config['ffdim']
NUM_LAYERS = 1                # config['numlayers']
MAX_QLEN = 8                  # extractor.config['maxqlen']
MAX_DOCLEN = 16               # extractor.config['maxdoclen']
BATCH = 2
MIXER = 0.9                   # nn.Parameter full([1,1,1], 0.9); usemixer=True
SIGMA = 0.1
MUS = (-0.9, -0.7, -0.5, -0.3, -0.1, 0.1, 0.3, 0.5, 0.7, 0.9, 1.0)
K_KERNELS = len(MUS)
MAX_LEN_PE = 512

NEG_BIG = -1e30               # finite stand-in for the reference's additive -inf mask
LAYER_PARAM_NAMES = ("w_in", "b_in", "w_out", "b_out", "w_ff1", "b_ff1",
                     "w_ff2", "b_ff2", "ln1_g", "ln1_b", "ln2_g", "ln2_b")


# ------------------------------ in-kernel helpers ------------------------------
def _layer_norm(x, g, b, eps=1e-5):
    mu = jnp.mean(x, axis=-1, keepdims=True)
    xc = x - mu
    var = jnp.mean(xc * xc, axis=-1, keepdims=True)
    return xc * lax.rsqrt(var + eps) * g + b


# ------------------------------ fused Pallas kernel -----------------------------
def _tk_fused_kernel(emb_ref, pe_ref, attn_mask_ref, cos_mask_ref,
                     w_slog_ref, w_slen_ref, w_comb_ref, *rest,
                     batch, qlen, doclen):
    """All rows (B*(Lq+Ld), E) contextualized together; block-diag mask keeps
    per-sequence self-attention semantics. Then per-example cosine + RBF pooling."""
    layer_flat, out_ref = rest[:-1], rest[-1]
    n = len(LAYER_PARAM_NAMES)
    layers = [dict(zip(LAYER_PARAM_NAMES, layer_flat[i:i + n]))
              for i in range(0, len(layer_flat), n)]

    seg = qlen + doclen
    x_emb = emb_ref[...]                      # (N, E) raw embeddings
    x = x_emb + pe_ref[...]                   # positional encoding (eval: no dropout)
    mask = attn_mask_ref[...]                 # (N, N) {0,1}: same-block AND both valid
    scale = jnp.float32(HEAD_DIM ** -0.5)

    # ---- TransformerEncoder (post-norm, relu, dropout=0), all sequences at once ----
    for lw in layers:
        qkv = jnp.dot(x, lw["w_in"][...],
                      preferred_element_type=jnp.float32) + lw["b_in"][...]   # (N, 3E)
        ctx_heads = []
        for h in range(NUM_HEADS):            # unrolled; static lane slices
            lo = h * HEAD_DIM
            qh = qkv[:, lo:lo + HEAD_DIM] * scale
            kh = qkv[:, EMBED_DIM + lo:EMBED_DIM + lo + HEAD_DIM]
            vh = qkv[:, 2 * EMBED_DIM + lo:2 * EMBED_DIM + lo + HEAD_DIM]
            s = lax.dot_general(qh, kh, (((1,), (1,)), ((), ())),
                                preferred_element_type=jnp.float32)           # (N, N)
            # Reference's additive -inf mask as a finite select (NaN-safe).
            s = jnp.where(mask > 0.0, s, jnp.float32(NEG_BIG))
            s = s - jnp.max(s, axis=-1, keepdims=True)
            p = jnp.exp(s)
            p = p * pl.reciprocal(jnp.sum(p, axis=-1, keepdims=True), approx=True)
            ctx_heads.append(jnp.dot(p, vh, preferred_element_type=jnp.float32))
        ctx = jnp.concatenate(ctx_heads, axis=-1)                             # (N, E)
        attn = jnp.dot(ctx, lw["w_out"][...],
                       preferred_element_type=jnp.float32) + lw["b_out"][...]
        x = _layer_norm(x + attn, lw["ln1_g"][...], lw["ln1_b"][...])
        ff = jnp.dot(x, lw["w_ff1"][...],
                     preferred_element_type=jnp.float32) + lw["b_ff1"][...]
        ff = jnp.maximum(ff, 0.0)
        ff = jnp.dot(ff, lw["w_ff2"][...],
                     preferred_element_type=jnp.float32) + lw["b_ff2"][...]
        x = _layer_norm(x + ff, lw["ln2_g"][...], lw["ln2_b"][...])

    # ---- embedding mixer (usemixer=True) + row-normalisation for cosine ----
    mixed = jnp.float32(MIXER) * x_emb + jnp.float32(1.0 - MIXER) * x         # (N, E)
    nrm = mixed * lax.rsqrt(jnp.sum(mixed * mixed, axis=-1, keepdims=True) + 1e-12)

    inv_two_sigma_sq = jnp.float32(0.5 / (SIGMA * SIGMA))
    w_slog = w_slog_ref[...]                  # (1, K)
    w_slen = w_slen_ref[...]                  # (1, K)
    w_comb = w_comb_ref[...]                  # (1, 2)

    # ---- per-example masked cosine + 11-mu RBF kernel pooling + output linears ----
    # TODO(synk): StackedSimilarityMatrix source was not provided; implemented as the
    # standard capreolus masked cosine similarity (pad query/doc positions zeroed).
    scores = []
    for b in range(batch):                    # B=2: unrolled, static 8-aligned row slices
        r0 = b * seg
        qn = nrm[r0:r0 + qlen]                # (Lq, E)
        dn = nrm[r0 + qlen:r0 + seg]          # (Ld, E)
        sim = lax.dot_general(qn, dn, (((1,), (1,)), ((), ())),
                              preferred_element_type=jnp.float32)             # (Lq, Ld)
        sim = jnp.where(cos_mask_ref[b] > 0.0, sim, 0.0)

        cond_cols = []
        for mu in MUS:                        # unrolled at trace time
            # exactly as in TK_class.forward: exp(-(cos - mu)^2) / (2 * sigma^2)
            km = jnp.exp(-jnp.square(sim - jnp.float32(mu))) * inv_two_sigma_sq
            cond_cols.append(jnp.sum(km, axis=1, keepdims=True))              # (Lq, 1)
        condensed = jnp.concatenate(cond_cols, axis=1)                        # (Lq, K)

        s_log_k = jnp.sum(jnp.log2(condensed), axis=0, keepdims=True)         # (1, K)
        s_len_k = jnp.sum(condensed, axis=0, keepdims=True) * jnp.float32(1.0 / doclen)
        s_log = jnp.sum(s_log_k * w_slog, axis=1, keepdims=True)              # (1, 1)
        s_len = jnp.sum(s_len_k * w_slen, axis=1, keepdims=True)              # (1, 1)
        scores.append(w_comb[:, 0:1] * s_log + w_comb[:, 1:2] * s_len)        # (1, 1)

    out_ref[...] = jnp.concatenate(scores, axis=0)                            # (B, 1)


# ------------------------------ JAX wrapper (model) -----------------------------
def tk_forward(params, doctoks, querytoks, query_idf, pe):
    del query_idf                                   # unused in TK_class.forward
    B, Ld = doctoks.shape
    Lq = querytoks.shape[1]
    seg = Lq + Ld
    N = B * seg
    E = params["emb"].shape[1]

    q_emb = params["emb"][querytoks]                # (B, Lq, E) embedding lookup (XLA gather)
    d_emb = params["emb"][doctoks]                  # (B, Ld, E)
    emb_all = jnp.concatenate([q_emb, d_emb], axis=1).reshape(N, E)   # rows: [q_b ; d_b] per b

    pe_seg = jnp.concatenate([pe[:Lq], pe[:Ld]], axis=0)              # (seg, E)
    pe_all = jnp.tile(pe_seg, (B, 1))                                  # (N, E)

    # Token validity == reference's "embedding row is all-zero" check (pad row is zero).
    qv = (querytoks != PAD).astype(jnp.float32)     # (B, Lq)
    dv = (doctoks != PAD).astype(jnp.float32)       # (B, Ld)
    valid_all = jnp.concatenate([qv, dv], axis=1).reshape(N)          # (N,)

    # Block-diagonal attention mask: same (batch, segment) block AND both tokens valid.
    # NOTE: reference builds a (B*H, L, L) additive -inf mask; this is the equivalent
    # multiplicative mask shared by all heads, built once per batch of sequences.
    row = jnp.arange(N, dtype=jnp.int32)
    seg_id = 2 * (row // seg) + (row % seg >= Lq).astype(jnp.int32)
    attn_mask = ((seg_id[:, None] == seg_id[None, :]).astype(jnp.float32)
                 * valid_all[:, None] * valid_all[None, :])           # (N, N)

    cos_mask = qv[:, :, None] * dv[:, None, :]                        # (B, Lq, Ld)

    args = [emb_all, pe_all, attn_mask, cos_mask,
            params["w_slog"], params["w_slen"], params["w_comb"]]
    for lp in params["layers"]:
        args += [lp["w_in"], lp["b_in"].reshape(1, -1),
                 lp["w_out"], lp["b_out"].reshape(1, -1),
                 lp["w_ff1"], lp["b_ff1"].reshape(1, -1),
                 lp["w_ff2"], lp["b_ff2"].reshape(1, -1),
                 lp["ln1_g"].reshape(1, -1), lp["ln1_b"].reshape(1, -1),
                 lp["ln2_g"].reshape(1, -1), lp["ln2_b"].reshape(1, -1)]

    kernel = functools.partial(_tk_fused_kernel, batch=B, qlen=Lq, doclen=Ld)
    out = pl.pallas_call(
        kernel,
        out_shape=jax.ShapeDtypeStruct((B, 1), jnp.float32),
        # No grid: everything (a few tens of KiB) lives in VMEM for one invocation.
        in_specs=[pl.BlockSpec(memory_space=pltpu.MemorySpace.VMEM)] * len(args),
        out_specs=pl.BlockSpec(memory_space=pltpu.MemorySpace.VMEM),
    )(*args)
    return out                                       # (B, 1)


# ------------------------------ deterministic init ------------------------------
def make_positional_encoding(max_len, d_model):
    position = jnp.arange(max_len, dtype=jnp.float32)[:, None]
    div_term = jnp.exp(jnp.arange(0, d_model, 2, dtype=jnp.float32)
                       * (-math.log(10000.0) / d_model))
    pe = jnp.zeros((max_len, d_model), jnp.float32)
    pe = pe.at[:, 0::2].set(jnp.sin(position * div_term))
    pe = pe.at[:, 1::2].set(jnp.cos(position * div_term))
    return pe                                        # (max_len, E)


def init_params(key):
    ks = jax.random.split(key, 8)

    def unif(k, shape, a):
        return jax.random.uniform(k, shape, jnp.float32, minval=-a, maxval=a)

    emb = (jax.random.normal(ks[0], (VOCAB, EMBED_DIM), jnp.float32) * 0.5).at[PAD].set(0.0)

    layers = []
    for lk in jax.random.split(ks[1], NUM_LAYERS):
        k1, k2, k3, k4, k5, k6, k7, k8 = jax.random.split(lk, 8)
        s_e = 1.0 / math.sqrt(EMBED_DIM)
        s_f = 1.0 / math.sqrt(FF_DIM)
        layers.append(dict(
            w_in=unif(k1, (EMBED_DIM, 3 * EMBED_DIM), s_e),
            b_in=unif(k2, (3 * EMBED_DIM,), s_e),
            w_out=unif(k3, (EMBED_DIM, EMBED_DIM), s_e),
            b_out=unif(k4, (EMBED_DIM,), s_e),
            w_ff1=unif(k5, (EMBED_DIM, FF_DIM), s_e),
            b_ff1=unif(k6, (FF_DIM,), s_e),
            w_ff2=unif(k7, (FF_DIM, EMBED_DIM), s_f),
            b_ff2=unif(k8, (EMBED_DIM,), s_f),
            ln1_g=jnp.ones((EMBED_DIM,), jnp.float32),
            ln1_b=jnp.zeros((EMBED_DIM,), jnp.float32),
            ln2_g=jnp.ones((EMBED_DIM,), jnp.float32),
            ln2_b=jnp.zeros((EMBED_DIM,), jnp.float32),
        ))

    return dict(
        emb=emb,
        layers=layers,
        w_slog=unif(ks[2], (1, K_KERNELS), 0.014),
        w_slen=unif(ks[3], (1, K_KERNELS), 0.014),
        w_comb=unif(ks[4], (1, 2), 0.014),
    )


# ------------------------------------ main ---------------------------------------
if __name__ == "__main__":
    key = jax.random.PRNGKey(0)
    pkey, dkey, qkey, ikey = jax.random.split(key, 4)

    params = init_params(pkey)
    pe = make_positional_encoding(MAX_LEN_PE, EMBED_DIM)

    # token ids in [1, VOCAB) -> no pad tokens (full-length query/doc)
    doctoks = jax.random.randint(dkey, (BATCH, MAX_DOCLEN), 1, VOCAB, dtype=jnp.int32)
    querytoks = jax.random.randint(qkey, (BATCH, MAX_QLEN), 1, VOCAB, dtype=jnp.int32)
    query_idf = jax.random.uniform(ikey, (BATCH, MAX_QLEN), jnp.float32)

    fwd = jax.jit(functools.partial(tk_forward, pe=pe))
    score = fwd(params, doctoks, querytoks, query_idf)
    score = jax.block_until_ready(score)

    assert score.shape == (BATCH, 1)
    assert bool(jnp.all(jnp.isfinite(score)))
    print("KERNEL_OK")
</pallas_src>

<mosaic_0001>
module attributes {stable_mosaic.version = 11 : i64} {
  func.func @_tk_fused_kernel(%arg0: memref<48x32xf32, #tpu.memory_space<vmem>>, %arg1: memref<48x32xf32, #tpu.memory_space<vmem>>, %arg2: memref<48x48xf32, #tpu.memory_space<vmem>>, %arg3: memref<2x8x16xf32, #tpu.memory_space<vmem>>, %arg4: memref<1x11xf32, #tpu.memory_space<vmem>>, %arg5: memref<1x11xf32, #tpu.memory_space<vmem>>, %arg6: memref<1x2xf32, #tpu.memory_space<vmem>>, %arg7: memref<32x96xf32, #tpu.memory_space<vmem>>, %arg8: memref<1x96xf32, #tpu.memory_space<vmem>>, %arg9: memref<32x32xf32, #tpu.memory_space<vmem>>, %arg10: memref<1x32xf32, #tpu.memory_space<vmem>>, %arg11: memref<32x64xf32, #tpu.memory_space<vmem>>, %arg12: memref<1x64xf32, #tpu.memory_space<vmem>>, %arg13: memref<64x32xf32, #tpu.memory_space<vmem>>, %arg14: memref<1x32xf32, #tpu.memory_space<vmem>>, %arg15: memref<1x32xf32, #tpu.memory_space<vmem>>, %arg16: memref<1x32xf32, #tpu.memory_space<vmem>>, %arg17: memref<1x32xf32, #tpu.memory_space<vmem>>, %arg18: memref<1x32xf32, #tpu.memory_space<vmem>>, %arg19: memref<2x1xf32, #tpu.memory_space<vmem>>) attributes {dimension_semantics = [], scalar_prefetch = 0 : i64, scratch_operands = 0 : i64, tpu.core_type = #tpu.core_type<tc>} {
    %c0 = arith.constant 0 : index
    %c0_0 = arith.constant 0 : index
    %0 = vector.load %arg0[%c0, %c0_0] : memref<48x32xf32, #tpu.memory_space<vmem>>, vector<48x32xf32>
    %c0_1 = arith.constant 0 : index
    %c0_2 = arith.constant 0 : index
    %1 = vector.load %arg1[%c0_1, %c0_2] : memref<48x32xf32, #tpu.memory_space<vmem>>, vector<48x32xf32>
    %2 = arith.addf %0, %1 : vector<48x32xf32>
    %c0_3 = arith.constant 0 : index
    %c0_4 = arith.constant 0 : index
    %3 = vector.load %arg2[%c0_3, %c0_4] : memref<48x48xf32, #tpu.memory_space<vmem>>, vector<48x48xf32>
    %c0_5 = arith.constant 0 : index
    %c0_6 = arith.constant 0 : index
    %4 = vector.load %arg7[%c0_5, %c0_6] : memref<32x96xf32, #tpu.memory_space<vmem>>, vector<32x96xf32>
    %cst = arith.constant dense<0.000000e+00> : vector<48x96xf32>
    %5 = tpu.matmul %2, %4, %cst {dimension_numbers = #tpu.dot_dimension_numbers<[1], [0], [0], [1], [0, 0, 1, 1], [], []>} : vector<48x32xf32>, vector<32x96xf32>, vector<48x96xf32> -> vector<48x96xf32>
    %c0_7 = arith.constant 0 : index
    %c0_8 = arith.constant 0 : index
    %6 = vector.load %arg8[%c0_7, %c0_8] : memref<1x96xf32, #tpu.memory_space<vmem>>, vector<1x96xf32>
    %7 = vector.broadcast %6 : vector<1x96xf32> to vector<48x96xf32>
    %8 = arith.addf %5, %7 : vector<48x96xf32>
    %9 = vector.extract_strided_slice %8 {offsets = [0, 0], sizes = [48, 8], strides = [1, 1]} : vector<48x96xf32> to vector<48x8xf32>
    %cst_9 = arith.constant 0.353553385 : f32
    %10 = vector.broadcast %cst_9 : f32 to vector<48x8xf32>
    %11 = arith.mulf %9, %10 : vector<48x8xf32>
    %12 = vector.extract_strided_slice %8 {offsets = [0, 32], sizes = [48, 8], strides = [1, 1]} : vector<48x96xf32> to vector<48x8xf32>
    %13 = vector.extract_strided_slice %8 {offsets = [0, 64], sizes = [48, 8], strides = [1, 1]} : vector<48x96xf32> to vector<48x8xf32>
    %cst_10 = arith.constant dense<0.000000e+00> : vector<48x48xf32>
    %14 = tpu.matmul %11, %12, %cst_10 {dimension_numbers = #tpu.dot_dimension_numbers<[1], [1], [0], [0], [0, 0, 1, 0], [], []>} : vector<48x8xf32>, vector<48x8xf32>, vector<48x48xf32> -> vector<48x48xf32>
    %cst_11 = arith.constant 0.000000e+00 : f32
    %15 = vector.broadcast %cst_11 : f32 to vector<48x48xf32>
    %16 = arith.cmpf ogt, %3, %15 : vector<48x48xf32>
    %cst_12 = arith.constant -1.000000e+30 : f32
    %17 = vector.broadcast %cst_12 : f32 to vector<48x48xf32>
    %18 = arith.select %16, %14, %17 : vector<48x48xi1>, vector<48x48xf32>
    %cst_13 = arith.constant dense<0xFF800000> : vector<48xf32>
    %19 = vector.multi_reduction <maximumf>, %18, %cst_13 [1] : vector<48x48xf32> to vector<48xf32>
    %20 = vector.shape_cast %19 : vector<48xf32> to vector<48x1xf32>
    %21 = vector.broadcast %20 : vector<48x1xf32> to vector<48x48xf32>
    %22 = arith.subf %18, %21 : vector<48x48xf32>
    %23 = math.exp %22 : vector<48x48xf32>
    %cst_14 = arith.constant dense<0.000000e+00> : vector<48xf32>
    %24 = vector.multi_reduction <add>, %23, %cst_14 [1] : vector<48x48xf32> to vector<48xf32>
    %25 = vector.shape_cast %24 : vector<48xf32> to vector<48x1xf32>
    %26 = tpu.reciprocal %25 {approx = true} : vector<48x1xf32> -> vector<48x1xf32>
    %27 = vector.broadcast %26 : vector<48x1xf32> to vector<48x48xf32>
    %28 = arith.mulf %23, %27 : vector<48x48xf32>
    %cst_15 = arith.constant dense<0.000000e+00> : vector<48x8xf32>
    %29 = tpu.matmul %28, %13, %cst_15 {dimension_numbers = #tpu.dot_dimension_numbers<[1], [0], [0], [1], [0, 0, 1, 1], [], []>} : vector<48x48xf32>, vector<48x8xf32>, vector<48x8xf32> -> vector<48x8xf32>
    %30 = vector.extract_strided_slice %8 {offsets = [0, 8], sizes = [48, 8], strides = [1, 1]} : vector<48x96xf32> to vector<48x8xf32>
    %cst_16 = arith.constant 0.353553385 : f32
    %31 = vector.broadcast %cst_16 : f32 to vector<48x8xf32>
    %32 = arith.mulf %30, %31 : vector<48x8xf32>
    %33 = vector.extract_strided_slice %8 {offsets = [0, 40], sizes = [48, 8], strides = [1, 1]} : vector<48x96xf32> to vector<48x8xf32>
    %34 = vector.extract_strided_slice %8 {offsets = [0, 72], sizes = [48, 8], strides = [1, 1]} : vector<48x96xf32> to vector<48x8xf32>
    %cst_17 = arith.constant dense<0.000000e+00> : vector<48x48xf32>
    %35 = tpu.matmul %32, %33, %cst_17 {dimension_numbers = #tpu.dot_dimension_numbers<[1], [1], [0], [0], [0, 0, 1, 0], [], []>} : vector<48x8xf32>, vector<48x8xf32>, vector<48x48xf32> -> vector<48x48xf32>
    %cst_18 = arith.constant 0.000000e+00 : f32
    %36 = vector.broadcast %cst_18 : f32 to vector<48x48xf32>
    %37 = arith.cmpf ogt, %3, %36 : vector<48x48xf32>
    %cst_19 = arith.constant -1.000000e+30 : f32
    %38 = vector.broadcast %cst_19 : f32 to vector<48x48xf32>
    %39 = arith.select %37, %35, %38 : vector<48x48xi1>, vector<48x48xf32>
    %cst_20 = arith.constant dense<0xFF800000> : vector<48xf32>
    %40 = vector.multi_reduction <maximumf>, %39, %cst_20 [1] : vector<48x48xf32> to vector<48xf32>
    %41 = vector.shape_cast %40 : vector<48xf32> to vector<48x1xf32>
    %42 = vector.broadcast %41 : vector<48x1xf32> to vector<48x48xf32>
    %43 = arith.subf %39, %42 : vector<48x48xf32>
    %44 = math.exp %43 : vector<48x48xf32>
    %cst_21 = arith.constant dense<0.000000e+00> : vector<48xf32>
    %45 = vector.multi_reduction <add>, %44, %cst_21 [1] : vector<48x48xf32> to vector<48xf32>
    %46 = vector.shape_cast %45 : vector<48xf32> to vector<48x1xf32>
    %47 = tpu.reciprocal %46 {approx = true} : vector<48x1xf32> -> vector<48x1xf32>
    %48 = vector.broadcast %47 : vector<48x1xf32> to vector<48x48xf32>
    %49 = arith.mulf %44, %48 : vector<48x48xf32>
    %cst_22 = arith.constant dense<0.000000e+00> : vector<48x8xf32>
    %50 = tpu.matmul %49, %34, %cst_22 {dimension_numbers = #tpu.dot_dimension_numbers<[1], [0], [0], [1], [0, 0, 1, 1], [], []>} : vector<48x48xf32>, vector<48x8xf32>, vector<48x8xf32> -> vector<48x8xf32>
    %51 = vector.extract_strided_slice %8 {offsets = [0, 16], sizes = [48, 8], strides = [1, 1]} : vector<48x96xf32> to vector<48x8xf32>
    %cst_23 = arith.constant 0.353553385 : f32
    %52 = vector.broadcast %cst_23 : f32 to vector<48x8xf32>
    %53 = arith.mulf %51, %52 : vector<48x8xf32>
    %54 = vector.extract_strided_slice %8 {offsets = [0, 48], sizes = [48, 8], strides = [1, 1]} : vector<48x96xf32> to vector<48x8xf32>
    %55 = vector.extract_strided_slice %8 {offsets = [0, 80], sizes = [48, 8], strides = [1, 1]} : vector<48x96xf32> to vector<48x8xf32>
    %cst_24 = arith.constant dense<0.000000e+00> : vector<48x48xf32>
    %56 = tpu.matmul %53, %54, %cst_24 {dimension_numbers = #tpu.dot_dimension_numbers<[1], [1], [0], [0], [0, 0, 1, 0], [], []>} : vector<48x8xf32>, vector<48x8xf32>, vector<48x48xf32> -> vector<48x48xf32>
    %cst_25 = arith.constant 0.000000e+00 : f32
    %57 = vector.broadcast %cst_25 : f32 to vector<48x48xf32>
    %58 = arith.cmpf ogt, %3, %57 : vector<48x48xf32>
    %cst_26 = arith.constant -1.000000e+30 : f32
    %59 = vector.broadcast %cst_26 : f32 to vector<48x48xf32>
    %60 = arith.select %58, %56, %59 : vector<48x48xi1>, vector<48x48xf32>
    %cst_27 = arith.constant dense<0xFF800000> : vector<48xf32>
    %61 = vector.multi_reduction <maximumf>, %60, %cst_27 [1] : vector<48x48xf32> to vector<48xf32>
    %62 = vector.shape_cast %61 : vector<48xf32> to vector<48x1xf32>
    %63 = vector.broadcast %62 : vector<48x1xf32> to vector<48x48xf32>
    %64 = arith.subf %60, %63 : vector<48x48xf32>
    %65 = math.exp %64 : vector<48x48xf32>
    %cst_28 = arith.constant dense<0.000000e+00> : vector<48xf32>
    %66 = vector.multi_reduction <add>, %65, %cst_28 [1] : vector<48x48xf32> to vector<48xf32>
    %67 = vector.shape_cast %66 : vector<48xf32> to vector<48x1xf32>
    %68 = tpu.reciprocal %67 {approx = true} : vector<48x1xf32> -> vector<48x1xf32>
    %69 = vector.broadcast %68 : vector<48x1xf32> to vector<48x48xf32>
    %70 = arith.mulf %65, %69 : vector<48x48xf32>
    %cst_29 = arith.constant dense<0.000000e+00> : vector<48x8xf32>
    %71 = tpu.matmul %70, %55, %cst_29 {dimension_numbers = #tpu.dot_dimension_numbers<[1], [0], [0], [1], [0, 0, 1, 1], [], []>} : vector<48x48xf32>, vector<48x8xf32>, vector<48x8xf32> -> vector<48x8xf32>
    %72 = vector.extract_strided_slice %8 {offsets = [0, 24], sizes = [48, 8], strides = [1, 1]} : vector<48x96xf32> to vector<48x8xf32>
    %cst_30 = arith.constant 0.353553385 : f32
    %73 = vector.broadcast %cst_30 : f32 to vector<48x8xf32>
    %74 = arith.mulf %72, %73 : vector<48x8xf32>
    %75 = vector.extract_strided_slice %8 {offsets = [0, 56], sizes = [48, 8], strides = [1, 1]} : vector<48x96xf32> to vector<48x8xf32>
    %76 = vector.extract_strided_slice %8 {offsets = [0, 88], sizes = [48, 8], strides = [1, 1]} : vector<48x96xf32> to vector<48x8xf32>
    %cst_31 = arith.constant dense<0.000000e+00> : vector<48x48xf32>
    %77 = tpu.matmul %74, %75, %cst_31 {dimension_numbers = #tpu.dot_dimension_numbers<[1], [1], [0], [0], [0, 0, 1, 0], [], []>} : vector<48x8xf32>, vector<48x8xf32>, vector<48x48xf32> -> vector<48x48xf32>
    %cst_32 = arith.constant 0.000000e+00 : f32
    %78 = vector.broadcast %cst_32 : f32 to vector<48x48xf32>
    %79 = arith.cmpf ogt, %3, %78 : vector<48x48xf32>
    %cst_33 = arith.constant -1.000000e+30 : f32
    %80 = vector.broadcast %cst_33 : f32 to vector<48x48xf32>
    %81 = arith.select %79, %77, %80 : vector<48x48xi1>, vector<48x48xf32>
    %cst_34 = arith.constant dense<0xFF800000> : vector<48xf32>
    %82 = vector.multi_reduction <maximumf>, %81, %cst_34 [1] : vector<48x48xf32> to vector<48xf32>
    %83 = vector.shape_cast %82 : vector<48xf32> to vector<48x1xf32>
    %84 = vector.broadcast %83 : vector<48x1xf32> to vector<48x48xf32>
    %85 = arith.subf %81, %84 : vector<48x48xf32>
    %86 = math.exp %85 : vector<48x48xf32>
    %cst_35 = arith.constant dense<0.000000e+00> : vector<48xf32>
    %87 = vector.multi_reduction <add>, %86, %cst_35 [1] : vector<48x48xf32> to vector<48xf32>
    %88 = vector.shape_cast %87 : vector<48xf32> to vector<48x1xf32>
    %89 = tpu.reciprocal %88 {approx = true} : vector<48x1xf32> -> vector<48x1xf32>
    %90 = vector.broadcast %89 : vector<48x1xf32> to vector<48x48xf32>
    %91 = arith.mulf %86, %90 : vector<48x48xf32>
    %cst_36 = arith.constant dense<0.000000e+00> : vector<48x8xf32>
    %92 = tpu.matmul %91, %76, %cst_36 {dimension_numbers = #tpu.dot_dimension_numbers<[1], [0], [0], [1], [0, 0, 1, 1], [], []>} : vector<48x48xf32>, vector<48x8xf32>, vector<48x8xf32> -> vector<48x8xf32>
    %93 = tpu.concatenate %29, %50, %71, %92 in 1 : vector<48x8xf32>, vector<48x8xf32>, vector<48x8xf32>, vector<48x8xf32> -> vector<48x32xf32>
    %c0_37 = arith.constant 0 : index
    %c0_38 = arith.constant 0 : index
    %94 = vector.load %arg9[%c0_37, %c0_38] : memref<32x32xf32, #tpu.memory_space<vmem>>, vector<32x32xf32>
    %cst_39 = arith.constant dense<0.000000e+00> : vector<48x32xf32>
    %95 = tpu.matmul %93, %94, %cst_39 {dimension_numbers = #tpu.dot_dimension_numbers<[1], [0], [0], [1], [0, 0, 1, 1], [], []>} : vector<48x32xf32>, vector<32x32xf32>, vector<48x32xf32> -> vector<48x32xf32>
    %c0_40 = arith.constant 0 : index
    %c0_41 = arith.constant 0 : index
    %96 = vector.load %arg10[%c0_40, %c0_41] : memref<1x32xf32, #tpu.memory_space<vmem>>, vector<1x32xf32>
    %97 = vector.broadcast %96 : vector<1x32xf32> to vector<48x32xf32>
    %98 = arith.addf %95, %97 : vector<48x32xf32>
    %99 = arith.addf %2, %98 : vector<48x32xf32>
    %c0_42 = arith.constant 0 : index
    %c0_43 = arith.constant 0 : index
    %100 = vector.load %arg15[%c0_42, %c0_43] : memref<1x32xf32, #tpu.memory_space<vmem>>, vector<1x32xf32>
    %c0_44 = arith.constant 0 : index
    %c0_45 = arith.constant 0 : index
    %101 = vector.load %arg16[%c0_44, %c0_45] : memref<1x32xf32, #tpu.memory_space<vmem>>, vector<1x32xf32>
    %cst_46 = arith.constant dense<0.000000e+00> : vector<48xf32>
    %102 = vector.multi_reduction <add>, %99, %cst_46 [1] : vector<48x32xf32> to vector<48xf32>
    %103 = vector.shape_cast %102 : vector<48xf32> to vector<48x1xf32>
    %cst_47 = arith.constant 3.200000e+01 : f32
    %104 = vector.broadcast %cst_47 : f32 to vector<48x1xf32>
    %105 = arith.divf %103, %104 : vector<48x1xf32>
    %106 = vector.broadcast %105 : vector<48x1xf32> to vector<48x32xf32>
    %107 = arith.subf %99, %106 : vector<48x32xf32>
    %108 = arith.mulf %107, %107 : vector<48x32xf32>
    %cst_48 = arith.constant dense<0.000000e+00> : vector<48xf32>
    %109 = vector.multi_reduction <add>, %108, %cst_48 [1] : vector<48x32xf32> to vector<48xf32>
    %110 = vector.shape_cast %109 : vector<48xf32> to vector<48x1xf32>
    %cst_49 = arith.constant 3.200000e+01 : f32
    %111 = vector.broadcast %cst_49 : f32 to vector<48x1xf32>
    %112 = arith.divf %110, %111 : vector<48x1xf32>
    %cst_50 = arith.constant 9.99999974E-6 : f32
    %113 = vector.broadcast %cst_50 : f32 to vector<48x1xf32>
    %114 = arith.addf %112, %113 : vector<48x1xf32>
    %115 = math.rsqrt %114 : vector<48x1xf32>
    %116 = vector.broadcast %115 : vector<48x1xf32> to vector<48x32xf32>
    %117 = arith.mulf %107, %116 : vector<48x32xf32>
    %118 = vector.broadcast %100 : vector<1x32xf32> to vector<48x32xf32>
    %119 = arith.mulf %117, %118 : vector<48x32xf32>
    %120 = vector.broadcast %101 : vector<1x32xf32> to vector<48x32xf32>
    %121 = arith.addf %119, %120 : vector<48x32xf32>
    %c0_51 = arith.constant 0 : index
    %c0_52 = arith.constant 0 : index
    %122 = vector.load %arg11[%c0_51, %c0_52] : memref<32x64xf32, #tpu.memory_space<vmem>>, vector<32x64xf32>
    %cst_53 = arith.constant dense<0.000000e+00> : vector<48x64xf32>
    %123 = tpu.matmul %121, %122, %cst_53 {dimension_numbers = #tpu.dot_dimension_numbers<[1], [0], [0], [1], [0, 0, 1, 1], [], []>} : vector<48x32xf32>, vector<32x64xf32>, vector<48x64xf32> -> vector<48x64xf32>
    %c0_54 = arith.constant 0 : index
    %c0_55 = arith.constant 0 : index
    %124 = vector.load %arg12[%c0_54, %c0_55] : memref<1x64xf32, #tpu.memory_space<vmem>>, vector<1x64xf32>
    %125 = vector.broadcast %124 : vector<1x64xf32> to vector<48x64xf32>
    %126 = arith.addf %123, %125 : vector<48x64xf32>
    %cst_56 = arith.constant 0.000000e+00 : f32
    %127 = vector.broadcast %cst_56 : f32 to vector<48x64xf32>
    %128 = arith.maximumf %126, %127 : vector<48x64xf32>
    %c0_57 = arith.constant 0 : index
    %c0_58 = arith.constant 0 : index
    %129 = vector.load %arg13[%c0_57, %c0_58] : memref<64x32xf32, #tpu.memory_space<vmem>>, vector<64x32xf32>
    %cst_59 = arith.constant dense<0.000000e+00> : vector<48x32xf32>
    %130 = tpu.matmul %128, %129, %cst_59 {dimension_numbers = #tpu.dot_dimension_numbers<[1], [0], [0], [1], [0, 0, 1, 1], [], []>} : vector<48x64xf32>, vector<64x32xf32>, vector<48x32xf32> -> vector<48x32xf32>
    %c0_60 = arith.constant 0 : index
    %c0_61 = arith.constant 0 : index
    %131 = vector.load %arg14[%c0_60, %c0_61] : memref<1x32xf32, #tpu.memory_space<vmem>>, vector<1x32xf32>
    %132 = vector.broadcast %131 : vector<1x32xf32> to vector<48x32xf32>
    %133 = arith.addf %130, %132 : vector<48x32xf32>
    %134 = arith.addf %121, %133 : vector<48x32xf32>
    %c0_62 = arith.constant 0 : index
    %c0_63 = arith.constant 0 : index
    %135 = vector.load %arg17[%c0_62, %c0_63] : memref<1x32xf32, #tpu.memory_space<vmem>>, vector<1x32xf32>
    %c0_64 = arith.constant 0 : index
    %c0_65 = arith.constant 0 : index
    %136 = vector.load %arg18[%c0_64, %c0_65] : memref<1x32xf32, #tpu.memory_space<vmem>>, vector<1x32xf32>
    %cst_66 = arith.constant dense<0.000000e+00> : vector<48xf32>
    %137 = vector.multi_reduction <add>, %134, %cst_66 [1] : vector<48x32xf32> to vector<48xf32>
    %138 = vector.shape_cast %137 : vector<48xf32> to vector<48x1xf32>
    %cst_67 = arith.constant 3.200000e+01 : f32
    %139 = vector.broadcast %cst_67 : f32 to vector<48x1xf32>
    %140 = arith.divf %138, %139 : vector<48x1xf32>
    %141 = vector.broadcast %140 : vector<48x1xf32> to vector<48x32xf32>
    %142 = arith.subf %134, %141 : vector<48x32xf32>
    %143 = arith.mulf %142, %142 : vector<48x32xf32>
    %cst_68 = arith.constant dense<0.000000e+00> : vector<48xf32>
    %144 = vector.multi_reduction <add>, %143, %cst_68 [1] : vector<48x32xf32> to vector<48xf32>
    %145 = vector.shape_cast %144 : vector<48xf32> to vector<48x1xf32>
    %cst_69 = arith.constant 3.200000e+01 : f32
    %146 = vector.broadcast %cst_69 : f32 to vector<48x1xf32>
    %147 = arith.divf %145, %146 : vector<48x1xf32>
    %cst_70 = arith.constant 9.99999974E-6 : f32
    %148 = vector.broadcast %cst_70 : f32 to vector<48x1xf32>
    %149 = arith.addf %147, %148 : vector<48x1xf32>
    %150 = math.rsqrt %149 : vector<48x1xf32>
    %151 = vector.broadcast %150 : vector<48x1xf32> to vector<48x32xf32>
    %152 = arith.mulf %142, %151 : vector<48x32xf32>
    %153 = vector.broadcast %135 : vector<1x32xf32> to vector<48x32xf32>
    %154 = arith.mulf %152, %153 : vector<48x32xf32>
    %155 = vector.broadcast %136 : vector<1x32xf32> to vector<48x32xf32>
    %156 = arith.addf %154, %155 : vector<48x32xf32>
    %cst_71 = arith.constant 0.899999976 : f32
    %157 = vector.broadcast %cst_71 : f32 to vector<48x32xf32>
    %158 = arith.mulf %157, %0 : vector<48x32xf32>
    %cst_72 = arith.constant 1.000000e-01 : f32
    %159 = vector.broadcast %cst_72 : f32 to vector<48x32xf32>
    %160 = arith.mulf %159, %156 : vector<48x32xf32>
    %161 = arith.addf %158, %160 : vector<48x32xf32>
    %162 = arith.mulf %161, %161 : vector<48x32xf32>
    %cst_73 = arith.constant dense<0.000000e+00> : vector<48xf32>
    %163 = vector.multi_reduction <add>, %162, %cst_73 [1] : vector<48x32xf32> to vector<48xf32>
    %164 = vector.shape_cast %163 : vector<48xf32> to vector<48x1xf32>
    %cst_74 = arith.constant 9.99999996E-13 : f32
    %165 = vector.broadcast %cst_74 : f32 to vector<48x1xf32>
    %166 = arith.addf %164, %165 : vector<48x1xf32>
    %167 = math.rsqrt %166 : vector<48x1xf32>
    %168 = vector.broadcast %167 : vector<48x1xf32> to vector<48x32xf32>
    %169 = arith.mulf %161, %168 : vector<48x32xf32>
    %c0_75 = arith.constant 0 : index
    %c0_76 = arith.constant 0 : index
    %170 = vector.load %arg4[%c0_75, %c0_76] : memref<1x11xf32, #tpu.memory_space<vmem>>, vector<1x11xf32>
    %c0_77 = arith.constant 0 : index
    %c0_78 = arith.constant 0 : index
    %171 = vector.load %arg5[%c0_77, %c0_78] : memref<1x11xf32, #tpu.memory_space<vmem>>, vector<1x11xf32>
    %c0_79 = arith.constant 0 : index
    %c0_80 = arith.constant 0 : index
    %172 = vector.load %arg6[%c0_79, %c0_80] : memref<1x2xf32, #tpu.memory_space<vmem>>, vector<1x2xf32>
    %173 = vector.extract_strided_slice %169 {offsets = [0, 0], sizes = [8, 32], strides = [1, 1]} : vector<48x32xf32> to vector<8x32xf32>
    %174 = vector.extract_strided_slice %169 {offsets = [8, 0], sizes = [16, 32], strides = [1, 1]} : vector<48x32xf32> to vector<16x32xf32>
    %cst_81 = arith.constant dense<0.000000e+00> : vector<8x16xf32>
    %175 = tpu.matmul %173, %174, %cst_81 {dimension_numbers = #tpu.dot_dimension_numbers<[1], [1], [0], [0], [0, 0, 1, 0], [], []>} : vector<8x32xf32>, vector<16x32xf32>, vector<8x16xf32> -> vector<8x16xf32>
    %c0_82 = arith.constant 0 : index
    %c0_83 = arith.constant 0 : index
    %c0_84 = arith.constant 0 : index
    %176 = vector.load %arg3[%c0_82, %c0_83, %c0_84] : memref<2x8x16xf32, #tpu.memory_space<vmem>>, vector<1x8x16xf32>
    %177 = vector.shape_cast %176 : vector<1x8x16xf32> to vector<8x16xf32>
    %cst_85 = arith.constant 0.000000e+00 : f32
    %178 = vector.broadcast %cst_85 : f32 to vector<8x16xf32>
    %179 = arith.cmpf ogt, %177, %178 : vector<8x16xf32>
    %cst_86 = arith.constant 0.000000e+00 : f32
    %180 = vector.broadcast %cst_86 : f32 to vector<8x16xf32>
    %181 = arith.select %179, %175, %180 : vector<8x16xi1>, vector<8x16xf32>
    %cst_87 = arith.constant -0.899999976 : f32
    %182 = vector.broadcast %cst_87 : f32 to vector<8x16xf32>
    %183 = arith.subf %181, %182 : vector<8x16xf32>
    %184 = arith.mulf %183, %183 : vector<8x16xf32>
    %cst_88 = arith.constant 0.000000e+00 : f32
    %185 = vector.broadcast %cst_88 : f32 to vector<8x16xf32>
    %186 = arith.subf %185, %184 : vector<8x16xf32>
    %187 = math.exp %186 : vector<8x16xf32>
    %cst_89 = arith.constant 5.000000e+01 : f32
    %188 = vector.broadcast %cst_89 : f32 to vector<8x16xf32>
    %189 = arith.mulf %187, %188 : vector<8x16xf32>
    %cst_90 = arith.constant dense<0.000000e+00> : vector<8xf32>
    %190 = vector.multi_reduction <add>, %189, %cst_90 [1] : vector<8x16xf32> to vector<8xf32>
    %191 = vector.shape_cast %190 : vector<8xf32> to vector<8x1xf32>
    %cst_91 = arith.constant -0.699999988 : f32
    %192 = vector.broadcast %cst_91 : f32 to vector<8x16xf32>
    %193 = arith.subf %181, %192 : vector<8x16xf32>
    %194 = arith.mulf %193, %193 : vector<8x16xf32>
    %cst_92 = arith.constant 0.000000e+00 : f32
    %195 = vector.broadcast %cst_92 : f32 to vector<8x16xf32>
    %196 = arith.subf %195, %194 : vector<8x16xf32>
    %197 = math.exp %196 : vector<8x16xf32>
    %cst_93 = arith.constant 5.000000e+01 : f32
    %198 = vector.broadcast %cst_93 : f32 to vector<8x16xf32>
    %199 = arith.mulf %197, %198 : vector<8x16xf32>
    %cst_94 = arith.constant dense<0.000000e+00> : vector<8xf32>
    %200 = vector.multi_reduction <add>, %199, %cst_94 [1] : vector<8x16xf32> to vector<8xf32>
    %201 = vector.shape_cast %200 : vector<8xf32> to vector<8x1xf32>
    %cst_95 = arith.constant -5.000000e-01 : f32
    %202 = vector.broadcast %cst_95 : f32 to vector<8x16xf32>
    %203 = arith.subf %181, %202 : vector<8x16xf32>
    %204 = arith.mulf %203, %203 : vector<8x16xf32>
    %cst_96 = arith.constant 0.000000e+00 : f32
    %205 = vector.broadcast %cst_96 : f32 to vector<8x16xf32>
    %206 = arith.subf %205, %204 : vector<8x16xf32>
    %207 = math.exp %206 : vector<8x16xf32>
    %cst_97 = arith.constant 5.000000e+01 : f32
    %208 = vector.broadcast %cst_97 : f32 to vector<8x16xf32>
    %209 = arith.mulf %207, %208 : vector<8x16xf32>
    %cst_98 = arith.constant dense<0.000000e+00> : vector<8xf32>
    %210 = vector.multi_reduction <add>, %209, %cst_98 [1] : vector<8x16xf32> to vector<8xf32>
    %211 = vector.shape_cast %210 : vector<8xf32> to vector<8x1xf32>
    %cst_99 = arith.constant -3.000000e-01 : f32
    %212 = vector.broadcast %cst_99 : f32 to vector<8x16xf32>
    %213 = arith.subf %181, %212 : vector<8x16xf32>
    %214 = arith.mulf %213, %213 : vector<8x16xf32>
    %cst_100 = arith.constant 0.000000e+00 : f32
    %215 = vector.broadcast %cst_100 : f32 to vector<8x16xf32>
    %216 = arith.subf %215, %214 : vector<8x16xf32>
    %217 = math.exp %216 : vector<8x16xf32>
    %cst_101 = arith.constant 5.000000e+01 : f32
    %218 = vector.broadcast %cst_101 : f32 to vector<8x16xf32>
    %219 = arith.mulf %217, %218 : vector<8x16xf32>
    %cst_102 = arith.constant dense<0.000000e+00> : vector<8xf32>
    %220 = vector.multi_reduction <add>, %219, %cst_102 [1] : vector<8x16xf32> to vector<8xf32>
    %221 = vector.shape_cast %220 : vector<8xf32> to vector<8x1xf32>
    %cst_103 = arith.constant -1.000000e-01 : f32
    %222 = vector.broadcast %cst_103 : f32 to vector<8x16xf32>
    %223 = arith.subf %181, %222 : vector<8x16xf32>
    %224 = arith.mulf %223, %223 : vector<8x16xf32>
    %cst_104 = arith.constant 0.000000e+00 : f32
    %225 = vector.broadcast %cst_104 : f32 to vector<8x16xf32>
    %226 = arith.subf %225, %224 : vector<8x16xf32>
    %227 = math.exp %226 : vector<8x16xf32>
    %cst_105 = arith.constant 5.000000e+01 : f32
    %228 = vector.broadcast %cst_105 : f32 to vector<8x16xf32>
    %229 = arith.mulf %227, %228 : vector<8x16xf32>
    %cst_106 = arith.constant dense<0.000000e+00> : vector<8xf32>
    %230 = vector.multi_reduction <add>, %229, %cst_106 [1] : vector<8x16xf32> to vector<8xf32>
    %231 = vector.shape_cast %230 : vector<8xf32> to vector<8x1xf32>
    %cst_107 = arith.constant 1.000000e-01 : f32
    %232 = vector.broadcast %cst_107 : f32 to vector<8x16xf32>
    %233 = arith.subf %181, %232 : vector<8x16xf32>
    %234 = arith.mulf %233, %233 : vector<8x16xf32>
    %cst_108 = arith.constant 0.000000e+00 : f32
    %235 = vector.broadcast %cst_108 : f32 to vector<8x16xf32>
    %236 = arith.subf %235, %234 : vector<8x16xf32>
    %237 = math.exp %236 : vector<8x16xf32>
    %cst_109 = arith.constant 5.000000e+01 : f32
    %238 = vector.broadcast %cst_109 : f32 to vector<8x16xf32>
    %239 = arith.mulf %237, %238 : vector<8x16xf32>
    %cst_110 = arith.constant dense<0.000000e+00> : vector<8xf32>
    %240 = vector.multi_reduction <add>, %239, %cst_110 [1] : vector<8x16xf32> to vector<8xf32>
    %241 = vector.shape_cast %240 : vector<8xf32> to vector<8x1xf32>
    %cst_111 = arith.constant 3.000000e-01 : f32
    %242 = vector.broadcast %cst_111 : f32 to vector<8x16xf32>
    %243 = arith.subf %181, %242 : vector<8x16xf32>
    %244 = arith.mulf %243, %243 : vector<8x16xf32>
    %cst_112 = arith.constant 0.000000e+00 : f32
    %245 = vector.broadcast %cst_112 : f32 to vector<8x16xf32>
    %246 = arith.subf %245, %244 : vector<8x16xf32>
    %247 = math.exp %246 : vector<8x16xf32>
    %cst_113 = arith.constant 5.000000e+01 : f32
    %248 = vector.broadcast %cst_113 : f32 to vector<8x16xf32>
    %249 = arith.mulf %247, %248 : vector<8x16xf32>
    %cst_114 = arith.constant dense<0.000000e+00> : vector<8xf32>
    %250 = vector.multi_reduction <add>, %249, %cst_114 [1] : vector<8x16xf32> to vector<8xf32>
    %251 = vector.shape_cast %250 : vector<8xf32> to vector<8x1xf32>
    %cst_115 = arith.constant 5.000000e-01 : f32
    %252 = vector.broadcast %cst_115 : f32 to vector<8x16xf32>
    %253 = arith.subf %181, %252 : vector<8x16xf32>
    %254 = arith.mulf %253, %253 : vector<8x16xf32>
    %cst_116 = arith.constant 0.000000e+00 : f32
    %255 = vector.broadcast %cst_116 : f32 to vector<8x16xf32>
    %256 = arith.subf %255, %254 : vector<8x16xf32>
    %257 = math.exp %256 : vector<8x16xf32>
    %cst_117 = arith.constant 5.000000e+01 : f32
    %258 = vector.broadcast %cst_117 : f32 to vector<8x16xf32>
    %259 = arith.mulf %257, %258 : vector<8x16xf32>
    %cst_118 = arith.constant dense<0.000000e+00> : vector<8xf32>
    %260 = vector.multi_reduction <add>, %259, %cst_118 [1] : vector<8x16xf32> to vector<8xf32>
    %261 = vector.shape_cast %260 : vector<8xf32> to vector<8x1xf32>
    %cst_119 = arith.constant 0.699999988 : f32
    %262 = vector.broadcast %cst_119 : f32 to vector<8x16xf32>
    %263 = arith.subf %181, %262 : vector<8x16xf32>
    %264 = arith.mulf %263, %263 : vector<8x16xf32>
    %cst_120 = arith.constant 0.000000e+00 : f32
    %265 = vector.broadcast %cst_120 : f32 to vector<8x16xf32>
    %266 = arith.subf %265, %264 : vector<8x16xf32>
    %267 = math.exp %266 : vector<8x16xf32>
    %cst_121 = arith.constant 5.000000e+01 : f32
    %268 = vector.broadcast %cst_121 : f32 to vector<8x16xf32>
    %269 = arith.mulf %267, %268 : vector<8x16xf32>
    %cst_122 = arith.constant dense<0.000000e+00> : vector<8xf32>
    %270 = vector.multi_reduction <add>, %269, %cst_122 [1] : vector<8x16xf32> to vector<8xf32>
    %271 = vector.shape_cast %270 : vector<8xf32> to vector<8x1xf32>
    %cst_123 = arith.constant 0.899999976 : f32
    %272 = vector.broadcast %cst_123 : f32 to vector<8x16xf32>
    %273 = arith.subf %181, %272 : vector<8x16xf32>
    %274 = arith.mulf %273, %273 : vector<8x16xf32>
    %cst_124 = arith.constant 0.000000e+00 : f32
    %275 = vector.broadcast %cst_124 : f32 to vector<8x16xf32>
    %276 = arith.subf %275, %274 : vector<8x16xf32>
    %277 = math.exp %276 : vector<8x16xf32>
    %cst_125 = arith.constant 5.000000e+01 : f32
    %278 = vector.broadcast %cst_125 : f32 to vector<8x16xf32>
    %279 = arith.mulf %277, %278 : vector<8x16xf32>
    %cst_126 = arith.constant dense<0.000000e+00> : vector<8xf32>
    %280 = vector.multi_reduction <add>, %279, %cst_126 [1] : vector<8x16xf32> to vector<8xf32>
    %281 = vector.shape_cast %280 : vector<8xf32> to vector<8x1xf32>
    %cst_127 = arith.constant 1.000000e+00 : f32
    %282 = vector.broadcast %cst_127 : f32 to vector<8x16xf32>
    %283 = arith.subf %181, %282 : vector<8x16xf32>
    %284 = arith.mulf %283, %283 : vector<8x16xf32>
    %cst_128 = arith.constant 0.000000e+00 : f32
    %285 = vector.broadcast %cst_128 : f32 to vector<8x16xf32>
    %286 = arith.subf %285, %284 : vector<8x16xf32>
    %287 = math.exp %286 : vector<8x16xf32>
    %cst_129 = arith.constant 5.000000e+01 : f32
    %288 = vector.broadcast %cst_129 : f32 to vector<8x16xf32>
    %289 = arith.mulf %287, %288 : vector<8x16xf32>
    %cst_130 = arith.constant dense<0.000000e+00> : vector<8xf32>
    %290 = vector.multi_reduction <add>, %289, %cst_130 [1] : vector<8x16xf32> to vector<8xf32>
    %291 = vector.shape_cast %290 : vector<8xf32> to vector<8x1xf32>
    %292 = tpu.concatenate %191, %201, %211, %221, %231, %241, %251, %261, %271, %281, %291 in 1 : vector<8x1xf32>, vector<8x1xf32>, vector<8x1xf32>, vector<8x1xf32>, vector<8x1xf32>, vector<8x1xf32>, vector<8x1xf32>, vector<8x1xf32>, vector<8x1xf32>, vector<8x1xf32>, vector<8x1xf32> -> vector<8x11xf32>
    %293 = math.log %292 : vector<8x11xf32>
    %cst_131 = arith.constant 2.000000e+00 : f32
    %294 = math.log %cst_131 : f32
    %295 = vector.broadcast %294 : f32 to vector<8x11xf32>
    %296 = arith.divf %293, %295 : vector<8x11xf32>
    %cst_132 = arith.constant dense<0.000000e+00> : vector<11xf32>
    %297 = vector.multi_reduction <add>, %296, %cst_132 [0] : vector<8x11xf32> to vector<11xf32>
    %298 = vector.shape_cast %297 : vector<11xf32> to vector<1x11xf32>
    %cst_133 = arith.constant dense<0.000000e+00> : vector<11xf32>
    %299 = vector.multi_reduction <add>, %292, %cst_133 [0] : vector<8x11xf32> to vector<11xf32>
    %300 = vector.shape_cast %299 : vector<11xf32> to vector<1x11xf32>
    %cst_134 = arith.constant 6.250000e-02 : f32
    %301 = vector.broadcast %cst_134 : f32 to vector<1x11xf32>
    %302 = arith.mulf %300, %301 : vector<1x11xf32>
    %303 = arith.mulf %298, %170 : vector<1x11xf32>
    %cst_135 = arith.constant dense<0.000000e+00> : vector<1xf32>
    %304 = vector.multi_reduction <add>, %303, %cst_135 [1] : vector<1x11xf32> to vector<1xf32>
    %305 = vector.shape_cast %304 : vector<1xf32> to vector<1x1xf32>
    %306 = arith.mulf %302, %171 : vector<1x11xf32>
    %cst_136 = arith.constant dense<0.000000e+00> : vector<1xf32>
    %307 = vector.multi_reduction <add>, %306, %cst_136 [1] : vector<1x11xf32> to vector<1xf32>
    %308 = vector.shape_cast %307 : vector<1xf32> to vector<1x1xf32>
    %309 = vector.extract_strided_slice %172 {offsets = [0, 0], sizes = [1, 1], strides = [1, 1]} : vector<1x2xf32> to vector<1x1xf32>
    %310 = arith.mulf %309, %305 : vector<1x1xf32>
    %311 = vector.extract_strided_slice %172 {offsets = [0, 1], sizes = [1, 1], strides = [1, 1]} : vector<1x2xf32> to vector<1x1xf32>
    %312 = arith.mulf %311, %308 : vector<1x1xf32>
    %313 = arith.addf %310, %312 : vector<1x1xf32>
    %314 = vector.extract_strided_slice %169 {offsets = [24, 0], sizes = [8, 32], strides = [1, 1]} : vector<48x32xf32> to vector<8x32xf32>
    %315 = vector.extract_strided_slice %169 {offsets = [32, 0], sizes = [16, 32], strides = [1, 1]} : vector<48x32xf32> to vector<16x32xf32>
    %cst_137 = arith.constant dense<0.000000e+00> : vector<8x16xf32>
    %316 = tpu.matmul %314, %315, %cst_137 {dimension_numbers = #tpu.dot_dimension_numbers<[1], [1], [0], [0], [0, 0, 1, 0], [], []>} : vector<8x32xf32>, vector<16x32xf32>, vector<8x16xf32> -> vector<8x16xf32>
    %c1 = arith.constant 1 : index
    %c0_138 = arith.constant 0 : index
    %c0_139 = arith.constant 0 : index
    %317 = vector.load %arg3[%c1, %c0_138, %c0_139] : memref<2x8x16xf32, #tpu.memory_space<vmem>>, vector<1x8x16xf32>
    %318 = vector.shape_cast %317 : vector<1x8x16xf32> to vector<8x16xf32>
    %cst_140 = arith.constant 0.000000e+00 : f32
    %319 = vector.broadcast %cst_140 : f32 to vector<8x16xf32>
    %320 = arith.cmpf ogt, %318, %319 : vector<8x16xf32>
    %cst_141 = arith.constant 0.000000e+00 : f32
    %321 = vector.broadcast %cst_141 : f32 to vector<8x16xf32>
    %322 = arith.select %320, %316, %321 : vector<8x16xi1>, vector<8x16xf32>
    %cst_142 = arith.constant -0.899999976 : f32
    %323 = vector.broadcast %cst_142 : f32 to vector<8x16xf32>
    %324 = arith.subf %322, %323 : vector<8x16xf32>
    %325 = arith.mulf %324, %324 : vector<8x16xf32>
    %cst_143 = arith.constant 0.000000e+00 : f32
    %326 = vector.broadcast %cst_143 : f32 to vector<8x16xf32>
    %327 = arith.subf %326, %325 : vector<8x16xf32>
    %328 = math.exp %327 : vector<8x16xf32>
    %cst_144 = arith.constant 5.000000e+01 : f32
    %329 = vector.broadcast %cst_144 : f32 to vector<8x16xf32>
    %330 = arith.mulf %328, %329 : vector<8x16xf32>
    %cst_145 = arith.constant dense<0.000000e+00> : vector<8xf32>
    %331 = vector.multi_reduction <add>, %330, %cst_145 [1] : vector<8x16xf32> to vector<8xf32>
    %332 = vector.shape_cast %331 : vector<8xf32> to vector<8x1xf32>
    %cst_146 = arith.constant -0.699999988 : f32
    %333 = vector.broadcast %cst_146 : f32 to vector<8x16xf32>
    %334 = arith.subf %322, %333 : vector<8x16xf32>
    %335 = arith.mulf %334, %334 : vector<8x16xf32>
    %cst_147 = arith.constant 0.000000e+00 : f32
    %336 = vector.broadcast %cst_147 : f32 to vector<8x16xf32>
    %337 = arith.subf %336, %335 : vector<8x16xf32>
    %338 = math.exp %337 : vector<8x16xf32>
    %cst_148 = arith.constant 5.000000e+01 : f32
    %339 = vector.broadcast %cst_148 : f32 to vector<8x16xf32>
    %340 = arith.mulf %338, %339 : vector<8x16xf32>
    %cst_149 = arith.constant dense<0.000000e+00> : vector<8xf32>
    %341 = vector.multi_reduction <add>, %340, %cst_149 [1] : vector<8x16xf32> to vector<8xf32>
    %342 = vector.shape_cast %341 : vector<8xf32> to vector<8x1xf32>
    %cst_150 = arith.constant -5.000000e-01 : f32
    %343 = vector.broadcast %cst_150 : f32 to vector<8x16xf32>
    %344 = arith.subf %322, %343 : vector<8x16xf32>
    %345 = arith.mulf %344, %344 : vector<8x16xf32>
    %cst_151 = arith.constant 0.000000e+00 : f32
    %346 = vector.broadcast %cst_151 : f32 to vector<8x16xf32>
    %347 = arith.subf %346, %345 : vector<8x16xf32>
    %348 = math.exp %347 : vector<8x16xf32>
    %cst_152 = arith.constant 5.000000e+01 : f32
    %349 = vector.broadcast %cst_152 : f32 to vector<8x16xf32>
    %350 = arith.mulf %348, %349 : vector<8x16xf32>
    %cst_153 = arith.constant dense<0.000000e+00> : vector<8xf32>
    %351 = vector.multi_reduction <add>, %350, %cst_153 [1] : vector<8x16xf32> to vector<8xf32>
    %352 = vector.shape_cast %351 : vector<8xf32> to vector<8x1xf32>
    %cst_154 = arith.constant -3.000000e-01 : f32
    %353 = vector.broadcast %cst_154 : f32 to vector<8x16xf32>
    %354 = arith.subf %322, %353 : vector<8x16xf32>
    %355 = arith.mulf %354, %354 : vector<8x16xf32>
    %cst_155 = arith.constant 0.000000e+00 : f32
    %356 = vector.broadcast %cst_155 : f32 to vector<8x16xf32>
    %357 = arith.subf %356, %355 : vector<8x16xf32>
    %358 = math.exp %357 : vector<8x16xf32>
    %cst_156 = arith.constant 5.000000e+01 : f32
    %359 = vector.broadcast %cst_156 : f32 to vector<8x16xf32>
    %360 = arith.mulf %358, %359 : vector<8x16xf32>
    %cst_157 = arith.constant dense<0.000000e+00> : vector<8xf32>
    %361 = vector.multi_reduction <add>, %360, %cst_157 [1] : vector<8x16xf32> to vector<8xf32>
    %362 = vector.shape_cast %361 : vector<8xf32> to vector<8x1xf32>
    %cst_158 = arith.constant -1.000000e-01 : f32
    %363 = vector.broadcast %cst_158 : f32 to vector<8x16xf32>
    %364 = arith.subf %322, %363 : vector<8x16xf32>
    %365 = arith.mulf %364, %364 : vector<8x16xf32>
    %cst_159 = arith.constant 0.000000e+00 : f32
    %366 = vector.broadcast %cst_159 : f32 to vector<8x16xf32>
    %367 = arith.subf %366, %365 : vector<8x16xf32>
    %368 = math.exp %367 : vector<8x16xf32>
    %cst_160 = arith.constant 5.000000e+01 : f32
    %369 = vector.broadcast %cst_160 : f32 to vector<8x16xf32>
    %370 = arith.mulf %368, %369 : vector<8x16xf32>
    %cst_161 = arith.constant dense<0.000000e+00> : vector<8xf32>
    %371 = vector.multi_reduction <add>, %370, %cst_161 [1] : vector<8x16xf32> to vector<8xf32>
    %372 = vector.shape_cast %371 : vector<8xf32> to vector<8x1xf32>
    %cst_162 = arith.constant 1.000000e-01 : f32
    %373 = vector.broadcast %cst_162 : f32 to vector<8x16xf32>
    %374 = arith.subf %322, %373 : vector<8x16xf32>
    %375 = arith.mulf %374, %374 : vector<8x16xf32>
    %cst_163 = arith.constant 0.000000e+00 : f32
    %376 = vector.broadcast %cst_163 : f32 to vector<8x16xf32>
    %377 = arith.subf %376, %375 : vector<8x16xf32>
    %378 = math.exp %377 : vector<8x16xf32>
    %cst_164 = arith.constant 5.000000e+01 : f32
    %379 = vector.broadcast %cst_164 : f32 to vector<8x16xf32>
    %380 = arith.mulf %378, %379 : vector<8x16xf32>
    %cst_165 = arith.constant dense<0.000000e+00> : vector<8xf32>
    %381 = vector.multi_reduction <add>, %380, %cst_165 [1] : vector<8x16xf32> to vector<8xf32>
    %382 = vector.shape_cast %381 : vector<8xf32> to vector<8x1xf32>
    %cst_166 = arith.constant 3.000000e-01 : f32
    %383 = vector.broadcast %cst_166 : f32 to vector<8x16xf32>
    %384 = arith.subf %322, %383 : vector<8x16xf32>
    %385 = arith.mulf %384, %384 : vector<8x16xf32>
    %cst_167 = arith.constant 0.000000e+00 : f32
    %386 = vector.broadcast %cst_167 : f32 to vector<8x16xf32>
    %387 = arith.subf %386, %385 : vector<8x16xf32>
    %388 = math.exp %387 : vector<8x16xf32>
    %cst_168 = arith.constant 5.000000e+01 : f32
    %389 = vector.broadcast %cst_168 : f32 to vector<8x16xf32>
    %390 = arith.mulf %388, %389 : vector<8x16xf32>
    %cst_169 = arith.constant dense<0.000000e+00> : vector<8xf32>
    %391 = vector.multi_reduction <add>, %390, %cst_169 [1] : vector<8x16xf32> to vector<8xf32>
    %392 = vector.shape_cast %391 : vector<8xf32> to vector<8x1xf32>
    %cst_170 = arith.constant 5.000000e-01 : f32
    %393 = vector.broadcast %cst_170 : f32 to vector<8x16xf32>
    %394 = arith.subf %322, %393 : vector<8x16xf32>
    %395 = arith.mulf %394, %394 : vector<8x16xf32>
    %cst_171 = arith.constant 0.000000e+00 : f32
    %396 = vector.broadcast %cst_171 : f32 to vector<8x16xf32>
    %397 = arith.subf %396, %395 : vector<8x16xf32>
    %398 = math.exp %397 : vector<8x16xf32>
    %cst_172 = arith.constant 5.000000e+01 : f32
    %399 = vector.broadcast %cst_172 : f32 to vector<8x16xf32>
    %400 = arith.mulf %398, %399 : vector<8x16xf32>
    %cst_173 = arith.constant dense<0.000000e+00> : vector<8xf32>
    %401 = vector.multi_reduction <add>, %400, %cst_173 [1] : vector<8x16xf32> to vector<8xf32>
    %402 = vector.shape_cast %401 : vector<8xf32> to vector<8x1xf32>
    %cst_174 = arith.constant 0.699999988 : f32
    %403 = vector.broadcast %cst_174 : f32 to vector<8x16xf32>
    %404 = arith.subf %322, %403 : vector<8x16xf32>
    %405 = arith.mulf %404, %404 : vector<8x16xf32>
    %cst_175 = arith.constant 0.000000e+00 : f32
    %406 = vector.broadcast %cst_175 : f32 to vector<8x16xf32>
    %407 = arith.subf %406, %405 : vector<8x16xf32>
    %408 = math.exp %407 : vector<8x16xf32>
    %cst_176 = arith.constant 5.000000e+01 : f32
    %409 = vector.broadcast %cst_176 : f32 to vector<8x16xf32>
    %410 = arith.mulf %408, %409 : vector<8x16xf32>
    %cst_177 = arith.constant dense<0.000000e+00> : vector<8xf32>
    %411 = vector.multi_reduction <add>, %410, %cst_177 [1] : vector<8x16xf32> to vector<8xf32>
    %412 = vector.shape_cast %411 : vector<8xf32> to vector<8x1xf32>
    %cst_178 = arith.constant 0.899999976 : f32
    %413 = vector.broadcast %cst_178 : f32 to vector<8x16xf32>
    %414 = arith.subf %322, %413 : vector<8x16xf32>
    %415 = arith.mulf %414, %414 : vector<8x16xf32>
    %cst_179 = arith.constant 0.000000e+00 : f32
    %416 = vector.broadcast %cst_179 : f32 to vector<8x16xf32>
    %417 = arith.subf %416, %415 : vector<8x16xf32>
    %418 = math.exp %417 : vector<8x16xf32>
    %cst_180 = arith.constant 5.000000e+01 : f32
    %419 = vector.broadcast %cst_180 : f32 to vector<8x16xf32>
    %420 = arith.mulf %418, %419 : vector<8x16xf32>
    %cst_181 = arith.constant dense<0.000000e+00> : vector<8xf32>
    %421 = vector.multi_reduction <add>, %420, %cst_181 [1] : vector<8x16xf32> to vector<8xf32>
    %422 = vector.shape_cast %421 : vector<8xf32> to vector<8x1xf32>
    %cst_182 = arith.constant 1.000000e+00 : f32
    %423 = vector.broadcast %cst_182 : f32 to vector<8x16xf32>
    %424 = arith.subf %322, %423 : vector<8x16xf32>
    %425 = arith.mulf %424, %424 : vector<8x16xf32>
    %cst_183 = arith.constant 0.000000e+00 : f32
    %426 = vector.broadcast %cst_183 : f32 to vector<8x16xf32>
    %427 = arith.subf %426, %425 : vector<8x16xf32>
    %428 = math.exp %427 : vector<8x16xf32>
    %cst_184 = arith.constant 5.000000e+01 : f32
    %429 = vector.broadcast %cst_184 : f32 to vector<8x16xf32>
    %430 = arith.mulf %428, %429 : vector<8x16xf32>
    %cst_185 = arith.constant dense<0.000000e+00> : vector<8xf32>
    %431 = vector.multi_reduction <add>, %430, %cst_185 [1] : vector<8x16xf32> to vector<8xf32>
    %432 = vector.shape_cast %431 : vector<8xf32> to vector<8x1xf32>
    %433 = tpu.concatenate %332, %342, %352, %362, %372, %382, %392, %402, %412, %422, %432 in 1 : vector<8x1xf32>, vector<8x1xf32>, vector<8x1xf32>, vector<8x1xf32>, vector<8x1xf32>, vector<8x1xf32>, vector<8x1xf32>, vector<8x1xf32>, vector<8x1xf32>, vector<8x1xf32>, vector<8x1xf32> -> vector<8x11xf32>
    %434 = math.log %433 : vector<8x11xf32>
    %cst_186 = arith.constant 2.000000e+00 : f32
    %435 = math.log %cst_186 : f32
    %436 = vector.broadcast %435 : f32 to vector<8x11xf32>
    %437 = arith.divf %434, %436 : vector<8x11xf32>
    %cst_187 = arith.constant dense<0.000000e+00> : vector<11xf32>
    %438 = vector.multi_reduction <add>, %437, %cst_187 [0] : vector<8x11xf32> to vector<11xf32>
    %439 = vector.shape_cast %438 : vector<11xf32> to vector<1x11xf32>
    %cst_188 = arith.constant dense<0.000000e+00> : vector<11xf32>
    %440 = vector.multi_reduction <add>, %433, %cst_188 [0] : vector<8x11xf32> to vector<11xf32>
    %441 = vector.shape_cast %440 : vector<11xf32> to vector<1x11xf32>
    %cst_189 = arith.constant 6.250000e-02 : f32
    %442 = vector.broadcast %cst_189 : f32 to vector<1x11xf32>
    %443 = arith.mulf %441, %442 : vector<1x11xf32>
    %444 = arith.mulf %439, %170 : vector<1x11xf32>
    %cst_190 = arith.constant dense<0.000000e+00> : vector<1xf32>
    %445 = vector.multi_reduction <add>, %444, %cst_190 [1] : vector<1x11xf32> to vector<1xf32>
    %446 = vector.shape_cast %445 : vector<1xf32> to vector<1x1xf32>
    %447 = arith.mulf %443, %171 : vector<1x11xf32>
    %cst_191 = arith.constant dense<0.000000e+00> : vector<1xf32>
    %448 = vector.multi_reduction <add>, %447, %cst_191 [1] : vector<1x11xf32> to vector<1xf32>
    %449 = vector.shape_cast %448 : vector<1xf32> to vector<1x1xf32>
    %450 = vector.extract_strided_slice %172 {offsets = [0, 0], sizes = [1, 1], strides = [1, 1]} : vector<1x2xf32> to vector<1x1xf32>
    %451 = arith.mulf %450, %446 : vector<1x1xf32>
    %452 = vector.extract_strided_slice %172 {offsets = [0, 1], sizes = [1, 1], strides = [1, 1]} : vector<1x2xf32> to vector<1x1xf32>
    %453 = arith.mulf %452, %449 : vector<1x1xf32>
    %454 = arith.addf %451, %453 : vector<1x1xf32>
    %455 = tpu.concatenate %313, %454 in 0 : vector<1x1xf32>, vector<1x1xf32> -> vector<2x1xf32>
    %c0_192 = arith.constant 0 : index
    %c0_193 = arith.constant 0 : index
    %456 = vector.load %arg19[%c0_192, %c0_193] : memref<2x1xf32, #tpu.memory_space<vmem>>, vector<2x1xf32>
    tpu.vector_store %arg19[%c0_192, %c0_193], %455 {strides = array<i32>} : memref<2x1xf32, #tpu.memory_space<vmem>>, vector<2x1xf32>,
    return
  }
}

</mosaic_0001>

<bundles_post_ra>
// kernel: mul.20
= control target key start
LH: loop header
LB: loop body
LE: loop exit
PB: predicated region body
PF: predicated region fallthrough
CT: control target
= control target key end

     0   :  { %vm7_vm0 = vcmask 195584   ;;  %vm13_vm1 = vcmask 392384   ;;  %s39_s0 = inlined_call_operand.vmem [shape: f32[2,24], index: 0, kind: input, shape index: {}]   ;;  %s40_s1 = inlined_call_operand.vmem [shape: f32[48], index: 1, kind: output, shape index: {}]  }
   0x1   :  { %v4_v0 = vld [vmem:[%s39_s0] sm:$0x3]  ;;  %s22_s0 = smov 24  }
   0x2   :  { %5 = vst [vmem:[#allocation1] sm:$0x3] %v4_v0 }
   0x9   :  { %v10_v1 = vld [vmem:[#allocation1 + $0x1] sm:$0x1]   ;;  %v6_v2 = vld [vmem:[#allocation1] sm:$0x1]  }
   0xa   :  { %11 = vrot.lane.b32.xlu0 %v10_v1, %s22_s0  ;;  %8 = vst.msk [vmem:[#allocation0] sm:$0x1] %vm7_vm0, %v6_v2  }
  0x7c   :  { %v12_v3 = vpop.permute.xlu0 %11  }
  0x7d   :  { %14 = vst.msk [vmem:[#allocation0] sm:$0x1] %vm13_vm1, %v12_v3  }
  0x84   :  { %v18_v4 = vld [vmem:[#allocation0] sm:$0x1] }
  0x85   :  { %20 = vst [vmem:[%s40_s1] sm:$0x1] %v18_v4 }

// kernel: tk_forward.1
= control target key start
LH: loop header
LB: loop body
LE: loop exit
PB: predicated region body
PF: predicated region fallthrough
CT: control target
= control target key end

     0   :  { %vm97_vm0 = vcmask 261120   ;;  %vm235_vm1 = vcmask 64512   ;;  %vm373_vm5 = vcmask 392192   ;;  %s3877_s27 = smov 80   ;;  %s3878_s28 = smov 112   ;;  %vm1687_vm10 = vcmask 130048   ;;  %s4827_s7 = inlined_call_operand.vmem [shape: f32[32,96], index: 7, kind: input, shape index: {}]   ;;  %s4828_s0 = inlined_call_operand.vmem [shape: f32[48,32], index: 0, kind: input, shape index: {}]   ;;  %s4829_s1 = inlined_call_operand.vmem [shape: f32[48,32], index: 1, kind: input, shape index: {}]   ;;  %s4830_s8 = inlined_call_operand.vmem [shape: f32[1,96], index: 8, kind: input, shape index: {}]   ;;  %s4831_s2 = inlined_call_operand.vmem [shape: f32[48,48], index: 2, kind: input, shape index: {}]   ;;  %s4832_s9 = inlined_call_operand.vmem [shape: f32[32,32], index: 9, kind: input, shape index: {}]   ;;  %s4833_s10 = inlined_call_operand.vmem [shape: f32[1,32], index: 10, kind: input, shape index: {}]   ;;  %s4834_s11 = inlined_call_operand.vmem [shape: f32[32,64], index: 11, kind: input, shape index: {}]   ;;  %s4835_s13 = inlined_call_operand.vmem [shape: f32[64,32], index: 13, kind: input, shape index: {}]   ;;  %s4836_s15 = inlined_call_operand.vmem [shape: f32[1,32], index: 15, kind: input, shape index: {}]   ;;  %s4837_s16 = inlined_call_operand.vmem [shape: f32[1,32], index: 16, kind: input, shape index: {}]   ;;  %s4838_s12 = inlined_call_operand.vmem [shape: f32[1,64], index: 12, kind: input, shape index: {}]   ;;  %s4839_s14 = inlined_call_operand.vmem [shape: f32[1,32], index: 14, kind: input, shape index: {}]   ;;  %s4840_s17 = inlined_call_operand.vmem [shape: f32[1,32], index: 17, kind: input, shape index: {}]   ;;  %s4841_s18 = inlined_call_operand.vmem [shape: f32[1,32], index: 18, kind: input, shape index: {}]   ;;  %s4842_s3 = inlined_call_operand.vmem [shape: f32[2,8,16], index: 3, kind: input, shape index: {}]   ;;  %s4843_s5 = inlined_call_operand.vmem [shape: f32[1,11], index: 5, kind: input, shape index: {}]   ;;  %s4844_s4 = inlined_call_operand.vmem [shape: f32[1,11], index: 4, kind: input, shape index: {}]   ;;  %s4845_s6 = inlined_call_operand.vmem [shape: f32[1,2], index: 6, kind: input, shape index: {}]   ;;  %s4846_s19 = inlined_call_operand.vmem [shape: f32[2,1], index: 19, kind: output, shape index: {}]  }
   0x1   :  { %4850 = sst [smem:[#allocation2_spill]] %s4827_s7  ;;  %vm4082_vm2 = vmpackc.low %vm235_vm1, %vm235_vm1  ;;  %v4121_v63 = vld [vmem:[%s4831_s2 + $0x8] sm:$0xff]  ;;  %s3879_s7 = smov 48   ;;  %vm1694_vm11 = vcmask 195584   ;;  %vm2081_vm12 = vcmask 523264   ;;  %vm3887_vm13 = vmmov 0  }
   0x2   :  { %4851 = sst [smem:[#allocation3_spill]] %s4828_s0  ;;  %s4854_s20 = sld [smem:[#allocation2_spill]]  ;;  %vm362_vm3 = vcmp.gt.f32.partialorder %v4121_v63, 0.0  ;;  %vm3542_vm14 = vmpackc.low %vm97_vm0, %vm97_vm0 }
   0x3   :  { %4852 = sst [smem:[#allocation4_spill]] %s4829_s1  ;;  %s4855_s26 = sld [smem:[#allocation3_spill]] }
   0x4   :  { %4853 = sst [smem:[#allocation5_spill]] %s4830_s8  ;;  %s4856_s29 = sld [smem:[#allocation4_spill]] }
   0x5   :  { %s4857_s25 = sld [smem:[#allocation5_spill]]  ;;  %s3873_s8 = smov 64  }
   0x6   :  { %s3880_s30 = smov 72   ;;  %s3882_s21 = smov 40  }
   0x7   :  { %s3883_s0 = smov 8   ;;  %s3884_s22 = smov 16  }
   0x8   :  { %v86_v0 = vld [vmem:[%s4854_s20] sm:$0xff]  ;;  %v87_v1 = vld [vmem:[%s4854_s20 + $0x8] sm:$0xff]  ;;  %v88_v2 = vld [vmem:[%s4854_s20 + $0x10] sm:$0xff] }
   0x9   :  { %v3380_v3 = vpack.c.bf16 %v87_v1, %v86_v0  ;;  %v89_v4 = vld [vmem:[%s4854_s20 + $0x18] sm:$0xff]  ;;  %v62_v5 = vld [vmem:[%s4855_s26] sm:$0xff]  ;;  %v63_v9 = vld [vmem:[%s4855_s26 + $0x8] sm:$0xff]  ;;  %s3881_s20 = smov 104  }
   0xa   :  { %v68_v6 = vld [vmem:[%s4856_s29] sm:$0xff]  ;;  %v3384_v7 = vpack.c.bf16 %v89_v4, %v88_v2  ;;  %v69_v10 = vld [vmem:[%s4856_s29 + $0x8] sm:$0xff]  ;;  %v64_v11 = vld [vmem:[%s4855_s26 + $0x10] sm:$0xff] }
   0xb   :  { %v4008_v8 = vadd.f32 %v68_v6, %v62_v5  ;;  %3381 = vmatprep.subr.bf16.mxu0 %v3380_v3  ;;  %v70_v12 = vld [vmem:[%s4856_s29 + $0x10] sm:$0xff]  ;;  %v4024_v13 = vadd.f32 %v69_v10, %v63_v9  ;;  %v65_v15 = vld [vmem:[%s4855_s26 + $0x18] sm:$0xff]  ;;  %v66_v17 = vld [vmem:[%s4855_s26 + $0x20] sm:$0xff] }
   0xc   :  { %3383 = vmatpush3.bf16.msra.mxu0 %v3380_v3  ;;  %v4026_v14 = vadd.f32 %v70_v12, %v64_v11  ;;  %v71_v16 = vld [vmem:[%s4856_s29 + $0x18] sm:$0xff]  ;;  %v72_v18 = vld [vmem:[%s4856_s29 + $0x20] sm:$0xff]  ;;  %v67_v21 = vld [vmem:[%s4855_s26 + $0x28] sm:$0xff] }
   0xd   :  { %3130 = vmatprep.mubr.msk.f32.mxu0 %vm97_vm0, %v4008_v8  ;;  %3385 = vmatprep.subr.bf16.mxu0 %v3384_v7  ;;  %v4042_v19 = vadd.f32 %v71_v16, %v65_v15  ;;  %v4046_v20 = vadd.f32 %v72_v18, %v66_v17  ;;  %v73_v22 = vld [vmem:[%s4856_s29 + $0x28] sm:$0xff]  ;;  %v2843_v24 = vld [vmem:[%s4857_s25] ss:$0 sm:$0xff]  ;;  %s3872_s29 = smov 96   ;;  %v4133_v1 = vld [vmem:[%s4831_s2 + $0x18] sm:$0xff] }
   0xe   :  { %v4056_v23 = vadd.f32 %v73_v22, %v67_v21  ;;  %v4126_v0 = vld [vmem:[%s4831_s2] sm:$0xff]  ;;  %v4138_v3 = vld [vmem:[%s4831_s2 + $0x10] sm:$0xff]  ;;  %vm364_vm6 = vcmp.gt.f32.partialorder %v4133_v1, 0.0  ;;  %v4151_v10 = vld [vmem:[%s4831_s2 + $0x28] sm:$0xff] }
   0xf   :  { %vm361_vm4 = vcmp.gt.f32.partialorder %v4126_v0, 0.0  ;;  %vm363_vm7 = vcmp.gt.f32.partialorder %v4138_v3, 0.0  ;;  %v4156_v12 = vld [vmem:[%s4831_s2 + $0x20] sm:$0xff]  ;;  %vm366_vm8 = vcmp.gt.f32.partialorder %v4151_v10, 0.0  ;;  %s3874_s2 = smov 88  }
  0x10   :  { %3387 = vmatpush3.bf16.msra.mxu0 %v3384_v7  ;;  %vm365_vm9 = vcmp.gt.f32.partialorder %v4156_v12, 0.0 }
  0x13   :  { %3131 = vmatmul.mubr.msk.f32.vlgmr.msra.gmra.mrb[0].mxu0 %vm97_vm0, %v4024_v13 }
  0x14   :  { %3133 = vmatprep.mubr.msk.f32.mxu0 %vm97_vm0, %v4026_v14 }
  0x17   :  { %3134 = vmatmul.mubr.msk.f32.gmra.mrb[2].mxu0 %vm97_vm0, %v4042_v19 }
  0x18   :  { %3136 = vmatprep.mubr.msk.f32.mxu0 %vm97_vm0, %v4046_v20 }
  0x1b   :  { %3137 = vmatmul.mubr.msk.f32.gmra.mrb[4].mxu0 %vm97_vm0, %v4056_v23 }
  0xe6   :  { %v3132_v25 = vpop.f32.mrb[0].mxu0 }
  0xe7   :  { %v188_v26 = vadd.f32 %v3132_v25, %v2843_v24  ;;  %v182_v27 = vpop.f32.mrb[1].mxu0 }
  0xe8   :  { %v183_v28 = vadd.f32 %v2843_v24, %v182_v27 }
  0xe9   :  { %v4098_v58 = vmul.f32 0.35355338, %v188_v26 }
  0xea   :  { %v3135_v29 = vpop.f32.mrb[2].mxu0  ;;  %v4065_v30 = vpack.i.bf16 %v188_v26, %v183_v28  ;;  %v4067_v31 = vmul.f32 0.35355338, %v183_v28 }
  0xeb   :  { %v198_v32 = vadd.f32 %v3135_v29, %v2843_v24  ;;  %v192_v33 = vpop.f32.mrb[3].mxu0 }
  0xec   :  { %v193_v34 = vadd.f32 %v2843_v24, %v192_v33  ;;  %3567 = vrot.lane.b32.xlu0 %v4065_v30, %s3872_s29  ;;  %3151 = vmatprep.mubr.msk.f32.mxu1 %vm235_vm1, %v4067_v31 }
  0xed   :  { %v4106_v60 = vmul.f32 0.35355338, %v198_v32 }
  0xee   :  { %v4072_v35 = vpack.i.bf16 %v198_v32, %v193_v34  ;;  %v3138_v36 = vpop.f32.mrb[4].mxu0  ;;  %v4100_v59 = vmul.f32 0.35355338, %v193_v34 }
  0xef   :  { %v208_v37 = vadd.f32 %v3138_v36, %v2843_v24  ;;  %v202_v38 = vpop.f32.mrb[5].mxu0 }
  0xf0   :  { %3572 = vrot.lane.b32.xlu0 %v4072_v35, %s3872_s29  ;;  %v203_v39 = vadd.f32 %v2843_v24, %v202_v38 }
  0xf1   :  { %v4114_v62 = vmul.f32 0.35355338, %v208_v37 }
  0xf2   :  { %v4075_v40 = vpack.i.bf16 %v208_v37, %v203_v39  ;;  %v4108_v61 = vmul.f32 0.35355338, %v203_v39 }
  0xf4   :  { %3582 = vrot.lane.b32.xlu0 %v4065_v30, %s3873_s8  ;;  %3577 = vrot.lane.b32.xlu1 %v4075_v40, %s3872_s29  ;;  %s3875_s29 = smov 120  }
 0x15e   :  { %v3568_v41 = vpop.permute.xlu0 %3567 }
 0x15f   :  { %v3570_v42 = vunpack.i.h.bf16 %v3568_v41  ;;  %v3569_v43 = vunpack.i.l.bf16 %v3568_v41 }
 0x161   :  { %v3388_v45 = vpack.c.bf16 %v3570_v42, %v3569_v43 }
 0x162   :  { %v3573_v46 = vpop.permute.xlu0 %3572 }
 0x163   :  { %v3575_v47 = vunpack.i.h.bf16 %v3573_v46  ;;  %v3574_v48 = vunpack.i.l.bf16 %v3573_v46  ;;  %3390 = vmatprep.subr.msk.bf16.mxu1 %vm4082_vm2, %v3388_v45 }
 0x164   :  { %3393 = vmatpush3.bf16.xpose.msk.msra.mxu1 %vm4082_vm2, %v3388_v45 }
 0x165   :  { %v3394_v49 = vpack.c.bf16 %v3575_v47, %v3574_v48 }
 0x166   :  { %v3583_v50 = vpop.permute.xlu0 %3582  ;;  %v3578_v51 = vpop.permute.xlu1 %3577 }
 0x167   :  { %v3585_v52 = vunpack.i.h.bf16 %v3583_v50  ;;  %v3584_v53 = vunpack.i.l.bf16 %v3583_v50  ;;  %3396 = vmatprep.subr.msk.bf16.mxu1 %vm4082_vm2, %v3394_v49  ;;  %v3580_v54 = vunpack.i.h.bf16 %v3578_v51  ;;  %v3579_v55 = vunpack.i.l.bf16 %v3578_v51 }
 0x169   :  { %v3406_v56 = vpack.c.bf16 %v3585_v52, %v3584_v53  ;;  %v3400_v57 = vpack.c.bf16 %v3580_v54, %v3579_v55 }
 0x16b   :  { %3407 = vmatprep.subr.bf16.mxu0 %v3406_v56 }
 0x16c   :  { %3399 = vmatpush3.bf16.xpose.msk.msra.mxu1 %vm4082_vm2, %v3394_v49  ;;  %3409 = vmatpush3.bf16.msra.mxu0 %v3406_v56 }
 0x16d   :  { %3402 = vmatprep.subr.msk.bf16.mxu1 %vm4082_vm2, %v3400_v57 }
 0x174   :  { %3405 = vmatpush3.bf16.xpose.msk.msra.mxu1 %vm4082_vm2, %v3400_v57 }
 0x17b   :  { %3152 = vmatmul.mubr.msk.f32.vlgmr.msra.gmra.mrb[0].mxu1 %vm235_vm1, %v4098_v58 }
 0x17c   :  { %3154 = vmatprep.mubr.msk.f32.mxu1 %vm235_vm1, %v4100_v59 }
 0x17f   :  { %3155 = vmatmul.mubr.msk.f32.gmra.mrb[2].mxu1 %vm235_vm1, %v4106_v60 }
 0x180   :  { %3157 = vmatprep.mubr.msk.f32.mxu1 %vm235_vm1, %v4108_v61 }
 0x183   :  { %3158 = vmatmul.mubr.msk.f32.gmra.mrb[4].mxu1 %vm235_vm1, %v4114_v62 }
 0x24e   :  { %v3153_v2 = vpop.f32.mrb[0].mxu1 }
 0x24f   :  { %v368_v4 = vsel %vm362_vm3, %v3153_v2, -1e+30  ;;  %v332_v5 = vpop.f32.mrb[1].mxu1 }
 0x250   :  { %v367_v6 = vsel %vm361_vm4, %v332_v5, -1e+30  ;;  %v377_v7 = vsel %vm373_vm5, %v368_v4, -inf }
 0x251   :  { %378 = vmax.xlane.f32.xlu0 %v377_v7  ;;  %v374_v9 = vsel %vm373_vm5, %v367_v6, -inf }
 0x252   :  { %375 = vmax.xlane.f32.xlu1 %v374_v9  ;;  %v3156_v11 = vpop.f32.mrb[2].mxu1 }
 0x253   :  { %v370_v15 = vsel %vm364_vm6, %v3156_v11, -1e+30  ;;  %v342_v16 = vpop.f32.mrb[3].mxu1 }
 0x254   :  { %v369_v17 = vsel %vm363_vm7, %v342_v16, -1e+30  ;;  %v383_v18 = vsel %vm373_vm5, %v370_v15, -inf }
 0x255   :  { %v380_v21 = vsel %vm373_vm5, %v369_v17, -inf }
 0x256   :  { %384 = vmax.xlane.f32.xlu1 %v383_v18  ;;  %381 = vmax.xlane.f32.xlu0 %v380_v21  ;;  %v3159_v22 = vpop.f32.mrb[4].mxu1 }
 0x257   :  { %v372_v24 = vsel %vm366_vm8, %v3159_v22, -1e+30  ;;  %v352_v25 = vpop.f32.mrb[5].mxu1 }
 0x258   :  { %v371_v26 = vsel %vm365_vm9, %v352_v25, -1e+30  ;;  %v389_v27 = vsel %vm373_vm5, %v372_v24, -inf }
 0x259   :  { %v386_v28 = vsel %vm373_vm5, %v371_v26, -inf }
 0x25a   :  { %390 = vmax.xlane.f32.xlu1 %v389_v27  ;;  %387 = vmax.xlane.f32.xlu0 %v386_v28 }
 0x26b   :  { %3587 = vrot.lane.b32.xlu1 %v4072_v35, %s3873_s8 }
 0x270   :  { %3592 = vrot.lane.b32.xlu0 %v4075_v40, %s3873_s8  ;;  %s3876_s8 = smov 56  }
 0x2de   :  { %v379_v29 = vpop.xlane.xlu0 %378 }
 0x2df   :  { %v393_v32 = vsub.f32 %v368_v4, %v379_v29  ;;  %v376_v33 = vpop.xlane.xlu1 %375 }
 0x2e0   :  { %v392_v34 = vsub.f32 %v367_v6, %v376_v33 }
 0x2e1   :  { %v400_v36 = vmul.f32 1.442695, %v393_v32 }
 0x2e2   :  { %v398_v37 = vmul.f32 1.442695, %v392_v34 }
 0x2e3   :  { %3686 = vpow2.f32 %v400_v36  ;;  %v385_v38 = vpop.xlane.xlu1 %384  ;;  %v382_v39 = vpop.xlane.xlu0 %381 }
 0x2e4   :  { %3688 = vpow2.f32 %v398_v37  ;;  %v394_v56 = vsub.f32 %v369_v17, %v382_v39  ;;  %v395_v57 = vsub.f32 %v370_v15, %v385_v38 }
 0x2e6   :  { %v402_v2 = vmul.f32 1.442695, %v394_v56  ;;  %v404_v5 = vmul.f32 1.442695, %v395_v57 }
 0x2e7   :  { %v391_v41 = vpop.xlane.xlu1 %390  ;;  %v388_v42 = vpop.xlane.xlu0 %387 }
 0x2e8   :  { %v397_v4 = vsub.f32 %v372_v24, %v391_v41  ;;  %3690 = vpow2.f32 %v402_v2  ;;  %v396_v7 = vsub.f32 %v371_v26, %v388_v42 }
 0x2e9   :  { %3692 = vpow2.f32 %v404_v5 }
 0x2ea   :  { %v408_v6 = vmul.f32 1.442695, %v397_v4  ;;  %v406_v9 = vmul.f32 1.442695, %v396_v7 }
 0x2eb   :  { %v3588_v43 = vpop.permute.xlu1 %3587  ;;  %v3593_v45 = vpop.permute.xlu0 %3592 }
 0x2ec   :  { %v3590_v46 = vunpack.i.h.bf16 %v3588_v43  ;;  %v3589_v47 = vunpack.i.l.bf16 %v3588_v43  ;;  %v3595_v48 = vunpack.i.h.bf16 %v3593_v45  ;;  %v3594_v50 = vunpack.i.l.bf16 %v3593_v45 }
 0x2ed   :  { %v4176_v49 = vpop.eup %3686  ;;  %3694 = vpow2.f32 %v408_v6 }
 0x2ee   :  { %v3689_v51 = vpop.eup %3688  ;;  %v413_v52 = vsel %vm373_vm5, %v4176_v49, 0.0  ;;  %v3410_v53 = vpack.c.bf16 %v3590_v46, %v3589_v47  ;;  %v3414_v55 = vpack.c.bf16 %v3595_v48, %v3594_v50  ;;  %3696 = vpow2.f32 %v406_v9 }
 0x2ef   :  { %414 = vadd.xlane.f32.xlu1 %v413_v52  ;;  %v410_v54 = vsel %vm373_vm5, %v3689_v51, 0.0 }
 0x2f0   :  { %3411 = vmatprep.subr.bf16.mxu0 %v3410_v53  ;;  %411 = vadd.xlane.f32.xlu0 %v410_v54 }
 0x2f1   :  { %3413 = vmatpush3.bf16.msra.mxu0 %v3410_v53 }
 0x2f2   :  { %3415 = vmatprep.subr.bf16.mxu0 %v3414_v55  ;;  %v3691_v11 = vpop.eup %3690 }
 0x2f3   :  { %v3693_v16 = vpop.eup %3692  ;;  %v416_v18 = vsel %vm373_vm5, %v3691_v11, 0.0 }
 0x2f4   :  { %v419_v17 = vsel %vm373_vm5, %v3693_v16, 0.0 }
 0x2f5   :  { %3417 = vmatpush3.bf16.msra.mxu0 %v3414_v55 }
 0x2f7   :  { %v4184_v21 = vpop.eup %3694 }
 0x2f8   :  { %v425_v15 = vsel %vm373_vm5, %v4184_v21, 0.0  ;;  %v3697_v22 = vpop.eup %3696 }
 0x2f9   :  { %v422_v24 = vsel %vm373_vm5, %v3697_v22, 0.0 }
 0x300   :  { %3597 = vrot.lane.b32.xlu1 %v4065_v30, %s3874_s2 }
 0x306   :  { %3602 = vrot.lane.b32.xlu0 %v4072_v35, %s3874_s2 }
 0x324   :  { %417 = vadd.xlane.f32.xlu1 %v416_v18 }
 0x325   :  { %420 = vadd.xlane.f32.xlu0 %v419_v17 }
 0x328   :  { %426 = vadd.xlane.f32.xlu1 %v425_v15 }
 0x32c   :  { %423 = vadd.xlane.f32.xlu1 %v422_v24 }
 0x33b   :  { %3607 = vrot.lane.b32.xlu0 %v4075_v40, %s3874_s2 }
 0x33d   :  { %571 = vrot.lane.b32.xlu1 %v4067_v31, %s3875_s29 }
 0x33f   :  { %573 = vrot.lane.b32.xlu0 %v4098_v58, %s3875_s29 }
 0x341   :  { %575 = vrot.lane.b32.xlu1 %v4100_v59, %s3875_s29 }
 0x343   :  { %577 = vrot.lane.b32.xlu0 %v4106_v60, %s3875_s29 }
 0x345   :  { %579 = vrot.lane.b32.xlu1 %v4108_v61, %s3875_s29 }
 0x347   :  { %581 = vrot.lane.b32.xlu0 %v4114_v62, %s3875_s29 }
 0x34b   :  { %3612 = vrot.lane.b32.xlu0 %v4065_v30, %s3876_s8 }
 0x37c   :  { %v415_v25 = vpop.xlane.xlu1 %414 }
 0x37d   :  { %3698 = vrcp.f32 %v415_v25  ;;  %v412_v26 = vpop.xlane.xlu0 %411 }
 0x37e   :  { %3700 = vrcp.f32 %v412_v26 }
 0x380   :  { %v3598_v27 = vpop.permute.xlu1 %3597 }
 0x381   :  { %v3600_v28 = vunpack.i.h.bf16 %v3598_v27  ;;  %v3599_v29 = vunpack.i.l.bf16 %v3598_v27  ;;  %v3603_v33 = vpop.permute.xlu0 %3602 }
 0x382   :  { %v3605_v37 = vunpack.i.h.bf16 %v3603_v33  ;;  %v3604_v38 = vunpack.i.l.bf16 %v3603_v33 }
 0x383   :  { %v3418_v32 = vpack.c.bf16 %v3600_v28, %v3599_v29 }
 0x384   :  { %v3424_v42 = vpack.c.bf16 %v3605_v37, %v3604_v38 }
 0x385   :  { %3420 = vmatprep.subr.msk.bf16.mxu0 %vm4082_vm2, %v3418_v32 }
 0x387   :  { %v3699_v34 = vpop.eup %3698 }
 0x388   :  { %v3701_v36 = vpop.eup %3700  ;;  %v435_v41 = vmul.f32 %v3699_v34, %v4176_v49 }
 0x389   :  { %v434_v39 = vmul.f32 %v3701_v36, %v3689_v51 }
 0x38b   :  { %3172 = vmatprep.mubr.msk.f32.mxu0 %vm373_vm5, %v434_v39 }
 0x38c   :  { %3173 = vmatmul.mubr.msk.f32.vlgmr.msra.gmra.mrb[6].mxu0 %vm373_vm5, %v435_v41 }
 0x38d   :  { %3423 = vmatpush3.bf16.xpose.msk.msra.mxu0 %vm4082_vm2, %v3418_v32 }
 0x38e   :  { %3426 = vmatprep.subr.msk.bf16.mxu0 %vm4082_vm2, %v3424_v42 }
 0x395   :  { %3429 = vmatpush3.bf16.xpose.msk.msra.mxu0 %vm4082_vm2, %v3424_v42 }
 0x3b1   :  { %v418_v43 = vpop.xlane.xlu1 %417 }
 0x3b2   :  { %3702 = vrcp.f32 %v418_v43  ;;  %v421_v45 = vpop.xlane.xlu0 %420 }
 0x3b3   :  { %3704 = vrcp.f32 %v421_v45 }
 0x3b5   :  { %v427_v46 = vpop.xlane.xlu1 %426 }
 0x3b6   :  { %v3608_v47 = vpop.permute.xlu0 %3607  ;;  %3706 = vrcp.f32 %v427_v46 }
 0x3b7   :  { %v3610_v48 = vunpack.i.h.bf16 %v3608_v47  ;;  %v3609_v49 = vunpack.i.l.bf16 %v3608_v47 }
 0x3b9   :  { %v3430_v50 = vpack.c.bf16 %v3610_v48, %v3609_v49  ;;  %v424_v51 = vpop.xlane.xlu1 %423 }
 0x3ba   :  { %3708 = vrcp.f32 %v424_v51  ;;  %v574_v52 = vpop.permute.xlu0 %573 }
 0x3bb   :  { %3432 = vmatprep.subr.msk.bf16.mxu0 %vm4082_vm2, %v3430_v50 }
 0x3bc   :  { %v3703_v53 = vpop.eup %3702  ;;  %3435 = vmatpush3.bf16.xpose.msk.msra.mxu0 %vm4082_vm2, %v3430_v50 }
 0x3bd   :  { %v3705_v54 = vpop.eup %3704  ;;  %v436_v55 = vmul.f32 %v3703_v53, %v3691_v11  ;;  %v572_v6 = vpop.permute.xlu1 %571 }
 0x3be   :  { %v578_v56 = vpop.permute.xlu0 %577  ;;  %v437_v57 = vmul.f32 %v3705_v54, %v3693_v16 }
 0x3bf   :  { %3175 = vmatprep.mubr.msk.f32.mxu0 %vm373_vm5, %v436_v55 }
 0x3c0   :  { %3176 = vmatmul.mubr.msk.f32.gmra.mrb[8].mxu0 %vm373_vm5, %v437_v57  ;;  %v3707_v4 = vpop.eup %3706 }
 0x3c1   :  { %v439_v18 = vmul.f32 %v3707_v4, %v4184_v21  ;;  %v576_v16 = vpop.permute.xlu1 %575 }
 0x3c2   :  { %v582_v2 = vpop.permute.xlu0 %581 }
 0x3c4   :  { %v3709_v5 = vpop.eup %3708 }
 0x3c5   :  { %v438_v7 = vmul.f32 %v3709_v5, %v3697_v22  ;;  %v580_v22 = vpop.permute.xlu1 %579 }
 0x3c6   :  { %v3613_v9 = vpop.permute.xlu0 %3612 }
 0x3c7   :  { %v3615_v17 = vunpack.i.h.bf16 %v3613_v9  ;;  %v3614_v15 = vunpack.i.l.bf16 %v3613_v9  ;;  %3178 = vmatprep.mubr.msk.f32.mxu0 %vm373_vm5, %v438_v7 }
 0x3c8   :  { %3179 = vmatmul.mubr.msk.f32.gmra.mrb[10].mxu0 %vm373_vm5, %v439_v18 }
 0x3c9   :  { %3193 = vmatprep.mubr.msk.f32.mxu0 %vm235_vm1, %v572_v6  ;;  %v3436_v11 = vpack.c.bf16 %v3615_v17, %v3614_v15 }
 0x3cb   :  { %3437 = vmatprep.subr.bf16.mxu1 %v3436_v11 }
 0x3cc   :  { %3194 = vmatmul.mubr.msk.f32.vlgmr.msra.gmra.mrb[12].mxu0 %vm235_vm1, %v574_v52  ;;  %3439 = vmatpush3.bf16.msra.mxu1 %v3436_v11 }
 0x3cd   :  { %3196 = vmatprep.mubr.msk.f32.mxu0 %vm235_vm1, %v576_v16 }
 0x3d0   :  { %3197 = vmatmul.mubr.msk.f32.gmra.mrb[14].mxu0 %vm235_vm1, %v578_v56 }
 0x3d1   :  { %3199 = vmatprep.mubr.msk.f32.mxu0 %vm235_vm1, %v580_v22 }
 0x3d4   :  { %3200 = vmatmul.mubr.msk.f32.gmra.mrb[16].mxu0 %vm235_vm1, %v582_v2 }
 0x45f   :  { %v4225_v21 = vpop.f32.mrb[6].mxu0 }
 0x460   :  { %v4227_v24 = vpop.f32.mrb[7].mxu0 }
 0x493   :  { %v4229_v25 = vpop.f32.mrb[8].mxu0 }
 0x494   :  { %v4231_v26 = vpop.f32.mrb[9].mxu0 }
 0x49b   :  { %v4233_v27 = vpop.f32.mrb[10].mxu0 }
 0x49c   :  { %v4235_v28 = vpop.f32.mrb[11].mxu0 }
 0x49f   :  { %v3195_v29 = vpop.f32.mrb[12].mxu0 }
 0x4a0   :  { %v715_v32 = vsel %vm362_vm3, %v3195_v29, -1e+30  ;;  %v685_v33 = vpop.f32.mrb[13].mxu0 }
 0x4a1   :  { %v714_v34 = vsel %vm361_vm4, %v685_v33, -1e+30  ;;  %v723_v36 = vsel %vm373_vm5, %v715_v32, -inf }
 0x4a2   :  { %724 = vmax.xlane.f32.xlu0 %v723_v36  ;;  %v720_v37 = vsel %vm373_vm5, %v714_v34, -inf }
 0x4a3   :  { %721 = vmax.xlane.f32.xlu1 %v720_v37  ;;  %v3198_v38 = vpop.f32.mrb[14].mxu0 }
 0x4a4   :  { %v717_v39 = vsel %vm364_vm6, %v3198_v38, -1e+30  ;;  %v695_v41 = vpop.f32.mrb[15].mxu0 }
 0x4a5   :  { %v716_v42 = vsel %vm363_vm7, %v695_v41, -1e+30  ;;  %v729_v43 = vsel %vm373_vm5, %v717_v39, -inf }
 0x4a6   :  { %v726_v45 = vsel %vm373_vm5, %v716_v42, -inf }
 0x4a7   :  { %730 = vmax.xlane.f32.xlu1 %v729_v43  ;;  %727 = vmax.xlane.f32.xlu0 %v726_v45  ;;  %v3201_v46 = vpop.f32.mrb[16].mxu0 }
 0x4a8   :  { %v719_v47 = vsel %vm366_vm8, %v3201_v46, -1e+30  ;;  %v705_v48 = vpop.f32.mrb[17].mxu0 }
 0x4a9   :  { %v718_v49 = vsel %vm365_vm9, %v705_v48, -1e+30  ;;  %v735_v50 = vsel %vm373_vm5, %v719_v47, -inf }
 0x4aa   :  { %v732_v51 = vsel %vm373_vm5, %v718_v49, -inf }
 0x4ab   :  { %736 = vmax.xlane.f32.xlu1 %v735_v50  ;;  %733 = vmax.xlane.f32.xlu0 %v732_v51 }
 0x4bc   :  { %3617 = vrot.lane.b32.xlu1 %v4072_v35, %s3876_s8 }
 0x4c1   :  { %3622 = vrot.lane.b32.xlu0 %v4075_v40, %s3876_s8 }
 0x52f   :  { %v725_v52 = vpop.xlane.xlu0 %724 }
 0x530   :  { %v739_v53 = vsub.f32 %v715_v32, %v725_v52  ;;  %v722_v54 = vpop.xlane.xlu1 %721 }
 0x531   :  { %v738_v55 = vsub.f32 %v714_v34, %v722_v54 }
 0x532   :  { %v746_v56 = vmul.f32 1.442695, %v739_v53 }
 0x533   :  { %v744_v57 = vmul.f32 1.442695, %v738_v55 }
 0x534   :  { %3710 = vpow2.f32 %v746_v56  ;;  %v731_v2 = vpop.xlane.xlu1 %730  ;;  %v728_v4 = vpop.xlane.xlu0 %727 }
 0x535   :  { %3712 = vpow2.f32 %v744_v57  ;;  %v740_v36 = vsub.f32 %v716_v42, %v728_v4  ;;  %v741_v37 = vsub.f32 %v717_v39, %v731_v2 }
 0x537   :  { %v748_v38 = vmul.f32 1.442695, %v740_v36  ;;  %v750_v43 = vmul.f32 1.442695, %v741_v37 }
 0x538   :  { %v737_v5 = vpop.xlane.xlu1 %736  ;;  %v734_v6 = vpop.xlane.xlu0 %733 }
 0x539   :  { %v743_v41 = vsub.f32 %v719_v47, %v737_v5  ;;  %3714 = vpow2.f32 %v748_v38  ;;  %v742_v46 = vsub.f32 %v718_v49, %v734_v6 }
 0x53a   :  { %3716 = vpow2.f32 %v750_v43 }
 0x53b   :  { %v754_v45 = vmul.f32 1.442695, %v743_v41  ;;  %v752_v48 = vmul.f32 1.442695, %v742_v46 }
 0x53c   :  { %v3618_v7 = vpop.permute.xlu1 %3617  ;;  %v3623_v9 = vpop.permute.xlu0 %3622 }
 0x53d   :  { %v3620_v18 = vunpack.i.h.bf16 %v3618_v7  ;;  %v3619_v17 = vunpack.i.l.bf16 %v3618_v7  ;;  %v3625_v15 = vunpack.i.h.bf16 %v3623_v9  ;;  %v3624_v16 = vunpack.i.l.bf16 %v3623_v9 }
 0x53e   :  { %v4259_v11 = vpop.eup %3710  ;;  %3718 = vpow2.f32 %v754_v45 }
 0x53f   :  { %v4261_v22 = vpop.eup %3712  ;;  %v759_v29 = vsel %vm373_vm5, %v4259_v11, 0.0  ;;  %v3440_v32 = vpack.c.bf16 %v3620_v18, %v3619_v17  ;;  %v3444_v34 = vpack.c.bf16 %v3625_v15, %v3624_v16  ;;  %3720 = vpow2.f32 %v752_v48 }
 0x540   :  { %760 = vadd.xlane.f32.xlu1 %v759_v29  ;;  %v756_v33 = vsel %vm373_vm5, %v4261_v22, 0.0 }
 0x541   :  { %3441 = vmatprep.subr.bf16.mxu1 %v3440_v32  ;;  %757 = vadd.xlane.f32.xlu0 %v756_v33 }
 0x542   :  { %3443 = vmatpush3.bf16.msra.mxu1 %v3440_v32 }
 0x543   :  { %3445 = vmatprep.subr.bf16.mxu1 %v3444_v34  ;;  %v4269_v50 = vpop.eup %3714 }
 0x544   :  { %v4271_v51 = vpop.eup %3716  ;;  %v762_v52 = vsel %vm373_vm5, %v4269_v50, 0.0 }
 0x545   :  { %v765_v39 = vsel %vm373_vm5, %v4271_v51, 0.0 }
 0x546   :  { %3447 = vmatpush3.bf16.msra.mxu1 %v3444_v34 }
 0x548   :  { %v4275_v53 = vpop.eup %3718 }
 0x549   :  { %v771_v42 = vsel %vm373_vm5, %v4275_v53, 0.0  ;;  %v4281_v47 = vpop.eup %3720 }
 0x54a   :  { %v768_v49 = vsel %vm373_vm5, %v4281_v47, 0.0 }
 0x551   :  { %3627 = vrot.lane.b32.xlu1 %v4065_v30, %s3877_s27 }
 0x557   :  { %3632 = vrot.lane.b32.xlu0 %v4072_v35, %s3877_s27 }
 0x575   :  { %763 = vadd.xlane.f32.xlu1 %v762_v52 }
 0x576   :  { %766 = vadd.xlane.f32.xlu0 %v765_v39 }
 0x579   :  { %772 = vadd.xlane.f32.xlu1 %v771_v42 }
 0x57d   :  { %769 = vadd.xlane.f32.xlu1 %v768_v49 }
 0x58c   :  { %3637 = vrot.lane.b32.xlu0 %v4075_v40, %s3877_s27 }
 0x58e   :  { %917 = vrot.lane.b32.xlu1 %v4067_v31, %s3878_s28 }
 0x590   :  { %919 = vrot.lane.b32.xlu0 %v4098_v58, %s3878_s28 }
 0x592   :  { %921 = vrot.lane.b32.xlu1 %v4100_v59, %s3878_s28 }
 0x594   :  { %923 = vrot.lane.b32.xlu0 %v4106_v60, %s3878_s28 }
 0x596   :  { %925 = vrot.lane.b32.xlu1 %v4108_v61, %s3878_s28 }
 0x598   :  { %927 = vrot.lane.b32.xlu0 %v4114_v62, %s3878_s28  ;;  %s3885_s28 = smov 24  }
 0x59a   :  { %3647 = vrot.lane.b32.xlu1 %v4072_v35, %s3879_s7 }
 0x59c   :  { %3642 = vrot.lane.b32.xlu0 %v4065_v30, %s3879_s7 }
 0x5cd   :  { %v761_v54 = vpop.xlane.xlu1 %760 }
 0x5ce   :  { %3722 = vrcp.f32 %v761_v54  ;;  %v758_v55 = vpop.xlane.xlu0 %757 }
 0x5cf   :  { %3724 = vrcp.f32 %v758_v55 }
 0x5d1   :  { %v3628_v56 = vpop.permute.xlu1 %3627 }
 0x5d2   :  { %v3630_v57 = vunpack.i.h.bf16 %v3628_v56  ;;  %v3629_v2 = vunpack.i.l.bf16 %v3628_v56  ;;  %v3633_v5 = vpop.permute.xlu0 %3632 }
 0x5d3   :  { %v3635_v9 = vunpack.i.h.bf16 %v3633_v5  ;;  %v3634_v18 = vunpack.i.l.bf16 %v3633_v5 }
 0x5d4   :  { %v3448_v4 = vpack.c.bf16 %v3630_v57, %v3629_v2 }
 0x5d5   :  { %v3454_v16 = vpack.c.bf16 %v3635_v9, %v3634_v18 }
 0x5d6   :  { %3450 = vmatprep.subr.msk.bf16.mxu1 %vm4082_vm2, %v3448_v4 }
 0x5d8   :  { %v3723_v6 = vpop.eup %3722 }
 0x5d9   :  { %v3725_v7 = vpop.eup %3724  ;;  %v781_v15 = vmul.f32 %v3723_v6, %v4259_v11 }
 0x5da   :  { %v780_v17 = vmul.f32 %v3725_v7, %v4261_v22 }
 0x5dc   :  { %3214 = vmatprep.mubr.msk.f32.mxu1 %vm373_vm5, %v780_v17 }
 0x5dd   :  { %3215 = vmatmul.mubr.msk.f32.vlgmr.msra.gmra.mrb[6].mxu1 %vm373_vm5, %v781_v15 }
 0x5de   :  { %3453 = vmatpush3.bf16.xpose.msk.msra.mxu1 %vm4082_vm2, %v3448_v4 }
 0x5df   :  { %3456 = vmatprep.subr.msk.bf16.mxu1 %vm4082_vm2, %v3454_v16 }
 0x5e6   :  { %3459 = vmatpush3.bf16.xpose.msk.msra.mxu1 %vm4082_vm2, %v3454_v16 }
 0x602   :  { %v764_v29 = vpop.xlane.xlu1 %763 }
 0x603   :  { %3726 = vrcp.f32 %v764_v29  ;;  %v767_v32 = vpop.xlane.xlu0 %766 }
 0x604   :  { %3728 = vrcp.f32 %v767_v32 }
 0x606   :  { %v773_v22 = vpop.xlane.xlu1 %772 }
 0x607   :  { %v3638_v11 = vpop.permute.xlu0 %3637  ;;  %3730 = vrcp.f32 %v773_v22 }
 0x608   :  { %v3640_v33 = vunpack.i.h.bf16 %v3638_v11  ;;  %v3639_v34 = vunpack.i.l.bf16 %v3638_v11 }
 0x60a   :  { %v3460_v36 = vpack.c.bf16 %v3640_v33, %v3639_v34  ;;  %v770_v37 = vpop.xlane.xlu1 %769 }
 0x60b   :  { %3732 = vrcp.f32 %v770_v37  ;;  %v920_v38 = vpop.permute.xlu0 %919 }
 0x60c   :  { %3462 = vmatprep.subr.msk.bf16.mxu1 %vm4082_vm2, %v3460_v36 }
 0x60d   :  { %v3727_v41 = vpop.eup %3726  ;;  %3465 = vmatpush3.bf16.xpose.msk.msra.mxu1 %vm4082_vm2, %v3460_v36 }
 0x60e   :  { %v3729_v43 = vpop.eup %3728  ;;  %v918_v45 = vpop.permute.xlu1 %917  ;;  %v782_v46 = vmul.f32 %v3727_v41, %v4269_v50 }
 0x60f   :  { %v924_v48 = vpop.permute.xlu0 %923  ;;  %v783_v52 = vmul.f32 %v3729_v43, %v4271_v51 }
 0x610   :  { %3217 = vmatprep.mubr.msk.f32.mxu1 %vm373_vm5, %v782_v46 }
 0x611   :  { %3218 = vmatmul.mubr.msk.f32.gmra.mrb[8].mxu1 %vm373_vm5, %v783_v52  ;;  %v3731_v49 = vpop.eup %3730 }
 0x612   :  { %v922_v39 = vpop.permute.xlu1 %921  ;;  %v785_v2 = vmul.f32 %v3731_v49, %v4275_v53 }
 0x613   :  { %v928_v42 = vpop.permute.xlu0 %927 }
 0x615   :  { %v3733_v54 = vpop.eup %3732 }
 0x616   :  { %v926_v55 = vpop.permute.xlu1 %925  ;;  %v784_v56 = vmul.f32 %v3733_v54, %v4281_v47 }
 0x617   :  { %v3643_v57 = vpop.permute.xlu0 %3642 }
 0x618   :  { %v3645_v4 = vunpack.i.h.bf16 %v3643_v57  ;;  %v3644_v5 = vunpack.i.l.bf16 %v3643_v57  ;;  %3220 = vmatprep.mubr.msk.f32.mxu1 %vm373_vm5, %v784_v56 }
 0x619   :  { %3221 = vmatmul.mubr.msk.f32.gmra.mrb[10].mxu1 %vm373_vm5, %v785_v2 }
 0x61a   :  { %v3648_v50 = vpop.permute.xlu1 %3647  ;;  %3235 = vmatprep.mubr.msk.f32.mxu1 %vm235_vm1, %v918_v45  ;;  %v3466_v51 = vpack.c.bf16 %v3645_v4, %v3644_v5 }
 0x61b   :  { %v3650_v6 = vunpack.i.h.bf16 %v3648_v50  ;;  %v3649_v7 = vunpack.i.l.bf16 %v3648_v50 }
 0x61c   :  { %3467 = vmatprep.subr.bf16.mxu0 %v3466_v51 }
 0x61d   :  { %3236 = vmatmul.mubr.msk.f32.vlgmr.msra.gmra.mrb[12].mxu1 %vm235_vm1, %v920_v38  ;;  %3469 = vmatpush3.bf16.msra.mxu0 %v3466_v51  ;;  %v3470_v47 = vpack.c.bf16 %v3650_v6, %v3649_v7 }
 0x61e   :  { %3238 = vmatprep.mubr.msk.f32.mxu1 %vm235_vm1, %v922_v39 }
 0x61f   :  { %3471 = vmatprep.subr.bf16.mxu0 %v3470_v47 }
 0x621   :  { %3239 = vmatmul.mubr.msk.f32.gmra.mrb[14].mxu1 %vm235_vm1, %v924_v48  ;;  %3473 = vmatpush3.bf16.msra.mxu0 %v3470_v47 }
 0x622   :  { %3241 = vmatprep.mubr.msk.f32.mxu1 %vm235_vm1, %v926_v55 }
 0x625   :  { %3242 = vmatmul.mubr.msk.f32.gmra.mrb[16].mxu1 %vm235_vm1, %v928_v42 }
 0x6b0   :  { %v4326_v53 = vpop.f32.mrb[6].mxu1 }
 0x6b1   :  { %v4328_v9 = vpop.f32.mrb[7].mxu1 }
 0x6e4   :  { %v4330_v18 = vpop.f32.mrb[8].mxu1 }
 0x6e5   :  { %v4332_v17 = vpop.f32.mrb[9].mxu1 }
 0x6ec   :  { %v4334_v15 = vpop.f32.mrb[10].mxu1 }
 0x6ed   :  { %v4336_v16 = vpop.f32.mrb[11].mxu1 }
 0x6f0   :  { %v3237_v29 = vpop.f32.mrb[12].mxu1 }
 0x6f1   :  { %v1061_v32 = vsel %vm362_vm3, %v3237_v29, -1e+30  ;;  %v1031_v22 = vpop.f32.mrb[13].mxu1 }
 0x6f2   :  { %v1060_v11 = vsel %vm361_vm4, %v1031_v22, -1e+30  ;;  %v1069_v33 = vsel %vm373_vm5, %v1061_v32, -inf }
 0x6f3   :  { %1070 = vmax.xlane.f32.xlu0 %v1069_v33  ;;  %v1066_v34 = vsel %vm373_vm5, %v1060_v11, -inf }
 0x6f4   :  { %1067 = vmax.xlane.f32.xlu1 %v1066_v34  ;;  %v3240_v36 = vpop.f32.mrb[14].mxu1 }
 0x6f5   :  { %v1063_v37 = vsel %vm364_vm6, %v3240_v36, -1e+30  ;;  %v1041_v38 = vpop.f32.mrb[15].mxu1 }
 0x6f6   :  { %v1062_v41 = vsel %vm363_vm7, %v1041_v38, -1e+30  ;;  %v1075_v43 = vsel %vm373_vm5, %v1063_v37, -inf }
 0x6f7   :  { %v1072_v45 = vsel %vm373_vm5, %v1062_v41, -inf }
 0x6f8   :  { %1076 = vmax.xlane.f32.xlu1 %v1075_v43  ;;  %1073 = vmax.xlane.f32.xlu0 %v1072_v45  ;;  %v3243_v46 = vpop.f32.mrb[16].mxu1 }
 0x6f9   :  { %v1065_v48 = vsel %vm366_vm8, %v3243_v46, -1e+30  ;;  %v1051_v52 = vpop.f32.mrb[17].mxu1 }
 0x6fa   :  { %v1064_v39 = vsel %vm365_vm9, %v1051_v52, -1e+30  ;;  %v1081_v42 = vsel %vm373_vm5, %v1065_v48, -inf }
 0x6fb   :  { %v1078_v49 = vsel %vm373_vm5, %v1064_v39, -inf }
 0x6fc   :  { %1082 = vmax.xlane.f32.xlu1 %v1081_v42  ;;  %1079 = vmax.xlane.f32.xlu0 %v1078_v49 }
 0x70d   :  { %3657 = vrot.lane.b32.xlu1 %v4065_v30, %s3880_s30 }
 0x712   :  { %3652 = vrot.lane.b32.xlu0 %v4075_v40, %s3879_s7 }
 0x780   :  { %v1071_v54 = vpop.xlane.xlu0 %1070 }
 0x781   :  { %v1085_v55 = vsub.f32 %v1061_v32, %v1071_v54  ;;  %v1068_v56 = vpop.xlane.xlu1 %1067 }
 0x782   :  { %v1084_v57 = vsub.f32 %v1060_v11, %v1068_v56 }
 0x783   :  { %v1092_v2 = vmul.f32 1.442695, %v1085_v55 }
 0x784   :  { %v1090_v4 = vmul.f32 1.442695, %v1084_v57 }
 0x785   :  { %3734 = vpow2.f32 %v1092_v2  ;;  %v1077_v5 = vpop.xlane.xlu1 %1076  ;;  %v1074_v50 = vpop.xlane.xlu0 %1073 }
 0x786   :  { %3736 = vpow2.f32 %v1090_v4  ;;  %v1086_v46 = vsub.f32 %v1062_v41, %v1074_v50  ;;  %v1087_v52 = vsub.f32 %v1063_v37, %v1077_v5 }
 0x788   :  { %v1094_v42 = vmul.f32 1.442695, %v1086_v46  ;;  %v1096_v54 = vmul.f32 1.442695, %v1087_v52 }
 0x789   :  { %v1083_v51 = vpop.xlane.xlu1 %1082  ;;  %v1080_v6 = vpop.xlane.xlu0 %1079 }
 0x78a   :  { %v1089_v49 = vsub.f32 %v1065_v48, %v1083_v51  ;;  %3738 = vpow2.f32 %v1094_v42  ;;  %v1088_v56 = vsub.f32 %v1064_v39, %v1080_v6 }
 0x78b   :  { %3740 = vpow2.f32 %v1096_v54 }
 0x78c   :  { %v1100_v55 = vmul.f32 1.442695, %v1089_v49  ;;  %v1098_v57 = vmul.f32 1.442695, %v1088_v56 }
 0x78d   :  { %v3658_v7 = vpop.permute.xlu1 %3657  ;;  %v3653_v47 = vpop.permute.xlu0 %3652 }
 0x78e   :  { %v3655_v29 = vunpack.i.h.bf16 %v3653_v47  ;;  %v3660_v33 = vunpack.i.h.bf16 %v3658_v7  ;;  %v3659_v34 = vunpack.i.l.bf16 %v3658_v7  ;;  %v3654_v36 = vunpack.i.l.bf16 %v3653_v47 }
 0x78f   :  { %v3735_v22 = vpop.eup %3734  ;;  %3742 = vpow2.f32 %v1100_v55 }
 0x790   :  { %v3737_v38 = vpop.eup %3736  ;;  %v1105_v32 = vsel %vm373_vm5, %v3735_v22, 0.0  ;;  %v3474_v43 = vpack.c.bf16 %v3655_v29, %v3654_v36  ;;  %v3478_v45 = vpack.c.bf16 %v3660_v33, %v3659_v34  ;;  %3744 = vpow2.f32 %v1098_v57 }
 0x791   :  { %1106 = vadd.xlane.f32.xlu1 %v1105_v32  ;;  %v1102_v11 = vsel %vm373_vm5, %v3737_v38, 0.0 }
 0x792   :  { %1103 = vadd.xlane.f32.xlu0 %v1102_v11  ;;  %3475 = vmatprep.subr.bf16.mxu0 %v3474_v43 }
 0x793   :  { %3477 = vmatpush3.bf16.msra.mxu0 %v3474_v43 }
 0x794   :  { %3480 = vmatprep.subr.msk.bf16.mxu0 %vm4082_vm2, %v3478_v45  ;;  %v3739_v2 = vpop.eup %3738 }
 0x795   :  { %v3741_v4 = vpop.eup %3740  ;;  %v1108_v7 = vsel %vm373_vm5, %v3739_v2, 0.0 }
 0x796   :  { %v1111_v47 = vsel %vm373_vm5, %v3741_v4, 0.0 }
 0x7a2   :  { %1263 = vrot.lane.b32.xlu1 %v4067_v31, %s3881_s20  ;;  %v3743_v31 = vpop.eup %3742 }
 0x7a3   :  { %v1117_v37 = vsel %vm373_vm5, %v3743_v31, 0.0  ;;  %v3745_v41 = vpop.eup %3744 }
 0x7a4   :  { %v1114_v48 = vsel %vm373_vm5, %v3745_v41, 0.0 }
 0x7a8   :  { %3662 = vrot.lane.b32.xlu0 %v4072_v35, %s3880_s30 }
 0x7c6   :  { %1109 = vadd.xlane.f32.xlu1 %v1108_v7 }
 0x7c7   :  { %1112 = vadd.xlane.f32.xlu0 %v1111_v47 }
 0x7ca   :  { %1118 = vadd.xlane.f32.xlu1 %v1117_v37 }
 0x7ce   :  { %1115 = vadd.xlane.f32.xlu1 %v1114_v48 }
 0x7dd   :  { %3667 = vrot.lane.b32.xlu0 %v4075_v40, %s3880_s30 }
 0x7df   :  { %1267 = vrot.lane.b32.xlu1 %v4100_v59, %s3881_s20 }
 0x7e1   :  { %1265 = vrot.lane.b32.xlu0 %v4098_v58, %s3881_s20 }
 0x7e3   :  { %1271 = vrot.lane.b32.xlu1 %v4108_v61, %s3881_s20 }
 0x7e5   :  { %1269 = vrot.lane.b32.xlu0 %v4106_v60, %s3881_s20 }
 0x7e9   :  { %1273 = vrot.lane.b32.xlu0 %v4114_v62, %s3881_s20 }
 0x81e   :  { %v1107_v39 = vpop.xlane.xlu1 %1106 }
 0x81f   :  { %3746 = vrcp.f32 %v1107_v39  ;;  %v1104_v5 = vpop.xlane.xlu0 %1103 }
 0x820   :  { %3748 = vrcp.f32 %v1104_v5 }
 0x822   :  { %v1264_v60 = vpop.permute.xlu1 %1263 }
 0x823   :  { %v3663_v50 = vpop.permute.xlu0 %3662 }
 0x824   :  { %v3665_v59 = vunpack.i.h.bf16 %v3663_v50  ;;  %v3664_v29 = vunpack.i.l.bf16 %v3663_v50 }
 0x826   :  { %v3484_v61 = vpack.c.bf16 %v3665_v59, %v3664_v29 }
 0x829   :  { %v3747_v51 = vpop.eup %3746 }
 0x82a   :  { %v3749_v6 = vpop.eup %3748  ;;  %v1127_v58 = vmul.f32 %v3747_v51, %v3735_v22 }
 0x82b   :  { %v1126_v33 = vmul.f32 %v3749_v6, %v3737_v38 }
 0x82d   :  { %3256 = vmatprep.mubr.msk.f32.mxu0 %vm373_vm5, %v1126_v33 }
 0x82e   :  { %3257 = vmatmul.mubr.msk.f32.vlgmr.msra.gmra.mrb[18].mxu0 %vm373_vm5, %v1127_v58 }
 0x82f   :  { %3483 = vmatpush3.bf16.xpose.msk.msra.mxu0 %vm4082_vm2, %v3478_v45 }
 0x830   :  { %3486 = vmatprep.subr.msk.bf16.mxu0 %vm4082_vm2, %v3484_v61 }
 0x837   :  { %3489 = vmatpush3.bf16.xpose.msk.msra.mxu0 %vm4082_vm2, %v3484_v61 }
 0x853   :  { %v1110_v62 = vpop.xlane.xlu1 %1109 }
 0x854   :  { %3750 = vrcp.f32 %v1110_v62  ;;  %v1113_v34 = vpop.xlane.xlu0 %1112 }
 0x855   :  { %3752 = vrcp.f32 %v1113_v34 }
 0x857   :  { %v1119_v22 = vpop.xlane.xlu1 %1118 }
 0x858   :  { %v3668_v36 = vpop.permute.xlu0 %3667  ;;  %3754 = vrcp.f32 %v1119_v22 }
 0x859   :  { %v3670_v38 = vunpack.i.h.bf16 %v3668_v36  ;;  %v3669_v32 = vunpack.i.l.bf16 %v3668_v36 }
 0x85b   :  { %v3490_v11 = vpack.c.bf16 %v3670_v38, %v3669_v32  ;;  %v1116_v43 = vpop.xlane.xlu1 %1115 }
 0x85c   :  { %3756 = vrcp.f32 %v1116_v43  ;;  %v1266_v57 = vpop.permute.xlu0 %1265 }
 0x85d   :  { %3492 = vmatprep.subr.msk.bf16.mxu0 %vm4082_vm2, %v3490_v11 }
 0x85e   :  { %v3751_v45 = vpop.eup %3750  ;;  %3495 = vmatpush3.bf16.xpose.msk.msra.mxu0 %vm4082_vm2, %v3490_v11  ;;  %vm2549_vm2 = vcmask 7168  }
 0x85f   :  { %v3753_v46 = vpop.eup %3752  ;;  %v1128_v52 = vmul.f32 %v3751_v45, %v3739_v2  ;;  %v1268_v44 = vpop.permute.xlu1 %1267 }
 0x860   :  { %v1129_v42 = vmul.f32 %v3753_v46, %v3741_v4  ;;  %v1270_v2 = vpop.permute.xlu0 %1269 }
 0x861   :  { %3259 = vmatprep.mubr.msk.f32.mxu0 %vm373_vm5, %v1128_v52 }
 0x862   :  { %3260 = vmatmul.mubr.msk.f32.gmra.mrb[20].mxu0 %vm373_vm5, %v1129_v42  ;;  %v3755_v49 = vpop.eup %3754 }
 0x863   :  { %v1131_v56 = vmul.f32 %v3755_v49, %v3743_v31  ;;  %v1272_v4 = vpop.permute.xlu1 %1271 }
 0x864   :  { %v1274_v7 = vpop.permute.xlu0 %1273 }
 0x866   :  { %v3757_v54 = vpop.eup %3756 }
 0x867   :  { %v1130_v55 = vmul.f32 %v3757_v54, %v3745_v41 }
 0x869   :  { %3262 = vmatprep.mubr.msk.f32.mxu0 %vm373_vm5, %v1130_v55 }
 0x86a   :  { %3263 = vmatmul.mubr.msk.f32.gmra.mrb[22].mxu0 %vm373_vm5, %v1131_v56 }
 0x86b   :  { %3277 = vmatprep.mubr.msk.f32.mxu0 %vm235_vm1, %v1264_v60 }
 0x86e   :  { %3278 = vmatmul.mubr.msk.f32.vlgmr.msra.gmra.mrb[24].mxu0 %vm235_vm1, %v1266_v57 }
 0x86f   :  { %3280 = vmatprep.mubr.msk.f32.mxu0 %vm235_vm1, %v1268_v44 }
 0x872   :  { %3281 = vmatmul.mubr.msk.f32.gmra.mrb[26].mxu0 %vm235_vm1, %v1270_v2 }
 0x873   :  { %3283 = vmatprep.mubr.msk.f32.mxu0 %vm235_vm1, %v1272_v4 }
 0x876   :  { %3284 = vmatmul.mubr.msk.f32.gmra.mrb[28].mxu0 %vm235_vm1, %v1274_v7 }
 0x901   :  { %v4406_v31 = vpop.f32.mrb[18].mxu0 }
 0x902   :  { %v4408_v47 = vpop.f32.mrb[19].mxu0 }
 0x935   :  { %v4410_v37 = vpop.f32.mrb[20].mxu0 }
 0x936   :  { %v4412_v41 = vpop.f32.mrb[21].mxu0 }
 0x93d   :  { %v4414_v48 = vpop.f32.mrb[22].mxu0 }
 0x93e   :  { %v4416_v39 = vpop.f32.mrb[23].mxu0 }
 0x941   :  { %v3279_v5 = vpop.f32.mrb[24].mxu0 }
 0x942   :  { %v1407_v50 = vsel %vm362_vm3, %v3279_v5, -1e+30  ;;  %v1377_v51 = vpop.f32.mrb[25].mxu0  ;;  %vm2551_vm3 = vcmask 15360  }
 0x943   :  { %v1406_v6 = vsel %vm361_vm4, %v1377_v51, -1e+30  ;;  %v1415_v59 = vsel %vm373_vm5, %v1407_v50, -inf  ;;  %vm2553_vm4 = vcmask 23552  }
 0x944   :  { %1416 = vmax.xlane.f32.xlu0 %v1415_v59  ;;  %v1412_v29 = vsel %vm373_vm5, %v1406_v6, -inf }
 0x945   :  { %1413 = vmax.xlane.f32.xlu1 %v1412_v29  ;;  %v3282_v33 = vpop.f32.mrb[26].mxu0 }
 0x946   :  { %v1409_v58 = vsel %vm364_vm6, %v3282_v33, -1e+30  ;;  %v1387_v61 = vpop.f32.mrb[27].mxu0  ;;  %vm2557_vm6 = vcmask 39936  }
 0x947   :  { %v1408_v60 = vsel %vm363_vm7, %v1387_v61, -1e+30  ;;  %v1421_v63 = vsel %vm373_vm5, %v1409_v58, -inf  ;;  %vm2561_vm7 = vcmask 56320  }
 0x948   :  { %v1418_v62 = vsel %vm373_vm5, %v1408_v60, -inf }
 0x949   :  { %1422 = vmax.xlane.f32.xlu1 %v1421_v63  ;;  %1419 = vmax.xlane.f32.xlu0 %v1418_v62  ;;  %v3285_v0 = vpop.f32.mrb[28].mxu0 }
 0x94a   :  { %v1411_v34 = vsel %vm366_vm8, %v3285_v0, -1e+30  ;;  %v1397_v22 = vpop.f32.mrb[29].mxu0  ;;  %vm2559_vm8 = vcmask 48128  }
 0x94b   :  { %v1410_v36 = vsel %vm365_vm9, %v1397_v22, -1e+30  ;;  %v1427_v1 = vsel %vm373_vm5, %v1411_v34, -inf  ;;  %vm2564_vm9 = vcmask 72704  }
 0x94c   :  { %v1424_v38 = vsel %vm373_vm5, %v1410_v36, -inf }
 0x94d   :  { %1428 = vmax.xlane.f32.xlu1 %v1427_v1  ;;  %1425 = vmax.xlane.f32.xlu0 %v1424_v38 }
 0x9d1   :  { %v1417_v3 = vpop.xlane.xlu0 %1416 }
 0x9d2   :  { %v1431_v32 = vsub.f32 %v1407_v50, %v1417_v3  ;;  %v1414_v11 = vpop.xlane.xlu1 %1413 }
 0x9d3   :  { %v1430_v43 = vsub.f32 %v1406_v6, %v1414_v11 }
 0x9d4   :  { %v1438_v45 = vmul.f32 1.442695, %v1431_v32 }
 0x9d5   :  { %v1436_v46 = vmul.f32 1.442695, %v1430_v43 }
 0x9d6   :  { %3758 = vpow2.f32 %v1438_v45  ;;  %v1423_v52 = vpop.xlane.xlu1 %1422  ;;  %v1420_v10 = vpop.xlane.xlu0 %1419 }
 0x9d7   :  { %3760 = vpow2.f32 %v1436_v46  ;;  %v1433_v42 = vsub.f32 %v1409_v58, %v1423_v52  ;;  %v1432_v49 = vsub.f32 %v1408_v60, %v1420_v10 }
 0x9d9   :  { %v1442_v12 = vmul.f32 1.442695, %v1433_v42  ;;  %v1440_v54 = vmul.f32 1.442695, %v1432_v49 }
 0x9da   :  { %v1429_v55 = vpop.xlane.xlu1 %1428  ;;  %v1426_v56 = vpop.xlane.xlu0 %1425 }
 0x9db   :  { %3762 = vpow2.f32 %v1442_v12  ;;  %v1435_v57 = vsub.f32 %v1411_v34, %v1429_v55  ;;  %v1434_v44 = vsub.f32 %v1410_v36, %v1426_v56  ;;  %v1701_v12 = vld [vmem:[%s4832_s9] sm:$0xff]  ;;  %v1703_v55 = vld [vmem:[%s4832_s9 + $0x10] sm:$0xff] }
 0x9dc   :  { %3764 = vpow2.f32 %v1440_v54  ;;  %v1702_v54 = vld [vmem:[%s4832_s9 + $0x8] sm:$0xff] }
 0x9dd   :  { %v1446_v2 = vmul.f32 1.442695, %v1435_v57  ;;  %v1444_v4 = vmul.f32 1.442695, %v1434_v44  ;;  %v3508_v56 = vpack.c.bf16 %v1702_v54, %v1701_v12  ;;  %v1704_v57 = vld [vmem:[%s4832_s9 + $0x18] sm:$0xff] }
 0x9de   :  { %v3512_v44 = vpack.c.bf16 %v1704_v57, %v1703_v55 }
 0x9df   :  { %3766 = vpow2.f32 %v1446_v2 }
 0x9e0   :  { %v4436_v7 = vpop.eup %3758  ;;  %3768 = vpow2.f32 %v1444_v4 }
 0x9e1   :  { %v3761_v5 = vpop.eup %3760  ;;  %v1451_v50 = vsel %vm373_vm5, %v4436_v7, 0.0 }
 0x9e2   :  { %1452 = vadd.xlane.f32.xlu1 %v1451_v50  ;;  %v1448_v51 = vsel %vm373_vm5, %v3761_v5, 0.0 }
 0x9e3   :  { %1449 = vadd.xlane.f32.xlu0 %v1448_v51 }
 0x9e5   :  { %v4441_v6 = vpop.eup %3762 }
 0x9e6   :  { %v4443_v59 = vpop.eup %3764  ;;  %v1457_v29 = vsel %vm373_vm5, %v4441_v6, 0.0 }
 0x9e7   :  { %1458 = vadd.xlane.f32.xlu1 %v1457_v29  ;;  %v1454_v33 = vsel %vm373_vm5, %v4443_v59, 0.0 }
 0x9e8   :  { %1455 = vadd.xlane.f32.xlu0 %v1454_v33 }
 0x9e9   :  { %v4449_v58 = vpop.eup %3766 }
 0x9ea   :  { %v4451_v61 = vpop.eup %3768  ;;  %v1463_v60 = vsel %vm373_vm5, %v4449_v58, 0.0 }
 0x9eb   :  { %1464 = vadd.xlane.f32.xlu1 %v1463_v60  ;;  %v1460_v63 = vsel %vm373_vm5, %v4451_v61, 0.0 }
 0x9ec   :  { %1461 = vadd.xlane.f32.xlu0 %v1460_v63 }
 0x9fc   :  { %3677 = vrot.lane.b32.xlu1 %v4072_v35, %s3882_s21 }
 0xa00   :  { %3682 = vrot.lane.b32.xlu1 %v4075_v40, %s3882_s21 }
 0xa02   :  { %3672 = vrot.lane.b32.xlu0 %v4065_v30, %s3882_s21 }
 0xa04   :  { %1617 = vrot.lane.b32.xlu1 %v4326_v53, %s3883_s0 }
 0xa06   :  { %1615 = vrot.lane.b32.xlu0 %v4328_v9, %s3883_s0 }
 0xa08   :  { %1641 = vrot.lane.b32.xlu1 %v4406_v31, %s3884_s22 }
 0xa0a   :  { %1639 = vrot.lane.b32.xlu0 %v4408_v47, %s3884_s22 }
 0xa0c   :  { %1621 = vrot.lane.b32.xlu1 %v4330_v18, %s3883_s0 }
 0xa0e   :  { %1619 = vrot.lane.b32.xlu0 %v4332_v17, %s3883_s0 }
 0xa10   :  { %1645 = vrot.lane.b32.xlu1 %v4410_v37, %s3884_s22 }
 0xa12   :  { %1643 = vrot.lane.b32.xlu0 %v4412_v41, %s3884_s22 }
 0xa14   :  { %1625 = vrot.lane.b32.xlu1 %v4334_v15, %s3883_s0 }
 0xa16   :  { %1623 = vrot.lane.b32.xlu0 %v4336_v16, %s3883_s0 }
 0xa6f   :  { %v1453_v30 = vpop.xlane.xlu1 %1452 }
 0xa70   :  { %v1450_v35 = vpop.xlane.xlu0 %1449 }
 0xa71   :  { %3770 = vrcp.f32 %v1450_v35 }
 0xa72   :  { %3772 = vrcp.f32 %v1453_v30 }
 0xa74   :  { %v1459_v40 = vpop.xlane.xlu1 %1458 }
 0xa75   :  { %v1456_v53 = vpop.xlane.xlu0 %1455 }
 0xa76   :  { %3774 = vrcp.f32 %v1456_v53 }
 0xa77   :  { %3776 = vrcp.f32 %v1459_v40 }
 0xa78   :  { %v1465_v9 = vpop.xlane.xlu1 %1464 }
 0xa79   :  { %v1462_v31 = vpop.xlane.xlu0 %1461 }
 0xa7a   :  { %3778 = vrcp.f32 %v1462_v31 }
 0xa7b   :  { %v3771_v18 = vpop.eup %3770  ;;  %3780 = vrcp.f32 %v1465_v9 }
 0xa7c   :  { %v3678_v47 = vpop.permute.xlu1 %3677  ;;  %v1472_v17 = vmul.f32 %v3771_v18, %v3761_v5  ;;  %v3773_v3 = vpop.eup %3772 }
 0xa7d   :  { %v3673_v62 = vpop.permute.xlu0 %3672  ;;  %v3680_v0 = vunpack.i.h.bf16 %v3678_v47  ;;  %v3679_v37 = vunpack.i.l.bf16 %v3678_v47  ;;  %v1473_v11 = vmul.f32 %v3773_v3, %v4436_v7 }
 0xa7e   :  { %v3675_v34 = vunpack.i.h.bf16 %v3673_v62  ;;  %v3674_v22 = vunpack.i.l.bf16 %v3673_v62  ;;  %3298 = vmatprep.mubr.msk.f32.mxu1 %vm373_vm5, %v1472_v17 }
 0xa7f   :  { %v3500_v41 = vpack.c.bf16 %v3680_v0, %v3679_v37 }
 0xa80   :  { %v3496_v15 = vpack.c.bf16 %v3675_v34, %v3674_v22  ;;  %v3683_v16 = vpop.permute.xlu1 %3682  ;;  %v3775_v32 = vpop.eup %3774 }
 0xa81   :  { %v3685_v36 = vunpack.i.h.bf16 %v3683_v16  ;;  %v3684_v1 = vunpack.i.l.bf16 %v3683_v16  ;;  %v3777_v43 = vpop.eup %3776  ;;  %v1474_v45 = vmul.f32 %v3775_v32, %v4443_v59  ;;  %v1616_v59 = vpop.permute.xlu0 %1615 }
 0xa82   :  { %3497 = vmatprep.subr.bf16.mxu1 %v3496_v15  ;;  %v1475_v52 = vmul.f32 %v3777_v43, %v4441_v6 }
 0xa83   :  { %3499 = vmatpush3.bf16.msra.mxu1 %v3496_v15  ;;  %v3504_v38 = vpack.c.bf16 %v3685_v36, %v3684_v1 }
 0xa84   :  { %3501 = vmatprep.subr.bf16.mxu1 %v3500_v41  ;;  %v3779_v46 = vpop.eup %3778  ;;  %v1618_v6 = vpop.permute.xlu1 %1617 }
 0xa85   :  { %v3781_v10 = vpop.eup %3780  ;;  %v1476_v42 = vmul.f32 %v3779_v46, %v4451_v61  ;;  %v1640_v33 = vpop.permute.xlu0 %1639 }
 0xa86   :  { %v1477_v49 = vmul.f32 %v3781_v10, %v4449_v58 }
 0xa87   :  { %3503 = vmatpush3.bf16.msra.mxu1 %v3500_v41 }
 0xa88   :  { %3505 = vmatprep.subr.bf16.mxu1 %v3504_v38  ;;  %v1642_v29 = vpop.permute.xlu1 %1641 }
 0xa89   :  { %v1620_v61 = vpop.permute.xlu0 %1619 }
 0xa8a   :  { %v1683_v17 = vsel %vm235_vm1, %v4231_v26, %v1620_v61 }
 0xa8b   :  { %3507 = vmatpush3.bf16.msra.mxu1 %v3504_v38 }
 0xa8c   :  { %3509 = vmatprep.subr.bf16.mxu1 %v3508_v56  ;;  %v1622_v58 = vpop.permute.xlu1 %1621 }
 0xa8d   :  { %v1644_v63 = vpop.permute.xlu0 %1643 }
 0xa8e   :  { %3299 = vmatmul.mubr.msk.f32.vlgmr.msra.gmra.mrb[18].mxu1 %vm373_vm5, %v1473_v11  ;;  %v1690_v62 = vsel %vm1687_vm10, %v1683_v17, %v1644_v63 }
 0xa8f   :  { %3301 = vmatprep.mubr.msk.f32.mxu1 %vm373_vm5, %v1474_v45  ;;  %3511 = vmatpush3.bf16.msra.mxu1 %v3508_v56 }
 0xa90   :  { %3513 = vmatprep.subr.bf16.mxu1 %v3512_v44  ;;  %v1646_v60 = vpop.permute.xlu1 %1645 }
 0xa91   :  { %v1624_v35 = vpop.permute.xlu0 %1623 }
 0xa92   :  { %3302 = vmatmul.mubr.msk.f32.gmra.mrb[20].mxu1 %vm373_vm5, %v1475_v52  ;;  %v1685_v16 = vsel %vm235_vm1, %v4235_v28, %v1624_v35  ;;  %v2922_v28 = vld [vmem:[%s4833_s10] ss:$0 sm:$0xff] }
 0xa93   :  { %3304 = vmatprep.mubr.msk.f32.mxu1 %vm373_vm5, %v1476_v42  ;;  %3515 = vmatpush3.bf16.msra.mxu1 %v3512_v44 }
 0xa94   :  { %v1626_v30 = vpop.permute.xlu1 %1625 }
 0xa96   :  { %3305 = vmatmul.mubr.msk.f32.gmra.mrb[22].mxu1 %vm373_vm5, %v1477_v49  ;;  %vm2555_vm5 = vcmask 31744  }
 0xb61   :  { %v3300_v2 = vpop.f32.mrb[18].mxu1 }
 0xb62   :  { %1665 = vrot.lane.b32.xlu1 %v3300_v2, %s3885_s28  ;;  %v1580_v4 = vpop.f32.mrb[19].mxu1 }
 0xb63   :  { %1663 = vrot.lane.b32.xlu0 %v1580_v4, %s3885_s28 }
 0xb65   :  { %v3303_v7 = vpop.f32.mrb[20].mxu1 }
 0xb66   :  { %1669 = vrot.lane.b32.xlu1 %v3303_v7, %s3885_s28  ;;  %v1590_v5 = vpop.f32.mrb[21].mxu1 }
 0xb67   :  { %1667 = vrot.lane.b32.xlu0 %v1590_v5, %s3885_s28 }
 0xb69   :  { %v3306_v50 = vpop.f32.mrb[22].mxu1 }
 0xb6a   :  { %1649 = vrot.lane.b32.xlu1 %v4414_v48, %s3884_s22  ;;  %v1600_v51 = vpop.f32.mrb[23].mxu1  ;;  %v1681_v48 = vsel %vm235_vm1, %v4227_v24, %v1616_v59 }
 0xb6b   :  { %1647 = vrot.lane.b32.xlu0 %v4416_v39, %s3884_s22  ;;  %v1682_v39 = vsel %vm235_vm1, %v4225_v21, %v1618_v6  ;;  %v1688_v53 = vsel %vm1687_vm10, %v1681_v48, %v1640_v33  ;;  %v1684_v21 = vsel %vm235_vm1, %v4229_v25, %v1622_v58  ;;  %v1686_v25 = vsel %vm235_vm1, %v4233_v27, %v1626_v30 }
 0xb6c   :  { %v1689_v31 = vsel %vm1687_vm10, %v1682_v39, %v1642_v29  ;;  %v1691_v37 = vsel %vm1687_vm10, %v1684_v21, %v1646_v60 }
 0xb6e   :  { %1673 = vrot.lane.b32.xlu1 %v3306_v50, %s3885_s28 }
 0xb6f   :  { %1671 = vrot.lane.b32.xlu0 %v1600_v51, %s3885_s28 }
 0xbd4   :  { %v1666_v40 = vpop.permute.xlu1 %1665 }
 0xbd5   :  { %v1664_v9 = vpop.permute.xlu0 %1663  ;;  %v1696_v47 = vsel %vm1694_vm11, %v1689_v31, %v1666_v40 }
 0xbd6   :  { %v1695_v18 = vsel %vm1694_vm11, %v1688_v53, %v1664_v9 }
 0xbd7   :  { %3315 = vmatprep.mubr.msk.f32.mxu1 %vm97_vm0, %v1695_v18 }
 0xbd8   :  { %3316 = vmatmul.mubr.msk.f32.vlgmr.msra.gmra.mrb[24].mxu1 %vm97_vm0, %v1696_v47  ;;  %v1670_v24 = vpop.permute.xlu1 %1669 }
 0xbd9   :  { %v1668_v0 = vpop.permute.xlu0 %1667  ;;  %v1698_v22 = vsel %vm1694_vm11, %v1691_v37, %v1670_v24 }
 0xbda   :  { %v1697_v34 = vsel %vm1694_vm11, %v1690_v62, %v1668_v0 }
 0xbdb   :  { %3318 = vmatprep.mubr.msk.f32.mxu1 %vm97_vm0, %v1697_v34 }
 0xbdc   :  { %v1650_v15 = vpop.permute.xlu1 %1649  ;;  %3319 = vmatmul.mubr.msk.f32.gmra.mrb[26].mxu1 %vm97_vm0, %v1698_v22 }
 0xbdd   :  { %v1648_v26 = vpop.permute.xlu0 %1647  ;;  %v1693_v38 = vsel %vm1687_vm10, %v1686_v25, %v1650_v15  ;;  %v1938_v25 = vld [vmem:[%s4834_s11 + $0x10] sm:$0xff] }
 0xbde   :  { %v1692_v36 = vsel %vm1687_vm10, %v1685_v16, %v1648_v26  ;;  %v1936_v26 = vld [vmem:[%s4834_s11] sm:$0xff]  ;;  %v1937_v16 = vld [vmem:[%s4834_s11 + $0x8] sm:$0xff] }
 0xbe0   :  { %v1674_v41 = vpop.permute.xlu1 %1673 }
 0xbe1   :  { %v1672_v1 = vpop.permute.xlu0 %1671  ;;  %v1700_v32 = vsel %vm1694_vm11, %v1693_v38, %v1674_v41  ;;  %v3516_v41 = vpack.c.bf16 %v1937_v16, %v1936_v26  ;;  %v2066_v38 = vld [vmem:[%s4835_s13] sm:$0xff] }
 0xbe2   :  { %v1699_v3 = vsel %vm1694_vm11, %v1692_v36, %v1672_v1  ;;  %v1939_v36 = vld [vmem:[%s4834_s11 + $0x18] sm:$0xff]  ;;  %vm2572_vm11 = vcmask 89088  }
 0xbe3   :  { %3321 = vmatprep.mubr.msk.f32.mxu1 %vm97_vm0, %v1699_v3  ;;  %3517 = vmatprep.subr.bf16.mxu0 %v3516_v41  ;;  %v3520_v1 = vpack.c.bf16 %v1939_v36, %v1938_v25  ;;  %v2067_v3 = vld [vmem:[%s4835_s13 + $0x8] sm:$0xff] }
 0xbe4   :  { %3322 = vmatmul.mubr.msk.f32.gmra.mrb[28].mxu1 %vm97_vm0, %v1700_v32  ;;  %3519 = vmatpush3.bf16.msra.mxu0 %v3516_v41  ;;  %v2068_v32 = vld [vmem:[%s4835_s13 + $0x10] sm:$0xff] }
 0xbe5   :  { %3521 = vmatprep.subr.bf16.mxu0 %v3520_v1 }
 0xbe8   :  { %3523 = vmatpush3.bf16.msra.mxu0 %v3520_v1 }
 0xcab   :  { %v3317_v11 = vpop.f32.mrb[24].mxu1 }
 0xcac   :  { %v1802_v43 = vadd.f32 %v3317_v11, %v2922_v28  ;;  %v1796_v27 = vpop.f32.mrb[25].mxu1  ;;  %v2069_v11 = vld [vmem:[%s4835_s13 + $0x18] sm:$0xff] }
 0xcad   :  { %v1797_v45 = vadd.f32 %v2922_v28, %v1796_v27  ;;  %v2070_v27 = vld [vmem:[%s4835_s13 + $0x20] sm:$0xff] }
 0xcae   :  { %v1826_v46 = vadd.f32 %v1802_v43, %v4024_v13  ;;  %v3528_v43 = vpack.c.bf16 %v2069_v11, %v2068_v32 }
 0xcaf   :  { %v1825_v52 = vadd.f32 %v1797_v45, %v4008_v8  ;;  %v3320_v10 = vpop.f32.mrb[26].mxu1  ;;  %v2071_v45 = vld [vmem:[%s4835_s13 + $0x28] sm:$0xff] }
 0xcb0   :  { %v1806_v42 = vpop.f32.mrb[27].mxu1  ;;  %v1836_v49 = vsel %vm97_vm0, %v1826_v46, 0.0  ;;  %v1812_v12 = vadd.f32 %v3320_v10, %v2922_v28 }
 0xcb1   :  { %v1807_v54 = vadd.f32 %v2922_v28, %v1806_v42  ;;  %1837 = vadd.xlane.f32.xlu1 %v1836_v49  ;;  %v1833_v55 = vsel %vm97_vm0, %v1825_v52, 0.0 }
 0xcb2   :  { %1834 = vadd.xlane.f32.xlu0 %v1833_v55  ;;  %v1828_v57 = vadd.f32 %v1812_v12, %v4042_v19 }
 0xcb3   :  { %v1827_v56 = vadd.f32 %v1807_v54, %v4026_v14 }
 0xcb4   :  { %v1842_v7 = vsel %vm97_vm0, %v1828_v57, 0.0 }
 0xcb5   :  { %v1839_v44 = vsel %vm97_vm0, %v1827_v56, 0.0 }
 0xcb6   :  { %1840 = vadd.xlane.f32.xlu0 %v1839_v44 }
 0xcb7   :  { %v3323_v13 = vpop.f32.mrb[28].mxu1 }
 0xcb8   :  { %v1822_v2 = vadd.f32 %v3323_v13, %v2922_v28  ;;  %v1816_v8 = vpop.f32.mrb[29].mxu1 }
 0xcb9   :  { %v1817_v4 = vadd.f32 %v2922_v28, %v1816_v8  ;;  %v3524_v28 = vpack.c.bf16 %v2067_v3, %v2066_v38 }
 0xcba   :  { %v1830_v5 = vadd.f32 %v1822_v2, %v4056_v23  ;;  %1843 = vadd.xlane.f32.xlu0 %v1842_v7 }
 0xcbb   :  { %v1829_v50 = vadd.f32 %v1817_v4, %v4046_v20  ;;  %3525 = vmatprep.subr.bf16.mxu1 %v3524_v28 }
 0xcbc   :  { %v1848_v51 = vsel %vm97_vm0, %v1830_v5, 0.0  ;;  %3527 = vmatpush3.bf16.msra.mxu1 %v3524_v28 }
 0xcbd   :  { %v1845_v14 = vsel %vm97_vm0, %v1829_v50, 0.0  ;;  %3529 = vmatprep.subr.bf16.mxu1 %v3528_v43 }
 0xcbe   :  { %1846 = vadd.xlane.f32.xlu1 %v1845_v14  ;;  %1849 = vadd.xlane.f32.xlu0 %v1848_v51  ;;  %v2929_v51 = vld [vmem:[%s4836_s15] ss:$0 sm:$0xff] }
 0xcc0   :  { %3531 = vmatpush3.bf16.msra.mxu1 %v3528_v43 }
 0xd3e   :  { %v1838_v19 = vpop.xlane.xlu1 %1837 }
 0xd3f   :  { %v1853_v6 = vmul.f32 0.03125, %v1838_v19  ;;  %v1835_v59 = vpop.xlane.xlu0 %1834 }
 0xd40   :  { %v1852_v29 = vmul.f32 0.03125, %v1835_v59 }
 0xd41   :  { %v4546_v33 = vsub.f32 %v1826_v46, %v1853_v6  ;;  %v3532_v46 = vpack.c.bf16 %v2071_v45, %v2070_v27 }
 0xd42   :  { %v4548_v58 = vsub.f32 %v1825_v52, %v1852_v29 }
 0xd43   :  { %v1841_v61 = vpop.xlane.xlu0 %1840  ;;  %v1865_v23 = vmul.f32 %v4546_v33, %v4546_v33  ;;  %3533 = vmatprep.subr.bf16.mxu1 %v3532_v46 }
 0xd44   :  { %v1854_v60 = vmul.f32 0.03125, %v1841_v61  ;;  %v1864_v20 = vmul.f32 %v4548_v58, %v4548_v58  ;;  %3535 = vmatpush3.bf16.msra.mxu1 %v3532_v46  ;;  %v2930_v61 = vld [vmem:[%s4837_s16] ss:$0 sm:$0xff] }
 0xd45   :  { %v1873_v63 = vsel %vm97_vm0, %v1865_v23, 0.0 }
 0xd46   :  { %v4555_v30 = vsub.f32 %v1827_v56, %v1854_v60  ;;  %1874 = vadd.xlane.f32.xlu0 %v1873_v63  ;;  %v1870_v35 = vsel %vm97_vm0, %v1864_v20, 0.0 }
 0xd47   :  { %1871 = vadd.xlane.f32.xlu1 %v1870_v35  ;;  %v1844_v48 = vpop.xlane.xlu0 %1843 }
 0xd48   :  { %v1855_v40 = vmul.f32 0.03125, %v1844_v48  ;;  %v1866_v39 = vmul.f32 %v4555_v30, %v4555_v30 }
 0xd4a   :  { %v4560_v53 = vsub.f32 %v1828_v57, %v1855_v40  ;;  %v1876_v9 = vsel %vm97_vm0, %v1866_v39, 0.0 }
 0xd4b   :  { %v1847_v31 = vpop.xlane.xlu1 %1846  ;;  %1877 = vadd.xlane.f32.xlu1 %v1876_v9  ;;  %v1850_v18 = vpop.xlane.xlu0 %1849 }
 0xd4c   :  { %v1856_v47 = vmul.f32 0.03125, %v1847_v31  ;;  %v1857_v17 = vmul.f32 0.03125, %v1850_v18  ;;  %v1867_v24 = vmul.f32 %v4560_v53, %v4560_v53 }
 0xd4e   :  { %v4565_v21 = vsub.f32 %v1829_v50, %v1856_v47  ;;  %v4567_v62 = vsub.f32 %v1830_v5, %v1857_v17  ;;  %v1879_v0 = vsel %vm97_vm0, %v1867_v24, 0.0 }
 0xd4f   :  { %1880 = vadd.xlane.f32.xlu0 %v1879_v0 }
 0xd50   :  { %v1868_v37 = vmul.f32 %v4565_v21, %v4565_v21  ;;  %v1869_v34 = vmul.f32 %v4567_v62, %v4567_v62 }
 0xd52   :  { %v1882_v22 = vsel %vm97_vm0, %v1868_v37, 0.0  ;;  %v1885_v15 = vsel %vm97_vm0, %v1869_v34, 0.0 }
 0xd53   :  { %1883 = vadd.xlane.f32.xlu1 %v1882_v22  ;;  %1886 = vadd.xlane.f32.xlu0 %v1885_v15  ;;  %v2931_v22 = vld [vmem:[%s4838_s12] ss:$0 sm:$0xff]  ;;  %s3889_s12 = smov 127  }
 0xdd3   :  { %v1875_v52 = vpop.xlane.xlu0 %1874 }
 0xdd4   :  { %v1889_v10 = vmul.f32 0.03125, %v1875_v52  ;;  %v1872_v42 = vpop.xlane.xlu1 %1871 }
 0xdd5   :  { %v1888_v49 = vmul.f32 0.03125, %v1872_v42  ;;  %v2938_v42 = vld [vmem:[%s4839_s14] ss:$0 sm:$0xff] }
 0xdd6   :  { %v1895_v12 = vadd.f32 1e-05, %v1889_v10 }
 0xdd7   :  { %v1894_v54 = vadd.f32 1e-05, %v1888_v49 }
 0xdd8   :  { %3782 = vrsqrt.f32 %v1895_v12  ;;  %v1878_v55 = vpop.xlane.xlu1 %1877 }
 0xdd9   :  { %3784 = vrsqrt.f32 %v1894_v54  ;;  %v1890_v56 = vmul.f32 0.03125, %v1878_v55 }
 0xddb   :  { %v1896_v57 = vadd.f32 1e-05, %v1890_v56 }
 0xddc   :  { %v1881_v44 = vpop.xlane.xlu0 %1880 }
 0xddd   :  { %3786 = vrsqrt.f32 %v1896_v57  ;;  %v1891_v13 = vmul.f32 0.03125, %v1881_v44 }
 0xddf   :  { %v1897_v2 = vadd.f32 1e-05, %v1891_v13 }
 0xde0   :  { %v1884_v8 = vpop.xlane.xlu1 %1883  ;;  %v1887_v4 = vpop.xlane.xlu0 %1886 }
 0xde1   :  { %3788 = vrsqrt.f32 %v1897_v2  ;;  %v1892_v7 = vmul.f32 0.03125, %v1884_v8  ;;  %v1893_v5 = vmul.f32 0.03125, %v1887_v4 }
 0xde2   :  { %v3783_v50 = vpop.eup %3782 }
 0xde3   :  { %v3785_v14 = vpop.eup %3784  ;;  %v1907_v19 = vmul.f32 %v3783_v50, %v4546_v33  ;;  %v1898_v6 = vadd.f32 1e-05, %v1892_v7  ;;  %v1899_v59 = vadd.f32 1e-05, %v1893_v5 }
 0xde4   :  { %v1906_v29 = vmul.f32 %v3785_v14, %v4548_v58 }
 0xde5   :  { %v1919_v23 = vmul.f32 %v2929_v51, %v1907_v19  ;;  %3790 = vrsqrt.f32 %v1898_v6 }
 0xde6   :  { %3792 = vrsqrt.f32 %v1899_v59  ;;  %v1918_v60 = vmul.f32 %v2929_v51, %v1906_v29 }
 0xde7   :  { %v3787_v20 = vpop.eup %3786  ;;  %v1931_v48 = vadd.f32 %v2930_v61, %v1919_v23 }
 0xde8   :  { %v4614_v63 = vadd.f32 %v2930_v61, %v1918_v60  ;;  %v1908_v35 = vmul.f32 %v3787_v20, %v4555_v30 }
 0xdea   :  { %3332 = vmatprep.mubr.msk.f32.mxu0 %vm97_vm0, %v4614_v63  ;;  %v1920_v33 = vmul.f32 %v2929_v51, %v1908_v35 }
 0xdeb   :  { %v3789_v40 = vpop.eup %3788  ;;  %3333 = vmatmul.mubr.msk.f32.vlgmr.msra.gmra.mrb[30].mxu0 %vm97_vm0, %v1931_v48 }
 0xdec   :  { %v1932_v58 = vadd.f32 %v2930_v61, %v1920_v33  ;;  %v1909_v39 = vmul.f32 %v3789_v40, %v4560_v53  ;;  %v2072_v53 = vld [vmem:[%s4835_s13 + $0x30] sm:$0xff] }
 0xdee   :  { %3335 = vmatprep.mubr.msk.f32.mxu0 %vm97_vm0, %v1932_v58  ;;  %v1921_v9 = vmul.f32 %v2929_v51, %v1909_v39 }
 0xdef   :  { %v3791_v31 = vpop.eup %3790 }
 0xdf0   :  { %v3793_v18 = vpop.eup %3792  ;;  %v4622_v47 = vadd.f32 %v2930_v61, %v1921_v9  ;;  %v1910_v30 = vmul.f32 %v3791_v31, %v4565_v21  ;;  %v2073_v21 = vld [vmem:[%s4835_s13 + $0x38] sm:$0xff] }
 0xdf1   :  { %v1911_v17 = vmul.f32 %v3793_v18, %v4567_v62  ;;  %v3536_v62 = vpack.c.bf16 %v2073_v21, %v2072_v53 }
 0xdf2   :  { %3336 = vmatmul.mubr.msk.f32.gmra.mrb[32].mxu0 %vm97_vm0, %v4622_v47  ;;  %v1922_v24 = vmul.f32 %v2929_v51, %v1910_v30 }
 0xdf3   :  { %v1923_v0 = vmul.f32 %v2929_v51, %v1911_v17  ;;  %3537 = vmatprep.subr.bf16.mxu1 %v3536_v62 }
 0xdf4   :  { %v1934_v37 = vadd.f32 %v2930_v61, %v1922_v24  ;;  %3539 = vmatpush3.bf16.msra.mxu1 %v3536_v62 }
 0xdf5   :  { %v1935_v34 = vadd.f32 %v2930_v61, %v1923_v0 }
 0xdf6   :  { %3338 = vmatprep.mubr.msk.f32.mxu0 %vm97_vm0, %v1934_v37 }
 0xdf7   :  { %3339 = vmatmul.mubr.msk.f32.gmra.mrb[34].mxu0 %vm97_vm0, %v1935_v34 }
 0xebe   :  { %v3334_v15 = vpop.f32.mrb[30].mxu0 }
 0xebf   :  { %v2037_v26 = vadd.f32 %v3334_v15, %v2931_v22  ;;  %v2031_v16 = vpop.f32.mrb[31].mxu0 }
 0xec0   :  { %v2032_v41 = vadd.f32 %v2931_v22, %v2031_v16 }
 0xec1   :  { %v2061_v36 = vmax.f32 %v2037_v26, 0.0 }
 0xec2   :  { %v2060_v25 = vmax.f32 %v2032_v41, 0.0 }
 0xec4   :  { %3357 = vmatprep.mubr.msk.f32.mxu1 %vm2081_vm12, %v2060_v25 }
 0xec5   :  { %v3337_v1 = vpop.f32.mrb[32].mxu0  ;;  %3358 = vmatmul.mubr.msk.f32.vlgmr.msra.gmra.mrb[30].mxu1 %vm2081_vm12, %v2061_v36 }
 0xec6   :  { %v2047_v38 = vadd.f32 %v3337_v1, %v2931_v22  ;;  %v2041_v3 = vpop.f32.mrb[33].mxu0 }
 0xec7   :  { %v2042_v32 = vadd.f32 %v2931_v22, %v2041_v3 }
 0xec8   :  { %v2063_v11 = vmax.f32 %v2047_v38, 0.0 }
 0xec9   :  { %v2062_v28 = vmax.f32 %v2042_v32, 0.0 }
 0xeca   :  { %v3340_v43 = vpop.f32.mrb[34].mxu0 }
 0xecb   :  { %v2057_v27 = vadd.f32 %v3340_v43, %v2931_v22  ;;  %v2051_v45 = vpop.f32.mrb[35].mxu0  ;;  %3360 = vmatprep.mubr.msk.f32.mxu1 %vm2081_vm12, %v2062_v28 }
 0xecc   :  { %v2052_v46 = vadd.f32 %v2931_v22, %v2051_v45  ;;  %3361 = vmatmul.mubr.msk.f32.gmra.mrb[32].mxu1 %vm2081_vm12, %v2063_v11 }
 0xecd   :  { %v2065_v10 = vmax.f32 %v2057_v27, 0.0 }
 0xece   :  { %v2064_v52 = vmax.f32 %v2052_v46, 0.0 }
 0xed0   :  { %3363 = vmatprep.mubr.msk.f32.mxu1 %vm2081_vm12, %v2064_v52 }
 0xed1   :  { %3364 = vmatmul.mubr.msk.f32.gmra.mrb[34].mxu1 %vm2081_vm12, %v2065_v10  ;;  %vm2835_vm12 = vcmask 1040384  }
 0xf98   :  { %v3359_v49 = vpop.f32.mrb[30].mxu1 }
 0xf99   :  { %v2172_v12 = vadd.f32 %v3359_v49, %v2938_v42  ;;  %v2166_v54 = vpop.f32.mrb[31].mxu1 }
 0xf9a   :  { %v2167_v51 = vadd.f32 %v2938_v42, %v2166_v54  ;;  %v2945_v54 = vld [vmem:[%s4840_s17] ss:$0 sm:$0xff] }
 0xf9b   :  { %v2196_v55 = vadd.f32 %v2172_v12, %v1931_v48 }
 0xf9c   :  { %v2195_v61 = vadd.f32 %v2167_v51, %v4614_v63  ;;  %v3866_v51 = vld [vmem:[%s4855_s26 + $0x8] sm:$0xff] }
 0xf9d   :  { %v2206_v56 = vsel %vm97_vm0, %v2196_v55, 0.0 }
 0xf9e   :  { %2207 = vadd.xlane.f32.xlu1 %v2206_v56  ;;  %v2203_v20 = vsel %vm97_vm0, %v2195_v61, 0.0 }
 0xf9f   :  { %v3362_v57 = vpop.f32.mrb[32].mxu1 }
 0xfa0   :  { %v2176_v44 = vpop.f32.mrb[33].mxu1  ;;  %v2182_v4 = vadd.f32 %v3362_v57, %v2938_v42 }
 0xfa1   :  { %v2177_v13 = vadd.f32 %v2938_v42, %v2176_v44 }
 0xfa2   :  { %v2198_v59 = vadd.f32 %v2182_v4, %v4622_v47 }
 0xfa3   :  { %v2197_v2 = vadd.f32 %v2177_v13, %v1932_v58 }
 0xfa4   :  { %v3365_v8 = vpop.f32.mrb[34].mxu1  ;;  %v2212_v60 = vsel %vm97_vm0, %v2198_v59, 0.0 }
 0xfa5   :  { %v2192_v7 = vadd.f32 %v3365_v8, %v2938_v42  ;;  %v2186_v5 = vpop.f32.mrb[35].mxu1  ;;  %v2209_v50 = vsel %vm97_vm0, %v2197_v2, 0.0 }
 0xfa6   :  { %v2187_v14 = vadd.f32 %v2938_v42, %v2186_v5  ;;  %2210 = vadd.xlane.f32.xlu0 %v2209_v50 }
 0xfa7   :  { %v2200_v19 = vadd.f32 %v2192_v7, %v1935_v34 }
 0xfa8   :  { %v2199_v6 = vadd.f32 %v2187_v14, %v1934_v37  ;;  %v2306_v14 = vmul.f32 0.9, %v3866_v51 }
 0xfa9   :  { %v2218_v29 = vsel %vm97_vm0, %v2200_v19, 0.0 }
 0xfaa   :  { %2219 = vadd.xlane.f32.xlu0 %v2218_v29  ;;  %v2215_v23 = vsel %vm97_vm0, %v2199_v6, 0.0 }
 0xfab   :  { %2216 = vadd.xlane.f32.xlu1 %v2215_v23 }
 0xfae   :  { %2213 = vadd.xlane.f32.xlu0 %v2212_v60 }
 0xfaf   :  { %2204 = vadd.xlane.f32.xlu1 %v2203_v20 }
0x102b   :  { %v2208_v35 = vpop.xlane.xlu1 %2207 }
0x102c   :  { %v2222_v48 = vmul.f32 0.03125, %v2208_v35 }
0x102e   :  { %v2228_v33 = vsub.f32 %v2196_v55, %v2222_v48 }
0x1030   :  { %v2234_v40 = vmul.f32 %v2228_v33, %v2228_v33 }
0x1032   :  { %v2242_v58 = vsel %vm97_vm0, %v2234_v40, 0.0 }
0x1033   :  { %2243 = vadd.xlane.f32.xlu1 %v2242_v58  ;;  %v2211_v39 = vpop.xlane.xlu0 %2210 }
0x1034   :  { %v2223_v9 = vmul.f32 0.03125, %v2211_v39 }
0x1036   :  { %v4657_v63 = vsub.f32 %v2197_v2, %v2223_v9  ;;  %v2946_v2 = vld [vmem:[%s4841_s18] ss:$0 sm:$0xff] }
0x1037   :  { %v2220_v31 = vpop.xlane.xlu0 %2219 }
0x1038   :  { %v2226_v18 = vmul.f32 0.03125, %v2220_v31  ;;  %v2217_v47 = vpop.xlane.xlu1 %2216  ;;  %v2235_v30 = vmul.f32 %v4657_v63, %v4657_v63 }
0x1039   :  { %v2225_v17 = vmul.f32 0.03125, %v2217_v47 }
0x103a   :  { %v4661_v24 = vsub.f32 %v2200_v19, %v2226_v18  ;;  %v2245_v0 = vsel %vm97_vm0, %v2235_v30, 0.0 }
0x103b   :  { %v4664_v37 = vsub.f32 %v2199_v6, %v2225_v17  ;;  %2246 = vadd.xlane.f32.xlu0 %v2245_v0  ;;  %v2214_v34 = vpop.xlane.xlu0 %2213  ;;  %v3868_v0 = vld [vmem:[%s4855_s26 + $0x28] sm:$0xff] }
0x103c   :  { %v2224_v53 = vmul.f32 0.03125, %v2214_v34  ;;  %v2205_v21 = vpop.xlane.xlu1 %2204  ;;  %v2238_v62 = vmul.f32 %v4661_v24, %v4661_v24  ;;  %v2310_v34 = vmul.f32 0.9, %v3868_v0 }
0x103d   :  { %v2221_v22 = vmul.f32 0.03125, %v2205_v21  ;;  %v2237_v15 = vmul.f32 %v4664_v37, %v4664_v37 }
0x103e   :  { %v4670_v26 = vsub.f32 %v2198_v59, %v2224_v53  ;;  %v2254_v16 = vsel %vm97_vm0, %v2238_v62, 0.0 }
0x103f   :  { %v4673_v41 = vsub.f32 %v2195_v61, %v2221_v22  ;;  %2255 = vadd.xlane.f32.xlu0 %v2254_v16  ;;  %v2251_v25 = vsel %vm97_vm0, %v2237_v15, 0.0 }
0x1040   :  { %2252 = vadd.xlane.f32.xlu1 %v2251_v25  ;;  %v2236_v36 = vmul.f32 %v4670_v26, %v4670_v26 }
0x1041   :  { %v2233_v1 = vmul.f32 %v4673_v41, %v4673_v41 }
0x1042   :  { %v2248_v38 = vsel %vm97_vm0, %v2236_v36, 0.0 }
0x1043   :  { %2249 = vadd.xlane.f32.xlu0 %v2248_v38  ;;  %v2239_v3 = vsel %vm97_vm0, %v2233_v1, 0.0 }
0x1044   :  { %2240 = vadd.xlane.f32.xlu1 %v2239_v3 }
0x10c0   :  { %v2244_v32 = vpop.xlane.xlu1 %2243 }
0x10c1   :  { %v2258_v28 = vmul.f32 0.03125, %v2244_v32 }
0x10c3   :  { %v2264_v11 = vadd.f32 1e-05, %v2258_v28 }
0x10c5   :  { %3794 = vrsqrt.f32 %v2264_v11 }
0x10c8   :  { %v2247_v43 = vpop.xlane.xlu0 %2246 }
0x10c9   :  { %v2259_v27 = vmul.f32 0.03125, %v2247_v43 }
0x10cb   :  { %v2265_v45 = vadd.f32 1e-05, %v2259_v27 }
0x10cc   :  { %v2256_v46 = vpop.xlane.xlu0 %2255 }
0x10cd   :  { %3796 = vrsqrt.f32 %v2265_v45  ;;  %v2262_v52 = vmul.f32 0.03125, %v2256_v46  ;;  %v2253_v10 = vpop.xlane.xlu1 %2252 }
0x10ce   :  { %v2261_v42 = vmul.f32 0.03125, %v2253_v10 }
0x10cf   :  { %v3795_v49 = vpop.eup %3794  ;;  %v2268_v12 = vadd.f32 1e-05, %v2262_v52 }
0x10d0   :  { %v2267_v55 = vadd.f32 1e-05, %v2261_v42  ;;  %v2250_v56 = vpop.xlane.xlu0 %2249  ;;  %v2276_v57 = vmul.f32 %v3795_v49, %v2228_v33  ;;  %v3867_v33 = vld [vmem:[%s4855_s26 + $0x10] sm:$0xff] }
0x10d1   :  { %3798 = vrsqrt.f32 %v2268_v12  ;;  %v2260_v44 = vmul.f32 0.03125, %v2250_v56  ;;  %v2241_v13 = vpop.xlane.xlu1 %2240  ;;  %v2307_v40 = vmul.f32 0.9, %v3867_v33 }
0x10d2   :  { %3800 = vrsqrt.f32 %v2267_v55  ;;  %v2257_v8 = vmul.f32 0.03125, %v2241_v13  ;;  %v2288_v4 = vmul.f32 %v2945_v54, %v2276_v57  ;;  %v3888_v13 = vmov 0.0  }
0x10d3   :  { %v2266_v7 = vadd.f32 1e-05, %v2260_v44  ;;  %v3886_v44 = vmov 0.0|0.0   ;;  %3370 = vmatprep.mubr.msk.f32.mxu0 %vm3887_vm13, %v3888_v13 }
0x10d4   :  { %v2263_v5 = vadd.f32 1e-05, %v2257_v8  ;;  %v2300_v50 = vadd.f32 %v2946_v2, %v2288_v4  ;;  %3540 = vmatprep.subr.bf16.mxu0 %v3886_v44 }
0x10d5   :  { %3802 = vrsqrt.f32 %v2266_v7 }
0x10d6   :  { %3804 = vrsqrt.f32 %v2263_v5  ;;  %v2312_v19 = vmul.f32 0.1, %v2300_v50 }
0x10d7   :  { %v3797_v6 = vpop.eup %3796 }
0x10d8   :  { %v4691_v59 = vadd.f32 %v2312_v19, %v2306_v14  ;;  %v2277_v29 = vmul.f32 %v3797_v6, %v4657_v63 }
0x10da   :  { %v2324_v61 = vmul.f32 %v4691_v59, %v4691_v59  ;;  %v2289_v23 = vmul.f32 %v2945_v54, %v2277_v29 }
0x10db   :  { %v3799_v60 = vpop.eup %3798 }
0x10dc   :  { %v3801_v20 = vpop.eup %3800  ;;  %v2332_v35 = vsel %vm97_vm0, %v2324_v61, 0.0  ;;  %v2301_v48 = vadd.f32 %v2946_v2, %v2289_v23  ;;  %v2280_v58 = vmul.f32 %v3799_v60, %v4661_v24  ;;  %v3869_v24 = vld [vmem:[%s4855_s26 + $0x20] sm:$0xff] }
0x10dd   :  { %2333 = vadd.xlane.f32.xlu1 %v2332_v35  ;;  %v2279_v39 = vmul.f32 %v3801_v20, %v4664_v37  ;;  %v2309_v37 = vmul.f32 0.9, %v3869_v24 }
0x10de   :  { %v2313_v9 = vmul.f32 0.1, %v2301_v48  ;;  %v2292_v63 = vmul.f32 %v2945_v54, %v2280_v58 }
0x10df   :  { %v3803_v31 = vpop.eup %3802  ;;  %v2291_v18 = vmul.f32 %v2945_v54, %v2279_v39 }
0x10e0   :  { %v3805_v47 = vpop.eup %3804  ;;  %v4702_v30 = vadd.f32 %v2313_v9, %v2307_v40  ;;  %v2304_v17 = vadd.f32 %v2946_v2, %v2292_v63  ;;  %v2278_v53 = vmul.f32 %v3803_v31, %v4670_v26  ;;  %v3870_v26 = vld [vmem:[%s4855_s26 + $0x18] sm:$0xff] }
0x10e1   :  { %v2303_v21 = vadd.f32 %v2946_v2, %v2291_v18  ;;  %v2275_v62 = vmul.f32 %v3805_v47, %v4673_v41  ;;  %v2308_v32 = vmul.f32 0.9, %v3870_v26  ;;  %v3871_v41 = vld [vmem:[%s4855_s26] sm:$0xff] }
0x10e2   :  { %v2325_v22 = vmul.f32 %v4702_v30, %v4702_v30  ;;  %v2316_v15 = vmul.f32 0.1, %v2304_v17  ;;  %v2290_v16 = vmul.f32 %v2945_v54, %v2278_v53  ;;  %v2305_v28 = vmul.f32 0.9, %v3871_v41  ;;  %v2447_v47 = vld [vmem:[%s4842_s3] sm:$0xff] }
0x10e3   :  { %v2315_v25 = vmul.f32 0.1, %v2303_v21  ;;  %v2287_v36 = vmul.f32 %v2945_v54, %v2275_v62  ;;  %vm2448_vm15 = vcmp.gt.f32.partialorder %v2447_v47, 0.0 }
0x10e4   :  { %v2335_v1 = vsel %vm97_vm0, %v2325_v22, 0.0  ;;  %v2322_v38 = vadd.f32 %v2316_v15, %v2310_v34  ;;  %v2302_v3 = vadd.f32 %v2946_v2, %v2290_v16  ;;  %v2964_v34 = vld [vmem:[%s4842_s3 + $0x8] sm:$0xff] }
0x10e5   :  { %2336 = vadd.xlane.f32.xlu0 %v2335_v1  ;;  %v2321_v11 = vadd.f32 %v2315_v25, %v2309_v37  ;;  %v2299_v43 = vadd.f32 %v2946_v2, %v2287_v36 }
0x10e6   :  { %v2328_v27 = vmul.f32 %v2322_v38, %v2322_v38  ;;  %v2314_v45 = vmul.f32 0.1, %v2302_v3 }
0x10e7   :  { %v2327_v46 = vmul.f32 %v2321_v11, %v2321_v11  ;;  %v2311_v52 = vmul.f32 0.1, %v2299_v43 }
0x10e8   :  { %v2344_v10 = vsel %vm97_vm0, %v2328_v27, 0.0  ;;  %v2320_v42 = vadd.f32 %v2314_v45, %v2308_v32 }
0x10e9   :  { %2345 = vadd.xlane.f32.xlu0 %v2344_v10  ;;  %v2341_v49 = vsel %vm97_vm0, %v2327_v46, 0.0  ;;  %v2317_v12 = vadd.f32 %v2311_v52, %v2305_v28 }
0x10ea   :  { %2342 = vadd.xlane.f32.xlu1 %v2341_v49  ;;  %v2326_v54 = vmul.f32 %v2320_v42, %v2320_v42 }
0x10eb   :  { %v2323_v55 = vmul.f32 %v2317_v12, %v2317_v12 }
0x10ec   :  { %v2338_v56 = vsel %vm97_vm0, %v2326_v54, 0.0 }
0x10ed   :  { %2339 = vadd.xlane.f32.xlu0 %v2338_v56  ;;  %v2329_v57 = vsel %vm97_vm0, %v2323_v55, 0.0 }
0x10ee   :  { %2330 = vadd.xlane.f32.xlu1 %v2329_v57 }
0x116a   :  { %v2334_v2 = vpop.xlane.xlu1 %2333 }
0x116b   :  { %v2348_v8 = vadd.f32 1e-12, %v2334_v2 }
0x116d   :  { %3806 = vrsqrt.f32 %v2348_v8 }
0x1172   :  { %v2337_v4 = vpop.xlane.xlu0 %2336 }
0x1173   :  { %v2349_v7 = vadd.f32 1e-12, %v2337_v4 }
0x1175   :  { %3808 = vrsqrt.f32 %v2349_v7 }
0x1176   :  { %v2346_v5 = vpop.xlane.xlu0 %2345 }
0x1177   :  { %v2352_v50 = vadd.f32 1e-12, %v2346_v5  ;;  %v2343_v51 = vpop.xlane.xlu1 %2342  ;;  %v3807_v29 = vpop.eup %3806 }
0x1178   :  { %v2351_v14 = vadd.f32 1e-12, %v2343_v51  ;;  %v2360_v60 = vmul.f32 %v3807_v29, %v4691_v59 }
0x1179   :  { %3810 = vrsqrt.f32 %v2352_v50 }
0x117a   :  { %3812 = vrsqrt.f32 %v2351_v14  ;;  %v2340_v61 = vpop.xlane.xlu0 %2339 }
0x117b   :  { %v2331_v19 = vpop.xlane.xlu1 %2330  ;;  %v2350_v35 = vadd.f32 1e-12, %v2340_v61 }
0x117c   :  { %v2347_v6 = vadd.f32 1e-12, %v2331_v19 }
0x117e   :  { %3814 = vrsqrt.f32 %v2347_v6 }
0x117f   :  { %v3809_v23 = vpop.eup %3808  ;;  %3816 = vrsqrt.f32 %v2350_v35 }
0x1180   :  { %v2361_v20 = vmul.f32 %v3809_v23, %v4702_v30 }
0x1182   :  { %v3541_v48 = vpack.c.bf16 %v2361_v20, %v2360_v60 }
0x1183   :  { %v3811_v33 = vpop.eup %3810 }
0x1184   :  { %v3813_v40 = vpop.eup %3812  ;;  %3543 = vmatpush3.bf16.xpose.msk.msra.mxu0 %vm3542_vm14, %v3541_v48  ;;  %v2364_v58 = vmul.f32 %v3811_v33, %v2322_v38 }
0x1185   :  { %3544 = vmatprep.subr.bf16.mxu0 %v3886_v44  ;;  %v2363_v39 = vmul.f32 %v3813_v40, %v2321_v11 }
0x1187   :  { %v3545_v31 = vpack.c.bf16 %v2364_v58, %v2363_v39 }
0x1188   :  { %v3815_v9 = vpop.eup %3814 }
0x1189   :  { %v2359_v63 = vmul.f32 %v3815_v9, %v2317_v12  ;;  %v3817_v59 = vpop.eup %3816 }
0x118a   :  { %v2362_v18 = vmul.f32 %v3817_v59, %v2320_v42 }
0x118b   :  { %3371 = vmatmul.mubr.msk.f32.vlgmr.msra.gmra.mrb[36].mxu0 %vm97_vm0, %v2359_v63 }
0x118c   :  { %3547 = vmatpush3.bf16.xpose.msk.msra.mxu0 %vm3542_vm14, %v3545_v31  ;;  %3377 = vmatprep.mubr.msk.f32.mxu0 %vm3887_vm13, %v3888_v13  ;;  %vm2837_vm13 = vcmask 1024  }
0x1193   :  { %3378 = vmatmul.mubr.msk.f32.vlgmr.msra.gmra.mrb[38].mxu0 %vm97_vm0, %v2362_v18  ;;  %vm2685_vm0 = vcmp.gt.f32.partialorder %v2964_v34, 0.0 }
0x125e   :  { %v2443_v30 = vpop.f32.mrb[36].mxu0 }
0x125f   :  { %v4736_v17 = vsel %vm2448_vm15, %v2443_v30, 0.0  ;;  %v3372_v0 = vpop.f32.mrb[37].mxu0 }
0x1260   :  { %v2951_v53 = vadd.f32 0.7, %v4736_v17  ;;  %v2950_v21 = vadd.f32 0.9, %v4736_v17  ;;  %v2952_v24 = vadd.f32 0.5, %v4736_v17  ;;  %v2957_v63 = vadd.f32 -0.5, %v4736_v17 }
0x1261   :  { %v2953_v37 = vadd.f32 0.3, %v4736_v17  ;;  %v2954_v62 = vadd.f32 0.1, %v4736_v17  ;;  %v2955_v22 = vadd.f32 -0.1, %v4736_v17 }
0x1262   :  { %v2460_v15 = vmul.f32 %v2951_v53, %v2951_v53  ;;  %v2451_v16 = vmul.f32 %v2950_v21, %v2950_v21  ;;  %v2469_v25 = vmul.f32 %v2952_v24, %v2952_v24  ;;  %v2956_v28 = vadd.f32 -0.3, %v4736_v17 }
0x1263   :  { %v2478_v36 = vmul.f32 %v2953_v37, %v2953_v37  ;;  %v2487_v1 = vmul.f32 %v2954_v62, %v2954_v62  ;;  %v2496_v41 = vmul.f32 %v2955_v22, %v2955_v22 }
0x1264   :  { %v2461_v38 = vsub.f32 0.0, %v2460_v15  ;;  %v2452_v3 = vsub.f32 0.0, %v2451_v16  ;;  %v2470_v26 = vsub.f32 0.0, %v2469_v25  ;;  %v2505_v56 = vmul.f32 %v2956_v28, %v2956_v28 }
0x1265   :  { %v2479_v32 = vsub.f32 0.0, %v2478_v36  ;;  %v2488_v10 = vsub.f32 0.0, %v2487_v1  ;;  %v2497_v54 = vsub.f32 0.0, %v2496_v41  ;;  %v2514_v16 = vmul.f32 %v2957_v63, %v2957_v63 }
0x1266   :  { %v2679_v11 = vpop.f32.mrb[38].mxu0  ;;  %v2462_v43 = vmul.f32 1.442695, %v2461_v38  ;;  %v2453_v27 = vmul.f32 1.442695, %v2452_v3  ;;  %v2506_v29 = vsub.f32 0.0, %v2505_v56 }
0x1267   :  { %v4748_v45 = vsel %vm2685_vm0, %v2679_v11, 0.0  ;;  %v3379_v46 = vpop.f32.mrb[39].mxu0  ;;  %v2471_v52 = vmul.f32 1.442695, %v2470_v26  ;;  %v2480_v42 = vmul.f32 1.442695, %v2479_v32 }
0x1268   :  { %3818 = vpow2.f32 %v2462_v43  ;;  %v2966_v49 = vadd.f32 0.7, %v4748_v45  ;;  %v2968_v12 = vadd.f32 0.3, %v4748_v45  ;;  %v2969_v55 = vadd.f32 0.1, %v4748_v45 }
0x1269   :  { %3820 = vpow2.f32 %v2453_v27  ;;  %v2970_v13 = vadd.f32 -0.1, %v4748_v45  ;;  %v2489_v2 = vmul.f32 1.442695, %v2488_v10  ;;  %v2971_v4 = vadd.f32 -0.3, %v4748_v45 }
0x126a   :  { %3822 = vpow2.f32 %v2471_v52  ;;  %v2697_v57 = vmul.f32 %v2966_v49, %v2966_v49  ;;  %v2715_v44 = vmul.f32 %v2968_v12, %v2968_v12  ;;  %v2724_v8 = vmul.f32 %v2969_v55, %v2969_v55 }
0x126b   :  { %v2965_v7 = vadd.f32 0.9, %v4748_v45  ;;  %3824 = vpow2.f32 %v2480_v42  ;;  %v2733_v51 = vmul.f32 %v2970_v13, %v2970_v13  ;;  %v2742_v61 = vmul.f32 %v2971_v4, %v2971_v4 }
0x126c   :  { %v2698_v5 = vsub.f32 0.0, %v2697_v57  ;;  %v2716_v50 = vsub.f32 0.0, %v2715_v44  ;;  %v2725_v14 = vsub.f32 0.0, %v2724_v8  ;;  %3826 = vpow2.f32 %v2489_v2 }
0x126d   :  { %v2498_v23 = vmul.f32 1.442695, %v2497_v54  ;;  %v2688_v60 = vmul.f32 %v2965_v7, %v2965_v7  ;;  %v2972_v20 = vadd.f32 -0.5, %v4748_v45  ;;  %v2734_v48 = vsub.f32 0.0, %v2733_v51 }
0x126e   :  { %v2699_v19 = vmul.f32 1.442695, %v2698_v5  ;;  %v2717_v6 = vmul.f32 1.442695, %v2716_v50  ;;  %v2726_v35 = vmul.f32 1.442695, %v2725_v14 }
0x126f   :  { %v2967_v33 = vadd.f32 0.5, %v4748_v45  ;;  %v2507_v58 = vmul.f32 1.442695, %v2506_v29  ;;  %v2743_v39 = vsub.f32 0.0, %v2742_v61  ;;  %v2973_v9 = vadd.f32 -0.7, %v4748_v45 }
0x1270   :  { %3828 = vpow2.f32 %v2699_v19  ;;  %v2689_v18 = vsub.f32 0.0, %v2688_v60  ;;  %v2751_v47 = vmul.f32 %v2972_v20, %v2972_v20  ;;  %v2735_v34 = vmul.f32 1.442695, %v2734_v48 }
0x1271   :  { %3830 = vpow2.f32 %v2717_v6  ;;  %v2706_v53 = vmul.f32 %v2967_v33, %v2967_v33  ;;  %v2744_v22 = vmul.f32 1.442695, %v2743_v39  ;;  %v2760_v15 = vmul.f32 %v2973_v9, %v2973_v9 }
0x1272   :  { %v3819_v40 = vpop.eup %3818  ;;  %3832 = vpow2.f32 %v2498_v23  ;;  %v2752_v25 = vsub.f32 0.0, %v2751_v47  ;;  %v2974_v36 = vadd.f32 -0.9, %v4748_v45  ;;  %v2690_v1 = vmul.f32 1.442695, %v2689_v18 }
0x1273   :  { %v3821_v31 = vpop.eup %3820  ;;  %v2464_v59 = vmul.f32 50.0, %v3819_v40  ;;  %3834 = vpow2.f32 %v2726_v35  ;;  %v2707_v38 = vsub.f32 0.0, %v2706_v53  ;;  %v2958_v3 = vadd.f32 -0.7, %v4736_v17 }
0x1274   :  { %v3823_v30 = vpop.eup %3822  ;;  %v2455_v0 = vmul.f32 50.0, %v3821_v31  ;;  %3836 = vpow2.f32 %v2507_v58  ;;  %v2761_v11 = vsub.f32 0.0, %v2760_v15  ;;  %v2515_v43 = vsub.f32 0.0, %v2514_v16 }
0x1275   :  { %v2465_v21 = vsel %vm1687_vm10, %v2464_v59, 0.0  ;;  %v2473_v24 = vmul.f32 50.0, %v3823_v30  ;;  %v3825_v37 = vpop.eup %3824  ;;  %3838 = vpow2.f32 %v2735_v34  ;;  %v2753_v52 = vmul.f32 1.442695, %v2752_v25 }
0x1276   :  { %2466 = vadd.xlane.f32.xlu1 %v2465_v21  ;;  %v2456_v62 = vsel %vm1687_vm10, %v2455_v0, 0.0  ;;  %v3827_v26 = vpop.eup %3826  ;;  %v2482_v41 = vmul.f32 50.0, %v3825_v37  ;;  %3840 = vpow2.f32 %v2744_v22  ;;  %v2769_v10 = vmul.f32 %v2974_v36, %v2974_v36 }
0x1277   :  { %2457 = vadd.xlane.f32.xlu0 %v2456_v62  ;;  %v2474_v32 = vsel %vm1687_vm10, %v2473_v24, 0.0  ;;  %v2975_v42 = vadd.f32 -1.0, %v4748_v45  ;;  %3842 = vpow2.f32 %v2690_v1  ;;  %v2708_v49 = vmul.f32 1.442695, %v2707_v38 }
0x1278   :  { %v2523_v12 = vmul.f32 %v2958_v3, %v2958_v3  ;;  %v2959_v54 = vadd.f32 -0.9, %v4736_v17  ;;  %v2483_v56 = vsel %vm1687_vm10, %v2482_v41, 0.0  ;;  %v2491_v44 = vmul.f32 50.0, %v3827_v26 }
0x1279   :  { %v2516_v8 = vmul.f32 1.442695, %v2515_v43  ;;  %3844 = vpow2.f32 %v2753_v52  ;;  %v2762_v4 = vmul.f32 1.442695, %v2761_v11  ;;  %v2770_v7 = vsub.f32 0.0, %v2769_v10 }
0x127a   :  { %v3829_v28 = vpop.eup %3828  ;;  %2475 = vadd.xlane.f32.xlu1 %v2474_v32  ;;  %v2778_v45 = vmul.f32 %v2975_v42, %v2975_v42  ;;  %3846 = vpow2.f32 %v2708_v49  ;;  %v2524_v5 = vsub.f32 0.0, %v2523_v12  ;;  %v2532_v50 = vmul.f32 %v2959_v54, %v2959_v54 }
0x127b   :  { %v3831_v27 = vpop.eup %3830  ;;  %v2701_v46 = vmul.f32 50.0, %v3829_v28  ;;  %v2960_v51 = vadd.f32 -1.0, %v4736_v17  ;;  %v2492_v19 = vsel %vm1687_vm10, %v2491_v44, 0.0  ;;  %3848 = vpow2.f32 %v2762_v4 }
0x127c   :  { %v3833_v55 = vpop.eup %3832  ;;  %v2719_v13 = vmul.f32 50.0, %v3831_v27  ;;  %v2771_v60 = vmul.f32 1.442695, %v2770_v7  ;;  %v2779_v20 = vsub.f32 0.0, %v2778_v45  ;;  %3850 = vpow2.f32 %v2516_v8 }
0x127d   :  { %v2702_v57 = vsel %vm1687_vm10, %v2701_v46, 0.0  ;;  %v3835_v2 = vpop.eup %3834  ;;  %v2500_v29 = vmul.f32 50.0, %v3833_v55  ;;  %v2525_v48 = vmul.f32 1.442695, %v2524_v5  ;;  %v2533_v33 = vsub.f32 0.0, %v2532_v50 }
0x127e   :  { %2484 = vadd.xlane.f32.xlu1 %v2483_v56  ;;  %2703 = vadd.xlane.f32.xlu0 %v2702_v57  ;;  %v3837_v14 = vpop.eup %3836  ;;  %v2720_v6 = vsel %vm1687_vm10, %v2719_v13, 0.0  ;;  %v2728_v61 = vmul.f32 50.0, %v3835_v2  ;;  %v2541_v40 = vmul.f32 %v2960_v51, %v2960_v51  ;;  %3852 = vpow2.f32 %v2771_v60 }
0x127f   :  { %v3839_v23 = vpop.eup %3838  ;;  %v2501_v17 = vsel %vm1687_vm10, %v2500_v29, 0.0  ;;  %v2509_v39 = vmul.f32 50.0, %v3837_v14  ;;  %v2780_v31 = vmul.f32 1.442695, %v2779_v20  ;;  %3854 = vpow2.f32 %v2525_v48 }
0x1280   :  { %v3841_v35 = vpop.eup %3840  ;;  %v2729_v58 = vsel %vm1687_vm10, %v2728_v61, 0.0  ;;  %v2737_v9 = vmul.f32 50.0, %v3839_v23  ;;  %v2534_v59 = vmul.f32 1.442695, %v2533_v33  ;;  %v2542_v18 = vsub.f32 0.0, %v2541_v40 }
0x1281   :  { %v3843_v63 = vpop.eup %3842  ;;  %v2510_v30 = vsel %vm1687_vm10, %v2509_v39, 0.0  ;;  %v2746_v34 = vmul.f32 50.0, %v3841_v35  ;;  %3856 = vpow2.f32 %v2780_v31 }
0x1282   :  { %2493 = vadd.xlane.f32.xlu1 %v2492_v19  ;;  %2721 = vadd.xlane.f32.xlu0 %v2720_v6  ;;  %v2738_v0 = vsel %vm1687_vm10, %v2737_v9, 0.0  ;;  %v2692_v53 = vmul.f32 50.0, %v3843_v63  ;;  %3858 = vpow2.f32 %v2534_v59  ;;  %v2543_v24 = vmul.f32 1.442695, %v2542_v18 }
0x1283   :  { %v3845_v47 = vpop.eup %3844  ;;  %v2747_v62 = vsel %vm1687_vm10, %v2746_v34, 0.0 }
0x1284   :  { %v3847_v21 = vpop.eup %3846  ;;  %v2693_v22 = vsel %vm1687_vm10, %v2692_v53, 0.0  ;;  %v2755_v15 = vmul.f32 50.0, %v3845_v47  ;;  %3860 = vpow2.f32 %v2543_v24 }
0x1285   :  { %v3849_v37 = vpop.eup %3848  ;;  %v2710_v16 = vmul.f32 50.0, %v3847_v21 }
0x1286   :  { %2502 = vadd.xlane.f32.xlu1 %v2501_v17  ;;  %2730 = vadd.xlane.f32.xlu0 %v2729_v58  ;;  %v3851_v25 = vpop.eup %3850  ;;  %v2756_v1 = vsel %vm1687_vm10, %v2755_v15, 0.0  ;;  %v2764_v3 = vmul.f32 50.0, %v3849_v37 }
0x1287   :  { %v2711_v38 = vsel %vm1687_vm10, %v2710_v16, 0.0  ;;  %v2518_v26 = vmul.f32 50.0, %v3851_v25 }
0x1288   :  { %v3853_v36 = vpop.eup %3852  ;;  %v2765_v28 = vsel %vm1687_vm10, %v2764_v3, 0.0 }
0x1289   :  { %v3855_v32 = vpop.eup %3854  ;;  %v2519_v11 = vsel %vm1687_vm10, %v2518_v26, 0.0  ;;  %v2773_v43 = vmul.f32 50.0, %v3853_v36 }
0x128a   :  { %2511 = vadd.xlane.f32.xlu1 %v2510_v30  ;;  %2739 = vadd.xlane.f32.xlu0 %v2738_v0  ;;  %v2527_v27 = vmul.f32 50.0, %v3855_v32 }
0x128b   :  { %v3857_v41 = vpop.eup %3856  ;;  %v2774_v52 = vsel %vm1687_vm10, %v2773_v43, 0.0 }
0x128c   :  { %v3859_v46 = vpop.eup %3858  ;;  %v2528_v10 = vsel %vm1687_vm10, %v2527_v27, 0.0  ;;  %v2782_v42 = vmul.f32 50.0, %v3857_v41 }
0x128d   :  { %v2536_v49 = vmul.f32 50.0, %v3859_v46 }
0x128e   :  { %2748 = vadd.xlane.f32.xlu0 %v2747_v62  ;;  %2694 = vadd.xlane.f32.xlu1 %v2693_v22  ;;  %v3861_v12 = vpop.eup %3860  ;;  %v2783_v54 = vsel %vm1687_vm10, %v2782_v42, 0.0 }
0x128f   :  { %v2537_v55 = vsel %vm1687_vm10, %v2536_v49, 0.0  ;;  %v2545_v56 = vmul.f32 50.0, %v3861_v12 }
0x1291   :  { %v2546_v57 = vsel %vm1687_vm10, %v2545_v56, 0.0  ;;  %vm2566_vm10 = vcmask 80896  }
0x1292   :  { %2757 = vadd.xlane.f32.xlu0 %v2756_v1  ;;  %2712 = vadd.xlane.f32.xlu1 %v2711_v38 }
0x1296   :  { %2766 = vadd.xlane.f32.xlu0 %v2765_v28  ;;  %2520 = vadd.xlane.f32.xlu1 %v2519_v11 }
0x129a   :  { %2775 = vadd.xlane.f32.xlu0 %v2774_v52  ;;  %2529 = vadd.xlane.f32.xlu1 %v2528_v10  ;;  %v2366_v10 = vld [vmem:[%s4843_s5] sm:$0x1] }
0x129e   :  { %2784 = vadd.xlane.f32.xlu0 %v2783_v54  ;;  %2538 = vadd.xlane.f32.xlu1 %v2537_v55 }
0x12a2   :  { %2547 = vadd.xlane.f32.xlu0 %v2546_v57 }
0x1303   :  { %v2467_v44 = vpop.xlane.xlu1 %2466 }
0x1304   :  { %v2458_v13 = vpop.xlane.xlu0 %2457 }
0x1305   :  { %v2550_v39 = vsel %vm2549_vm2, %v2458_v13, %v2467_v44 }
0x1307   :  { %v2476_v2 = vpop.xlane.xlu1 %2475 }
0x1308   :  { %v2552_v31 = vsel %vm2551_vm3, %v2550_v39, %v2476_v2  ;;  %v2367_v39 = vld [vmem:[%s4845_s6] sm:$0x1] }
0x130b   :  { %v2485_v8 = vpop.xlane.xlu1 %2484  ;;  %v2704_v4 = vpop.xlane.xlu0 %2703 }
0x130c   :  { %v2554_v18 = vsel %vm2553_vm4, %v2552_v31, %v2485_v8 }
0x130f   :  { %v2494_v7 = vpop.xlane.xlu1 %2493  ;;  %v2722_v45 = vpop.xlane.xlu0 %2721 }
0x1310   :  { %v2556_v47 = vsel %vm2555_vm5, %v2554_v18, %v2494_v7  ;;  %v2830_v18 = vlaneseq }
0x1313   :  { %v2503_v5 = vpop.xlane.xlu1 %2502  ;;  %v2731_v50 = vpop.xlane.xlu0 %2730 }
0x1314   :  { %v2558_v30 = vsel %vm2557_vm6, %v2556_v47, %v2503_v5 }
0x1317   :  { %v2512_v51 = vpop.xlane.xlu1 %2511  ;;  %v2740_v14 = vpop.xlane.xlu0 %2739 }
0x1318   :  { %v2560_v53 = vsel %vm2559_vm8, %v2558_v30, %v2512_v51  ;;  %v2831_v30 = vshrl.u32 %v2830_v18, 7 }
0x131b   :  { %v2695_v19 = vpop.xlane.xlu1 %2694  ;;  %v2749_v6 = vpop.xlane.xlu0 %2748 }
0x131c   :  { %v2786_v29 = vsel %vm2549_vm2, %v2695_v19, %v2704_v4 }
0x131f   :  { %v2713_v61 = vpop.xlane.xlu1 %2712  ;;  %v2758_v23 = vpop.xlane.xlu0 %2757 }
0x1320   :  { %v2787_v60 = vsel %vm2551_vm3, %v2786_v29, %v2713_v61 }
0x1321   :  { %v2788_v20 = vsel %vm2553_vm4, %v2787_v60, %v2722_v45 }
0x1322   :  { %v2789_v35 = vsel %vm2555_vm5, %v2788_v20, %v2731_v50 }
0x1323   :  { %v2790_v48 = vsel %vm2557_vm6, %v2789_v35, %v2740_v14  ;;  %v2521_v33 = vpop.xlane.xlu1 %2520  ;;  %v2767_v40 = vpop.xlane.xlu0 %2766 }
0x1324   :  { %v2791_v17 = vsel %vm2559_vm8, %v2790_v48, %v2749_v6  ;;  %v2562_v37 = vsel %vm2561_vm7, %v2560_v53, %v2521_v33 }
0x1325   :  { %v2792_v58 = vsel %vm2561_vm7, %v2791_v17, %v2758_v23  ;;  %v2365_v23 = vld [vmem:[%s4844_s4] sm:$0x1] }
0x1326   :  { %v2793_v59 = vsel %vm235_vm1, %v2792_v58, %v2767_v40 }
0x1327   :  { %v2530_v9 = vpop.xlane.xlu1 %2529  ;;  %v2776_v63 = vpop.xlane.xlu0 %2775 }
0x1328   :  { %v2794_v0 = vsel %vm2564_vm9, %v2793_v59, %v2776_v63  ;;  %v2563_v22 = vsel %vm235_vm1, %v2562_v37, %v2530_v9  ;;  %vm2589_vm1 = vcmask 81920  }
0x132b   :  { %v2785_v34 = vpop.xlane.xlu0 %2784  ;;  %v2539_v21 = vpop.xlane.xlu1 %2538 }
0x132c   :  { %v2795_v24 = vsel %vm2566_vm10, %v2794_v0, %v2785_v34  ;;  %v2565_v16 = vsel %vm2564_vm9, %v2563_v22, %v2539_v21  ;;  %v2832_v21 = vsub.s32 0, %v2831_v30 }
0x132d   :  { %3862 = vlog2.f32 %v2795_v24  ;;  %v2806_v62 = vsel %vm2572_vm11, %v2795_v24, 0.0 }
0x132e   :  { %v2807_v15 = vrot.slane %v2806_v62, 4 }
0x132f   :  { %v2548_v25 = vpop.xlane.xlu0 %2547 }
0x1330   :  { %v2808_v36 = vadd.f32 %v2807_v15, %v2806_v62  ;;  %v2567_v1 = vsel %vm2566_vm10, %v2565_v16, %v2548_v25 }
0x1331   :  { %3864 = vlog2.f32 %v2567_v1  ;;  %v2580_v38 = vsel %vm2572_vm11, %v2567_v1, 0.0 }
0x1332   :  { %v2809_v3 = vrot.slane %v2808_v36, 2  ;;  %v2581_v26 = vrot.slane %v2580_v38, 4 }
0x1334   :  { %v2810_v32 = vadd.f32 %v2809_v3, %v2808_v36  ;;  %v2582_v41 = vadd.f32 %v2581_v26, %v2580_v38 }
0x1336   :  { %v2811_v28 = vrot.slane %v2810_v32, 1  ;;  %v2583_v11 = vrot.slane %v2582_v41, 2 }
0x1337   :  { %v3863_v43 = vpop.eup %3862 }
0x1338   :  { %v2797_v27 = vmul.f32 0.6931472, %v3863_v43  ;;  %v2584_v46 = vadd.f32 %v2583_v11, %v2582_v41  ;;  %v2812_v52 = vadd.f32 %v2811_v28, %v2810_v32 }
0x133a   :  { %v2798_v42 = vmul.f32 1.442695, %v2797_v27  ;;  %v2585_v49 = vrot.slane %v2584_v46, 1  ;;  %v2813_v12 = vmul.f32 0.0625, %v2812_v52 }
0x133b   :  { %v3865_v54 = vpop.eup %3864 }
0x133c   :  { %v2799_v55 = vsel %vm2572_vm11, %v2798_v42, 0.0  ;;  %v2569_v56 = vmul.f32 0.6931472, %v3865_v54  ;;  %v2818_v57 = vmul.f32 %v2813_v12, %v2366_v10  ;;  %v2586_v44 = vadd.f32 %v2585_v49, %v2584_v46 }
0x133d   :  { %v2800_v13 = vrot.slane %v2799_v55, 4 }
0x133e   :  { %v2571_v2 = vmul.f32 1.442695, %v2569_v56  ;;  %v2819_v8 = vsel %vm2589_vm1, %v2818_v57, 0.0  ;;  %v2587_v4 = vmul.f32 0.0625, %v2586_v44 }
0x133f   :  { %v2801_v7 = vadd.f32 %v2800_v13, %v2799_v55  ;;  %2820 = vadd.xlane.f32.xlu1 %v2819_v8 }
0x1340   :  { %v2573_v45 = vsel %vm2572_vm11, %v2571_v2, 0.0  ;;  %v2593_v5 = vmul.f32 %v2587_v4, %v2366_v10 }
0x1341   :  { %v2574_v50 = vrot.slane %v2573_v45, 4  ;;  %v2802_v51 = vrot.slane %v2801_v7, 2 }
0x1342   :  { %v2594_v14 = vsel %vm2589_vm1, %v2593_v5, 0.0 }
0x1343   :  { %v2575_v19 = vadd.f32 %v2574_v50, %v2573_v45  ;;  %2595 = vadd.xlane.f32.xlu0 %v2594_v14  ;;  %v2803_v6 = vadd.f32 %v2802_v51, %v2801_v7 }
0x1345   :  { %v2804_v29 = vrot.slane %v2803_v6, 1  ;;  %v2576_v61 = vrot.slane %v2575_v19, 2 }
0x1347   :  { %v2805_v60 = vadd.f32 %v2804_v29, %v2803_v6  ;;  %v2577_v20 = vadd.f32 %v2576_v61, %v2575_v19 }
0x1349   :  { %v2814_v35 = vmul.f32 %v2805_v60, %v2365_v23  ;;  %v2578_v48 = vrot.slane %v2577_v20, 1 }
0x134b   :  { %v2815_v33 = vsel %vm2589_vm1, %v2814_v35, 0.0  ;;  %v2579_v40 = vadd.f32 %v2578_v48, %v2577_v20 }
0x134c   :  { %2816 = vadd.xlane.f32.xlu1 %v2815_v33 }
0x134d   :  { %v2588_v17 = vmul.f32 %v2579_v40, %v2365_v23 }
0x134f   :  { %v2590_v58 = vsel %vm2589_vm1, %v2588_v17, 0.0 }
0x1350   :  { %2591 = vadd.xlane.f32.xlu0 %v2590_v58 }
0x13cc   :  { %v2821_v9 = vpop.xlane.xlu1 %2820 }
0x13cd   :  { %v2823_v63 = vmul.f32 %v2821_v9, %v2367_v39 }
0x13cf   :  { %2825 = vrot.lane.b32.xlu1 %v2823_v63, %s3889_s12 }
0x13d0   :  { %v2596_v31 = vpop.xlane.xlu0 %2595 }
0x13d1   :  { %v2598_v59 = vmul.f32 %v2596_v31, %v2367_v39 }
0x13d3   :  { %2600 = vrot.lane.b32.xlu0 %v2598_v59, %s3889_s12 }
0x13d9   :  { %v2817_v47 = vpop.xlane.xlu1 %2816 }
0x13da   :  { %v2822_v0 = vmul.f32 %v2817_v47, %v2367_v39 }
0x13dd   :  { %v2592_v34 = vpop.xlane.xlu0 %2591 }
0x13de   :  { %v2597_v37 = vmul.f32 %v2592_v34, %v2367_v39 }
0x1441   :  { %v2826_v53 = vpop.permute.xlu1 %2825 }
0x1442   :  { %v2828_v24 = vadd.f32 %v2826_v53, %v2822_v0 }
0x1444   :  { %v2833_v22 = vrot.slane %v2828_v24, %v2832_v21 }
0x1445   :  { %v2601_v62 = vpop.permute.xlu0 %2600 }
0x1446   :  { %v2603_v15 = vadd.f32 %v2601_v62, %v2597_v37 }
0x1448   :  { %v2836_v16 = vsel %vm2835_vm12, %v2603_v15, %v2833_v22 }
0x1449   :  { %2838 = vst.msk [vmem:[%s4846_s19] sm:$0x3] %vm2837_vm13, %v2836_v16 }

</bundles_post_ra>
